<compile_context>
chip_gen: v5e
topology: v5e:2x2
jax: 0.10.0
libtpu: 0.0.40
codegen_flags: <defaults>
</compile_context>

<pallas_src>
import functools

import jax
import jax.numpy as jnp
from jax.experimental import pallas as pl
from jax.experimental.pallas import tpu as pltpu

NH = 56      # parameter spatial size (hardcoded in the module)
SZ = 224     # output spatial size  (hardcoded in the module)


def _interp_matrix(out_size, in_size):
    """Row-interpolation matrix (out_size, in_size) for bilinear upsampling,
    matching PyTorch F.upsample(..., mode='bilinear', align_corners=False)."""
    scale = in_size / out_size
    dst = jnp.arange(out_size, dtype=jnp.float32)
    src = jnp.maximum((dst + 0.5) * scale - 0.5, 0.0)
    x0 = jnp.floor(src).astype(jnp.int32)
    x0 = jnp.minimum(x0, in_size - 1)
    x1 = jnp.minimum(x0 + 1, in_size - 1)
    lam = src - x0.astype(jnp.float32)
    rows = jnp.arange(out_size)
    m = jnp.zeros((out_size, in_size), jnp.float32)
    m = m.at[rows, x0].add(1.0 - lam)
    m = m.at[rows, x1].add(lam)
    return m


def _gumbel_sigmoid_kernel(w_ref, a_ref, b_ref, u_ref, o_ref, *, neg_inv_T, eps):
    # ---- batch-invariant path: done ONCE per block of BN images -------------
    p_small = jax.nn.sigmoid(w_ref[...])                                    # (56, 56)
    up = jnp.dot(a_ref[...], p_small, preferred_element_type=jnp.float32)   # (224, 56)
    p = jnp.dot(up, b_ref[...], preferred_element_type=jnp.float32)         # (224, 224)
    # fused log-pair: log(p+eps) - log(1-p+eps) == log((p+eps)/(1-p+eps))
    logit_p = jnp.log((p + eps) / (1.0 - p + eps))                          # (224, 224)

    # ---- per-image logistic noise for the whole (BN, 224, 224) slab ---------
    u = u_ref[...]                                                          # (BN, 224, 224)
    noise = jnp.log((u + eps) / (1.0 - u + eps))

    # -(logit_p + noise) / T, with -1/T folded into a constant multiply
    o_ref[...] = (logit_p[None, :, :] + noise) * neg_inv_T


def gumbel_mask_forward(w, N, key, T=0.1, eps=1e-9, block_n=8):
    """w: (1, NH, NH) parameter.  Returns (N, 1, SZ, SZ) float32."""
    w2d = w.reshape(NH, NH).astype(jnp.float32)
    a = _interp_matrix(SZ, NH)             # (224, 56)  row interpolation
    b = a.T                                # (56, 224)  column interpolation

    bn = max(1, min(block_n, N))           # images per grid step
    n_blocks = pl.cdiv(N, bn)
    n_pad = n_blocks * bn                  # pad batch to a multiple of bn

    # Uniform [0, 1) noise, one draw per padded batch element.
    u = jax.random.uniform(key, (n_pad, SZ, SZ), dtype=jnp.float32)

    kernel = functools.partial(_gumbel_sigmoid_kernel,
                               neg_inv_T=-1.0 / T, eps=eps)

    out = pl.pallas_call(
        kernel,
        out_shape=jax.ShapeDtypeStruct((n_pad, SZ, SZ), jnp.float32),
        grid_spec=pl.GridSpec(
            grid=(n_blocks,),
            in_specs=[
                pl.BlockSpec((NH, NH), lambda g: (0, 0)),       # w (resident)
                pl.BlockSpec((SZ, NH), lambda g: (0, 0)),       # A (resident)
                pl.BlockSpec((NH, SZ), lambda g: (0, 0)),       # B (resident)
                pl.BlockSpec((bn, SZ, SZ), lambda g: (g, 0, 0)),  # noise block
            ],
            out_specs=pl.BlockSpec((bn, SZ, SZ), lambda g: (g, 0, 0)),
        ),
        compiler_params=pltpu.CompilerParams(
            dimension_semantics=("parallel",),   # no cross-iteration carry
        ),
    )(w2d, a, b, u)

    return out[:N].reshape(N, 1, SZ, SZ)


if __name__ == "__main__":
    # deterministic parameter init, exactly as the module: fill with -5
    w = jnp.full((1, NH, NH), -5.0, dtype=jnp.float32)

    N = 2  # small batch
    key = jax.random.PRNGKey(0)  # drives the uniform noise

    out = gumbel_mask_forward(w, N, key, T=0.1, eps=1e-9)
    out = jax.block_until_ready(out)

    assert out.shape == (N, 1, SZ, SZ), out.shape
    assert bool(jnp.all(jnp.isfinite(out)))
    print("KERNEL_OK")
</pallas_src>

<mosaic_0001>
module attributes {stable_mosaic.version = 11 : i64} {
  func.func @_gumbel_sigmoid_kernel(%arg0: i32, %arg1: memref<56x56xf32, #tpu.memory_space<vmem>>, %arg2: memref<224x56xf32, #tpu.memory_space<vmem>>, %arg3: memref<56x224xf32, #tpu.memory_space<vmem>>, %arg4: memref<2x224x224xf32, #tpu.memory_space<vmem>>, %arg5: memref<2x224x224xf32, #tpu.memory_space<vmem>>) attributes {dimension_semantics = [#tpu.dimension_semantics<parallel>], iteration_bounds = array<i64: 1>, scalar_prefetch = 0 : i64, scratch_operands = 0 : i64, tpu.core_type = #tpu.core_type<tc>, window_params = [{pipeline_mode = #tpu.pipeline_mode<synchronous>, transform_indices = @transform_0, window_bounds = array<i64: 56, 56>}, {pipeline_mode = #tpu.pipeline_mode<synchronous>, transform_indices = @transform_1, window_bounds = array<i64: 224, 56>}, {pipeline_mode = #tpu.pipeline_mode<synchronous>, transform_indices = @transform_2, window_bounds = array<i64: 56, 224>}, {transform_indices = @transform_3, window_bounds = array<i64: 2, 224, 224>}, {transform_indices = @transform_4, window_bounds = array<i64: 2, 224, 224>}]} {
    %c0 = arith.constant 0 : index
    %c0_0 = arith.constant 0 : index
    %0 = vector.load %arg1[%c0, %c0_0] : memref<56x56xf32, #tpu.memory_space<vmem>>, vector<56x56xf32>
    %1 = arith.negf %0 : vector<56x56xf32>
    %2 = math.exp %1 : vector<56x56xf32>
    %cst = arith.constant 1.000000e+00 : f32
    %3 = vector.broadcast %cst : f32 to vector<56x56xf32>
    %4 = arith.addf %3, %2 : vector<56x56xf32>
    %5 = arith.divf %3, %4 : vector<56x56xf32>
    %c0_1 = arith.constant 0 : index
    %c0_2 = arith.constant 0 : index
    %6 = vector.load %arg2[%c0_1, %c0_2] : memref<224x56xf32, #tpu.memory_space<vmem>>, vector<224x56xf32>
    %cst_3 = arith.constant dense<0.000000e+00> : vector<224x56xf32>
    %7 = tpu.matmul %6, %5, %cst_3 {dimension_numbers = #tpu.dot_dimension_numbers<[1], [0], [0], [1], [0, 0, 1, 1], [], []>} : vector<224x56xf32>, vector<56x56xf32>, vector<224x56xf32> -> vector<224x56xf32>
    %c0_4 = arith.constant 0 : index
    %c0_5 = arith.constant 0 : index
    %8 = vector.load %arg3[%c0_4, %c0_5] : memref<56x224xf32, #tpu.memory_space<vmem>>, vector<56x224xf32>
    %cst_6 = arith.constant dense<0.000000e+00> : vector<224x224xf32>
    %9 = tpu.matmul %7, %8, %cst_6 {dimension_numbers = #tpu.dot_dimension_numbers<[1], [0], [0], [1], [0, 0, 1, 1], [], []>} : vector<224x56xf32>, vector<56x224xf32>, vector<224x224xf32> -> vector<224x224xf32>
    %cst_7 = arith.constant 9.99999971E-10 : f32
    %10 = vector.broadcast %cst_7 : f32 to vector<224x224xf32>
    %11 = arith.addf %9, %10 : vector<224x224xf32>
    %cst_8 = arith.constant 1.000000e+00 : f32
    %12 = vector.broadcast %cst_8 : f32 to vector<224x224xf32>
    %13 = arith.subf %12, %9 : vector<224x224xf32>
    %cst_9 = arith.constant 9.99999971E-10 : f32
    %14 = vector.broadcast %cst_9 : f32 to vector<224x224xf32>
    %15 = arith.addf %13, %14 : vector<224x224xf32>
    %16 = arith.divf %11, %15 : vector<224x224xf32>
    %17 = math.log %16 : vector<224x224xf32>
    %c0_10 = arith.constant 0 : index
    %c0_11 = arith.constant 0 : index
    %c0_12 = arith.constant 0 : index
    %18 = vector.load %arg4[%c0_10, %c0_11, %c0_12] : memref<2x224x224xf32, #tpu.memory_space<vmem>>, vector<2x224x224xf32>
    %cst_13 = arith.constant 9.99999971E-10 : f32
    %19 = vector.broadcast %cst_13 : f32 to vector<2x224x224xf32>
    %20 = arith.addf %18, %19 : vector<2x224x224xf32>
    %cst_14 = arith.constant 1.000000e+00 : f32
    %21 = vector.broadcast %cst_14 : f32 to vector<2x224x224xf32>
    %22 = arith.subf %21, %18 : vector<2x224x224xf32>
    %cst_15 = arith.constant 9.99999971E-10 : f32
    %23 = vector.broadcast %cst_15 : f32 to vector<2x224x224xf32>
    %24 = arith.addf %22, %23 : vector<2x224x224xf32>
    %25 = arith.divf %20, %24 : vector<2x224x224xf32>
    %26 = math.log %25 : vector<2x224x224xf32>
    %27 = vector.shape_cast %17 : vector<224x224xf32> to vector<1x224x224xf32>
    %28 = vector.broadcast %27 : vector<1x224x224xf32> to vector<2x224x224xf32>
    %29 = arith.addf %28, %26 : vector<2x224x224xf32>
    %cst_16 = arith.constant -1.000000e+01 : f32
    %30 = vector.broadcast %cst_16 : f32 to vector<2x224x224xf32>
    %31 = arith.mulf %29, %30 : vector<2x224x224xf32>
    %c0_17 = arith.constant 0 : index
    %c0_18 = arith.constant 0 : index
    %c0_19 = arith.constant 0 : index
    %32 = vector.load %arg5[%c0_17, %c0_18, %c0_19] : memref<2x224x224xf32, #tpu.memory_space<vmem>>, vector<2x224x224xf32>
    tpu.vector_store %arg5[%c0_17, %c0_18, %c0_19], %31 {strides = array<i32>} : memref<2x224x224xf32, #tpu.memory_space<vmem>>, vector<2x224x224xf32>,
    return
  }
  func.func @transform_0(%arg0: i32) -> (i32, i32) {
    %c0_i32 = arith.constant 0 : i32
    %c0_i32_0 = arith.constant 0 : i32
    %c0_i32_1 = arith.constant 0 : i32
    return %c0_i32, %c0_i32_0 : i32, i32
  }
  func.func @transform_1(%arg0: i32) -> (i32, i32) {
    %c0_i32 = arith.constant 0 : i32
    %c0_i32_0 = arith.constant 0 : i32
    %c0_i32_1 = arith.constant 0 : i32
    return %c0_i32, %c0_i32_0 : i32, i32
  }
  func.func @transform_2(%arg0: i32) -> (i32, i32) {
    %c0_i32 = arith.constant 0 : i32
    %c0_i32_0 = arith.constant 0 : i32
    %c0_i32_1 = arith.constant 0 : i32
    return %c0_i32, %c0_i32_0 : i32, i32
  }
  func.func @transform_3(%arg0: i32) -> (i32, i32, i32) {
    %c0_i32 = arith.constant 0 : i32
    %c0_i32_0 = arith.constant 0 : i32
    %c0_i32_1 = arith.constant 0 : i32
    return %arg0, %c0_i32, %c0_i32_0 : i32, i32, i32
  }
  func.func @transform_4(%arg0: i32) -> (i32, i32, i32) {
    %c0_i32 = arith.constant 0 : i32
    %c0_i32_0 = arith.constant 0 : i32
    %c0_i32_1 = arith.constant 0 : i32
    return %arg0, %c0_i32, %c0_i32_0 : i32, i32, i32
  }
}

</mosaic_0001>

<bundles_post_ra>
// kernel: tpu_custom_call.1
= control target key start
LH: loop header
LB: loop body
LE: loop exit
PB: predicated region body
PF: predicated region fallthrough
CT: control target
= control target key end

     0   :  { %9 = vsyncpa [#allocation3], 0  ;;  %s9492_s0 = inlined_call_operand.vmem [shape: f32[56,56], index: 0, kind: input, shape index: {}]   ;;  %s9493_s1 = inlined_call_operand.vmem [shape: f32[224,56], index: 1, kind: input, shape index: {}]   ;;  %s9494_s2 = inlined_call_operand.vmem [shape: f32[56,224], index: 2, kind: input, shape index: {}]   ;;  %s9495_s3 = inlined_call_operand.hbm [shape: f32[2,224,224], index: 3, kind: input, shape index: {}]   ;;  %s9496_s4 = inlined_call_operand.hbm [shape: f32[2,224,224], index: 4, kind: output, shape index: {}]  }
   0x1   :  { %10 = vsyncpa [#allocation4], 0  ;;  %s21_s17 = sshll.u32 %s9495_s3, 4  ;;  %s5384_s18 = smov [#allocation2]   ;;  %s22_s17 = int_to_ptr.hbm [resolvable:$true] %s21_s17 }
   0x2   :  { %s23_s19 = sshll.u32 %s5384_s18, 4  ;;  %s5385_s20 = smov 256   ;;  %s24_s19 = int_to_ptr.vmem [resolvable:$true] %s23_s19 }
   0x3   :  { %s5386_s21 = smov 16  }
   0x4   :  { %29 = dma.hbm_to_vmem [thread:$0]  %s22_s17, 14336, %s24_s19, [#allocation3], %s5385_s20, %s5385_s20, %s5386_s21  }
   0x5   :  { %5380 = dma.done.wait [#allocation3], 14336  }
   0x6   :  { %5381 = vsyncadd [#allocation3], 4294952960  ;;  %v40_v0 = vld [vmem:[%s9492_s0 + $0x30] sm:$0xff]  ;;  %v39_v1 = vld [vmem:[%s9492_s0 + $0x28] sm:$0xff]  ;;  %s4503_s16 = sshll.u32 %s9496_s4, 4  ;;  %s4504_s16 = int_to_ptr.hbm [resolvable:$true] %s4503_s16 }
   0x7   :  { %v38_v2 = vld [vmem:[%s9492_s0 + $0x20] sm:$0xff]  ;;  %v4522_v3 = vmul.f32 -1.442695, %v40_v0  ;;  %v4521_v4 = vmul.f32 -1.442695, %v39_v1  ;;  %v37_v6 = vld [vmem:[%s9492_s0 + $0x18] sm:$0xff] }
   0x8   :  { %v4520_v5 = vmul.f32 -1.442695, %v38_v2  ;;  %v36_v7 = vld [vmem:[%s9492_s0 + $0x10] sm:$0xff]  ;;  %v35_v8 = vld [vmem:[%s9492_s0 + $0x8] sm:$0xff]  ;;  %v4519_v9 = vmul.f32 -1.442695, %v37_v6 }
   0x9   :  { %4632 = vpow2.f32 %v4522_v3  ;;  %v4518_v10 = vmul.f32 -1.442695, %v36_v7  ;;  %v4517_v11 = vmul.f32 -1.442695, %v35_v8  ;;  %v34_v12 = vld [vmem:[%s9492_s0] sm:$0xff]  ;;  %v196_v46 = vld [vmem:[%s9493_s1 + $0xb0] sm:$0xff] }
   0xa   :  { %4634 = vpow2.f32 %v4521_v4  ;;  %v4516_v18 = vmul.f32 -1.442695, %v34_v12  ;;  %v177_v49 = vld [vmem:[%s9493_s1 + $0x18] sm:$0xff]  ;;  %v401_v62 = vld [vmem:[%s9494_s2 + $0x68] sm:$0xff] }
   0xb   :  { %4636 = vpow2.f32 %v4520_v5  ;;  %v201_v56 = vld [vmem:[%s9493_s1 + $0xd8] sm:$0xff]  ;;  %596 = vmatpush.msra.mxu2 %v401_v62 }
   0xc   :  { %4638 = vpow2.f32 %v4519_v9 }
   0xd   :  { %4640 = vpow2.f32 %v4518_v10  ;;  %v388_v10 = vld [vmem:[%s9494_s2] sm:$0xff] }
   0xe   :  { %4642 = vpow2.f32 %v4517_v11 }
   0xf   :  { %v4633_v13 = vpop.eup %4632 }
  0x10   :  { %v4635_v14 = vpop.eup %4634  ;;  %v68_v15 = vadd.f32 1.0, %v4633_v13 }
  0x11   :  { %v4637_v16 = vpop.eup %4636  ;;  %v67_v17 = vadd.f32 1.0, %v4635_v14 }
  0x12   :  { %v4639_v19 = vpop.eup %4638  ;;  %4644 = vrcp.f32 %v68_v15  ;;  %v168_v21 = vand.u32 2147483647, %v68_v15  ;;  %v170_v23 = vand.u32 2147483648, %v68_v15  ;;  %v5440_v24 = vadd.f32 1.0, %v4637_v16 }
  0x13   :  { %v4641_v20 = vpop.eup %4640  ;;  %4646 = vrcp.f32 %v67_v17  ;;  %v5442_v25 = vadd.f32 1.0, %v4639_v19  ;;  %v153_v26 = vand.u32 2147483647, %v67_v17  ;;  %v155_v27 = vand.u32 2147483648, %v67_v17 }
  0x14   :  { %v4643_v22 = vpop.eup %4642  ;;  %v5444_v28 = vadd.f32 1.0, %v4641_v20  ;;  %4648 = vpow2.f32 %v4516_v18  ;;  %vm164_vm0 = vweird.f32 %v68_v15  ;;  %vm149_vm1 = vweird.f32 %v67_v17 }
  0x15   :  { %4650 = vrcp.f32 %v5440_v24  ;;  %v140_v29 = vand.u32 2147483648, %v5440_v24  ;;  %vm5448_vm2 = vcmp.eq.f32.partialorder %v168_v21, 8.507059e+37  ;;  %v138_v31 = vand.u32 2147483647, %v5440_v24 }
  0x16   :  { %4652 = vrcp.f32 %v5442_v25  ;;  %v5454_v32 = vadd.f32 1.0, %v4643_v22  ;;  %v171_v34 = vor.u32 1.1754944e-38, %v170_v23  ;;  %v123_v35 = vand.u32 2147483647, %v5442_v25 }
  0x17   :  { %v125_v36 = vand.u32 2147483648, %v5442_v25  ;;  %4654 = vrcp.f32 %v5444_v28  ;;  %vm5459_vm3 = vcmp.eq.f32.partialorder %v153_v26, 8.507059e+37  ;;  %v156_v40 = vor.u32 1.1754944e-38, %v155_v27 }
  0x18   :  { %v4645_v33 = vpop.eup %4644  ;;  %vm134_vm4 = vweird.f32 %v5440_v24  ;;  %v141_v42 = vor.u32 1.1754944e-38, %v140_v29  ;;  %vm119_vm5 = vweird.f32 %v5442_v25  ;;  %v110_v43 = vand.u32 2147483648, %v5444_v28 }
  0x19   :  { %v4647_v37 = vpop.eup %4646  ;;  %v160_v38 = vmul.f32 %v4645_v33, %v68_v15  ;;  %vm165_vm6 = vweird.f32 %v4645_v33  ;;  %vm5466_vm7 = vcmp.eq.f32.partialorder %v138_v31, 8.507059e+37  ;;  %vm104_vm8 = vweird.f32 %v5444_v28  ;;  %v189_v15 = vld [vmem:[%s9493_s1 + $0x78] sm:$0xff] }
  0x1a   :  { %v145_v41 = vmul.f32 %v4647_v37, %v67_v17  ;;  %v4649_v44 = vpop.eup %4648  ;;  %4656 = vrcp.f32 %v5454_v32  ;;  %vm150_vm9 = vweird.f32 %v4647_v37  ;;  %vm5472_vm10 = vcmp.eq.f32.partialorder %v123_v35, 8.507059e+37  ;;  %vm5481_vm12 = vmor %vm164_vm0, %vm165_vm6 }
  0x1b   :  { %v161_v45 = vsub.f32 1.0, %v160_v38  ;;  %v4651_v47 = vpop.eup %4650  ;;  %v126_v50 = vor.u32 1.1754944e-38, %v125_v36  ;;  %v108_v54 = vand.u32 2147483647, %v5444_v28  ;;  %vm89_vm11 = vweird.f32 %v5454_v32  ;;  %vm5489_vm13 = vmor %vm149_vm1, %vm150_vm9 }
  0x1c   :  { %v146_v48 = vsub.f32 1.0, %v145_v41  ;;  %v4653_v51 = vpop.eup %4652  ;;  %v130_v53 = vmul.f32 %v4651_v47, %v5440_v24  ;;  %v111_v59 = vor.u32 1.1754944e-38, %v110_v43  ;;  %v93_v60 = vand.u32 2147483647, %v5454_v32  ;;  %v195_v43 = vld [vmem:[%s9493_s1 + $0xa8] sm:$0xff] }
  0x1d   :  { %v162_v52 = vmul.f32 %v4645_v33, %v161_v45  ;;  %v4655_v55 = vpop.eup %4654  ;;  %v115_v58 = vmul.f32 %v4653_v51, %v5442_v25  ;;  %vm135_vm14 = vweird.f32 %v4651_v47  ;;  %vm120_vm15 = vweird.f32 %v4653_v51  ;;  %v175_v45 = vld [vmem:[%s9493_s1 + $0x8] sm:$0xff] }
  0x1e   :  { %v147_v57 = vmul.f32 %v4647_v37, %v146_v48  ;;  %v131_v63 = vsub.f32 1.0, %v130_v53  ;;  %v100_v0 = vmul.f32 %v4655_v55, %v5444_v28  ;;  %v62_v3 = vadd.f32 1.0, %v4649_v44  ;;  %vm5502_vm1 = vmor %vm134_vm4, %vm135_vm14  ;;  %v197_v48 = vld [vmem:[%s9493_s1 + $0xb8] sm:$0xff]  ;;  %v179_v53 = vld [vmem:[%s9493_s1 + $0x28] sm:$0xff] }
  0x1f   :  { %v163_v61 = vadd.f32 %v4645_v33, %v162_v52  ;;  %v116_v2 = vsub.f32 1.0, %v115_v58  ;;  %vm105_vm0 = vweird.f32 %v4655_v55  ;;  %v95_v17 = vand.u32 2147483648, %v5454_v32  ;;  %v199_v52 = vld [vmem:[%s9493_s1 + $0xc8] sm:$0xff]  ;;  %v182_v58 = vld [vmem:[%s9493_s1 + $0x40] sm:$0xff] }
  0x20   :  { %v148_v1 = vadd.f32 %v4647_v37, %v147_v57  ;;  %v4657_v4 = vpop.eup %4656  ;;  %v132_v6 = vmul.f32 %v4651_v47, %v131_v63  ;;  %v101_v7 = vsub.f32 1.0, %v100_v0  ;;  %vm5519_vm4 = vmor %vm104_vm8, %vm105_vm0  ;;  %4658 = vrcp.f32 %v62_v3  ;;  %v181_v57 = vld [vmem:[%s9493_s1 + $0x38] sm:$0xff]  ;;  %v398_v63 = vld [vmem:[%s9494_s2 + $0x50] sm:$0xff] }
  0x21   :  { %v167_v5 = vsel %vm5481_vm12, %v4645_v33, %v163_v61  ;;  %v117_v11 = vmul.f32 %v4653_v51, %v116_v2  ;;  %v85_v12 = vmul.f32 %v4657_v4, %v5454_v32  ;;  %v96_v28 = vor.u32 1.1754944e-38, %v95_v17  ;;  %v400_v61 = vld [vmem:[%s9494_s2 + $0x60] sm:$0xff]  ;;  %v399_v0 = vld [vmem:[%s9494_s2 + $0x58] sm:$0xff]  ;;  %v397_v2 = vld [vmem:[%s9494_s2 + $0x48] sm:$0xff] }
  0x22   :  { %v172_v8 = vsel %vm5448_vm2, %v171_v34, %v167_v5  ;;  %v152_v9 = vsel %vm5489_vm13, %v4647_v37, %v148_v1  ;;  %v133_v14 = vadd.f32 %v4651_v47, %v132_v6  ;;  %vm5512_vm2 = vmor %vm119_vm5, %vm120_vm15  ;;  %v102_v16 = vmul.f32 %v4655_v55, %v101_v7  ;;  %495 = vmatpush.msra.mxu1 %v400_v61  ;;  %v396_v1 = vld [vmem:[%s9494_s2 + $0x40] sm:$0xff]  ;;  %v185_v5 = vld [vmem:[%s9493_s1 + $0x58] sm:$0xff] }
  0x23   :  { %296 = vmatpush.msra.mxu0 %v172_v8  ;;  %4607 = vmatpush.msra.mxu3 %v172_v8  ;;  %v157_v13 = vsel %vm5459_vm3, %v156_v40, %v152_v9  ;;  %v118_v18 = vadd.f32 %v4653_v51, %v117_v11  ;;  %v86_v20 = vsub.f32 1.0, %v85_v12  ;;  %vm90_vm3 = vweird.f32 %v4657_v4  ;;  %v392_v6 = vld [vmem:[%s9494_s2 + $0x20] sm:$0xff]  ;;  %v393_v7 = vld [vmem:[%s9494_s2 + $0x28] sm:$0xff]  ;;  %v390_v8 = vld [vmem:[%s9494_s2 + $0x10] sm:$0xff] }
  0x24   :  { %v137_v21 = vsel %vm5502_vm1, %v4651_v47, %v133_v14  ;;  %v103_v22 = vadd.f32 %v4655_v55, %v102_v16  ;;  %vm109_vm5 = vcmp.eq.f32.partialorder %v108_v54, 8.507059e+37  ;;  %vm91_vm6 = vmor %vm89_vm11, %vm90_vm3  ;;  %vm94_vm8 = vcmp.eq.f32.partialorder %v93_v60, 8.507059e+37  ;;  %v176_v47 = vld [vmem:[%s9493_s1 + $0x10] sm:$0xff]  ;;  %496 = vmatpush.msra.mxu1 %v398_v63  ;;  %597 = vmatpush.msra.mxu2 %v399_v0  ;;  %v391_v9 = vld [vmem:[%s9494_s2 + $0x18] sm:$0xff] }
  0x25   :  { %297 = vmatpush.msra.mxu0 %v157_v13  ;;  %4608 = vmatpush.msra.mxu3 %v157_v13  ;;  %v142_v23 = vsel %vm5466_vm7, %v141_v42, %v137_v21  ;;  %v122_v24 = vsel %vm5512_vm2, %v4653_v51, %v118_v18  ;;  %v87_v25 = vmul.f32 %v4657_v4, %v86_v20  ;;  %v80_v36 = vand.u32 2147483648, %v62_v3  ;;  %v174_v42 = vld [vmem:[%s9493_s1] sm:$0xff]  ;;  %v200_v54 = vld [vmem:[%s9493_s1 + $0xd0] sm:$0xff]  ;;  %v389_v11 = vld [vmem:[%s9494_s2 + $0x8] sm:$0xff] }
  0x26   :  { %v127_v26 = vsel %vm5472_vm10, %v126_v50, %v122_v24  ;;  %v107_v27 = vsel %vm5519_vm4, %v4655_v55, %v103_v22  ;;  %v4659_v31 = vpop.eup %4658  ;;  %vm74_vm7 = vweird.f32 %v62_v3  ;;  %v78_v32 = vand.u32 2147483647, %v62_v3  ;;  %v198_v50 = vld [vmem:[%s9493_s1 + $0xc0] sm:$0xff]  ;;  %v180_v55 = vld [vmem:[%s9493_s1 + $0x30] sm:$0xff]  ;;  %497 = vmatpush.msra.mxu1 %v396_v1  ;;  %598 = vmatpush.msra.mxu2 %v397_v2  ;;  %v187_v13 = vld [vmem:[%s9493_s1 + $0x68] sm:$0xff] }
  0x27   :  { %298 = vmatpush.msra.mxu0 %v142_v23  ;;  %4609 = vmatpush.msra.mxu3 %v142_v23  ;;  %v112_v29 = vsel %vm109_vm5, %v111_v59, %v107_v27  ;;  %v88_v30 = vadd.f32 %v4657_v4, %v87_v25  ;;  %v70_v35 = vmul.f32 %v4659_v31, %v62_v3  ;;  %vm75_vm9 = vweird.f32 %v4659_v31  ;;  %v178_v51 = vld [vmem:[%s9493_s1 + $0x20] sm:$0xff]  ;;  %v183_v59 = vld [vmem:[%s9493_s1 + $0x48] sm:$0xff]  ;;  %v184_v60 = vld [vmem:[%s9493_s1 + $0x50] sm:$0xff] }
  0x28   :  { %vm76_vm10 = vmor %vm74_vm7, %vm75_vm9  ;;  %v81_v39 = vor.u32 1.1754944e-38, %v80_v36  ;;  %vm79_vm11 = vcmp.eq.f32.partialorder %v78_v32, 8.507059e+37  ;;  %vm202_vm12 = vcmask 457728   ;;  %v394_v3 = vld [vmem:[%s9494_s2 + $0x30] sm:$0xff]  ;;  %v186_v12 = vld [vmem:[%s9493_s1 + $0x60] sm:$0xff] }
  0x29   :  { %299 = vmatpush.msra.mxu0 %v127_v26  ;;  %4610 = vmatpush.msra.mxu3 %v127_v26  ;;  %v92_v33 = vsel %vm91_vm6, %v4657_v4, %v88_v30  ;;  %v71_v37 = vsub.f32 1.0, %v70_v35  ;;  %v395_v4 = vld [vmem:[%s9494_s2 + $0x38] sm:$0xff]  ;;  %v188_v14 = vld [vmem:[%s9493_s1 + $0x70] sm:$0xff]  ;;  %v190_v17 = vld [vmem:[%s9493_s1 + $0x80] sm:$0xff] }
  0x2a   :  { %v97_v34 = vsel %vm94_vm8, %v96_v28, %v92_v33  ;;  %498 = vmatpush.msra.mxu1 %v394_v3  ;;  %599 = vmatpush.msra.mxu2 %v395_v4  ;;  %v191_v20 = vld [vmem:[%s9493_s1 + $0x88] sm:$0xff]  ;;  %v192_v23 = vld [vmem:[%s9493_s1 + $0x90] sm:$0xff]  ;;  %v193_v26 = vld [vmem:[%s9493_s1 + $0x98] sm:$0xff] }
  0x2b   :  { %300 = vmatpush.msra.mxu0 %v112_v29  ;;  %4611 = vmatpush.msra.mxu3 %v112_v29  ;;  %v72_v38 = vmul.f32 %v4659_v31, %v71_v37  ;;  %v194_v29 = vld [vmem:[%s9493_s1 + $0xa0] sm:$0xff]  ;;  %s5387_s1 = smov [#allocation5]  }
  0x2c   :  { %499 = vmatpush.msra.mxu1 %v392_v6  ;;  %600 = vmatpush.msra.mxu2 %v393_v7  ;;  %s4501_s13 = sshll.u32 %s5387_s1, 4  ;;  %s4502_s13 = int_to_ptr.vmem [resolvable:$true] %s4501_s13 }
  0x2d   :  { %301 = vmatpush.msra.mxu0 %v97_v34  ;;  %4612 = vmatpush.msra.mxu3 %v97_v34  ;;  %v73_v40 = vadd.f32 %v4659_v31, %v72_v38 }
  0x2e   :  { %500 = vmatpush.msra.mxu1 %v390_v8  ;;  %601 = vmatpush.msra.mxu2 %v391_v9 }
  0x2f   :  { %v77_v41 = vsel %vm76_vm10, %v4659_v31, %v73_v40  ;;  %v1808_v40 = vld [vmem:[#allocation2] sm:$0xff] }
  0x30   :  { %v82_v44 = vsel %vm79_vm11, %v81_v39, %v77_v41  ;;  %501 = vmatpush.msra.mxu1 %v388_v10  ;;  %602 = vmatpush.msra.mxu2 %v389_v11  ;;  %v5724_v41 = vld [vmem:[#allocation2 + $0x1c0] sm:$0xff] }
  0x31   :  { %302 = vmatpush.msra.mxu0 %v82_v44  ;;  %4613 = vmatpush.msra.mxu3 %v82_v44 }
  0x32   :  { %4523 = vmatmul.msk.f32.vlgmr.msra.gmra.mxu0 %vm202_vm12, %v174_v42  ;;  %4544 = vmatmul.msk.f32.vlgmr.msra.gmra.mxu3 %vm202_vm12, %v195_v43  ;;  %v2032_v42 = vsub.f32 1.0, %v1808_v40  ;;  %v2088_v43 = vsub.f32 1.0, %v5724_v41 }
  0x33   :  { %4614 = vmatpush.msrb.mxu3 %v400_v61 }
  0x35   :  { %4615 = vmatpush.msrb.mxu3 %v398_v63 }
  0x37   :  { %4616 = vmatpush.msrb.mxu3 %v396_v1 }
  0x39   :  { %4617 = vmatpush.msrb.mxu3 %v394_v3 }
  0x3a   :  { %4524 = vmatmul.msk.f32.gmra.mxu0 %vm202_vm12, %v175_v45  ;;  %4545 = vmatmul.msk.f32.gmra.mxu3 %vm202_vm12, %v196_v46  ;;  %v2144_v45 = vadd.f32 1e-09, %v2032_v42  ;;  %v2200_v46 = vadd.f32 1e-09, %v2088_v43 }
  0x3b   :  { %4618 = vmatpush.msrb.mxu3 %v392_v6 }
  0x3c   :  { %4660 = vrcp.f32 %v2144_v45  ;;  %v2267_v3 = vand.u32 2147483648, %v2144_v45  ;;  %vm2261_vm13 = vweird.f32 %v2144_v45  ;;  %vm3101_vm0 = vweird.f32 %v2200_v46 }
  0x3d   :  { %4619 = vmatpush.msrb.mxu3 %v390_v8  ;;  %4662 = vrcp.f32 %v2200_v46 }
  0x3f   :  { %4620 = vmatpush.msrb.mxu3 %v388_v10 }
  0x41   :  { %4621 = vmatpush.msra.mxu3 %v401_v62 }
  0x42   :  { %4525 = vmatmul.msk.f32.gmra.mxu0 %vm202_vm12, %v176_v47  ;;  %4546 = vmatmul.msk.f32.gmra.mxu3 %vm202_vm12, %v197_v48  ;;  %v5730_v47 = vld [vmem:[#allocation2 + $0x8] sm:$0xff] }
  0x43   :  { %4622 = vmatpush.msra.mxu3 %v399_v0  ;;  %v5732_v48 = vld [vmem:[#allocation2 + $0x1c8] sm:$0xff] }
  0x45   :  { %4623 = vmatpush.msra.mxu3 %v397_v2 }
  0x47   :  { %4624 = vmatpush.msra.mxu3 %v395_v4 }
  0x49   :  { %4625 = vmatpush.msra.mxu3 %v393_v7 }
  0x4a   :  { %4526 = vmatmul.msk.f32.gmra.mxu0 %vm202_vm12, %v177_v49  ;;  %4547 = vmatmul.msk.f32.gmra.mxu3 %vm202_vm12, %v198_v50  ;;  %v2033_v49 = vsub.f32 1.0, %v5730_v47  ;;  %v2089_v50 = vsub.f32 1.0, %v5732_v48 }
  0x4b   :  { %4626 = vmatpush.msra.mxu3 %v391_v9  ;;  %v2265_v9 = vand.u32 2147483647, %v2144_v45 }
  0x4d   :  { %4627 = vmatpush.msra.mxu3 %v389_v11  ;;  %v2268_v11 = vor.u32 1.1754944e-38, %v2267_v3  ;;  %vm2266_vm2 = vcmp.eq.f32.partialorder %v2265_v9, 8.507059e+37 }
  0x52   :  { %4527 = vmatmul.msk.f32.gmra.mxu0 %vm202_vm12, %v178_v51  ;;  %4548 = vmatmul.msk.f32.gmra.mxu3 %vm202_vm12, %v199_v52  ;;  %v5737_v52 = vadd.f32 1e-09, %v2033_v49 }
  0x54   :  { %4664 = vrcp.f32 %v5737_v52  ;;  %vm2276_vm5 = vweird.f32 %v5737_v52 }
  0x5a   :  { %4528 = vmatmul.msk.f32.gmra.mxu0 %vm202_vm12, %v179_v53  ;;  %4549 = vmatmul.msk.f32.gmra.mxu3 %vm202_vm12, %v200_v54  ;;  %v5739_v53 = vadd.f32 1e-09, %v2089_v50  ;;  %v5741_v54 = vld [vmem:[#allocation2 + $0x10] sm:$0xff] }
  0x5c   :  { %4666 = vrcp.f32 %v5739_v53  ;;  %vm3116_vm8 = vweird.f32 %v5739_v53 }
  0x62   :  { %4529 = vmatmul.msk.f32.gmra.mxu0 %vm202_vm12, %v180_v55  ;;  %4550 = vmatmul.msk.f32.gmra.mxu3 %vm202_vm12, %v201_v56  ;;  %v5743_v55 = vld [vmem:[#allocation2 + $0x1d0] sm:$0xff]  ;;  %v4661_v56 = vpop.eup %4660 }
  0x63   :  { %vm2262_vm14 = vweird.f32 %v4661_v56 }
  0x64   :  { %vm2263_vm15 = vmor %vm2261_vm13, %vm2262_vm14 }
  0x6a   :  { %4530 = vmatmul.msk.f32.gmra.mxu0 %vm202_vm12, %v181_v57  ;;  %v2034_v57 = vsub.f32 1.0, %v5741_v54 }
  0x6c   :  { %v5751_v62 = vadd.f32 1e-09, %v2034_v57 }
  0x6e   :  { %4668 = vrcp.f32 %v5751_v62  ;;  %vm2291_vm14 = vweird.f32 %v5751_v62 }
  0x72   :  { %4531 = vmatmul.msk.f32.gmra.mxu0 %vm202_vm12, %v182_v58  ;;  %v2090_v58 = vsub.f32 1.0, %v5743_v55 }
  0x74   :  { %v5753_v63 = vadd.f32 1e-09, %v2090_v58 }
  0x76   :  { %4670 = vrcp.f32 %v5753_v63  ;;  %v3135_v9 = vand.u32 2147483647, %v5753_v63 }
  0x7a   :  { %4532 = vmatmul.msk.f32.gmra.mxu0 %vm202_vm12, %v183_v59  ;;  %v4663_v59 = vpop.eup %4662 }
  0x7b   :  { %v3097_v61 = vmul.f32 %v4663_v59, %v2200_v46  ;;  %v4665_v6 = vpop.eup %4664  ;;  %vm3102_vm1 = vweird.f32 %v4663_v59 }
  0x7c   :  { %v5758_v10 = vpop.eup %4666  ;;  %vm5762_vm4 = vmor %vm3101_vm0, %vm3102_vm1  ;;  %vm2277_vm6 = vweird.f32 %v4665_v6  ;;  %vm3131_vm1 = vweird.f32 %v5753_v63 }
  0x7d   :  { %v3098_v1 = vsub.f32 1.0, %v3097_v61  ;;  %vm5785_vm7 = vmor %vm2276_vm5, %vm2277_vm6  ;;  %vm3117_vm10 = vweird.f32 %v5758_v10  ;;  %vm5853_vm5 = vcmp.eq.f32.partialorder %v3135_v9, 8.507059e+37 }
  0x7e   :  { %vm5798_vm11 = vmor %vm3116_vm8, %vm3117_vm10 }
  0x7f   :  { %v3099_v4 = vmul.f32 %v4663_v59, %v3098_v1 }
  0x82   :  { %4533 = vmatmul.msk.f32.gmra.mxu0 %vm202_vm12, %v184_v60  ;;  %v2257_v60 = vmul.f32 %v4661_v56, %v2144_v45 }
  0x84   :  { %v2258_v0 = vsub.f32 1.0, %v2257_v60  ;;  %v2297_v60 = vand.u32 2147483648, %v5751_v62 }
  0x86   :  { %v2259_v2 = vmul.f32 %v4661_v56, %v2258_v0 }
  0x88   :  { %v2260_v8 = vadd.f32 %v4661_v56, %v2259_v2 }
  0x8a   :  { %4534 = vmatmul.msk.f32.gmra.mxu0 %vm202_vm12, %v185_v5  ;;  %v3107_v5 = vand.u32 2147483648, %v2200_v46 }
  0x92   :  { %4535 = vmatmul.msk.f32.gmra.mxu0 %vm202_vm12, %v186_v12  ;;  %v3100_v12 = vadd.f32 %v4663_v59, %v3099_v4 }
  0x9a   :  { %4536 = vmatmul.msk.f32.gmra.mxu0 %vm202_vm12, %v187_v13  ;;  %v1920_v13 = vadd.f32 1e-09, %v1808_v40 }
  0xa2   :  { %4537 = vmatmul.msk.f32.gmra.mxu0 %vm202_vm12, %v188_v14  ;;  %v2264_v14 = vsel %vm2263_vm15, %v4661_v56, %v2260_v8 }
  0xaa   :  { %4538 = vmatmul.msk.f32.gmra.mxu0 %vm202_vm12, %v189_v15 }
  0xaf   :  { %v304_v16 = vpop.f32.mrf.mxu0 }
  0xb0   :  { %4551 = vmatmul.msk.f32.vlgmr.msra.gmra.mxu1 %vm202_vm12, %v304_v16  ;;  %4579 = vmatmul.msk.f32.vlgmr.msra.gmra.mxu2 %vm202_vm12, %v304_v16  ;;  %v2269_v16 = vsel %vm2266_vm2, %v2268_v11, %v2264_v14 }
  0xb2   :  { %4539 = vmatmul.msk.f32.gmra.mxu0 %vm202_vm12, %v190_v17  ;;  %v3105_v17 = vand.u32 2147483647, %v2200_v46  ;;  %v1977_v46 = vadd.f32 1e-09, %v5732_v48 }
  0xb4   :  { %vm3106_vm3 = vcmp.eq.f32.partialorder %v3105_v17, 8.507059e+37 }
  0xb5   :  { %v367_v18 = vpop.f32.mrf.mxu3 }
  0xb6   :  { %4572 = vmatmul.msk.f32.vlgmr.msrb.gmra.mxu3 %vm202_vm12, %v367_v18 }
  0xb7   :  { %v307_v19 = vpop.f32.mrf.mxu0 }
  0xb8   :  { %4552 = vmatmul.msk.f32.gmra.mxu1 %vm202_vm12, %v307_v19  ;;  %4580 = vmatmul.msk.f32.gmra.mxu2 %vm202_vm12, %v307_v19  ;;  %v3108_v19 = vor.u32 1.1754944e-38, %v3107_v5 }
  0xba   :  { %4540 = vmatmul.msk.f32.gmra.mxu0 %vm202_vm12, %v191_v20  ;;  %v2272_v20 = vmul.f32 %v4665_v6, %v5737_v52 }
  0xbd   :  { %v370_v21 = vpop.f32.mrf.mxu3 }
  0xbe   :  { %4573 = vmatmul.msk.f32.gmra.mxu3 %vm202_vm12, %v370_v21 }
  0xbf   :  { %v310_v22 = vpop.f32.mrf.mxu0 }
  0xc0   :  { %4553 = vmatmul.msk.f32.gmra.mxu1 %vm202_vm12, %v310_v22  ;;  %4581 = vmatmul.msk.f32.gmra.mxu2 %vm202_vm12, %v310_v22 }
  0xc2   :  { %4541 = vmatmul.msk.f32.gmra.mxu0 %vm202_vm12, %v192_v23  ;;  %v3104_v23 = vsel %vm5762_vm4, %v4663_v59, %v3100_v12  ;;  %v2295_v59 = vand.u32 2147483647, %v5751_v62  ;;  %v1922_v12 = vadd.f32 1e-09, %v5741_v54 }
  0xc4   :  { %vm2296_vm4 = vcmp.eq.f32.partialorder %v2295_v59, 8.507059e+37 }
  0xc5   :  { %v373_v24 = vpop.f32.mrf.mxu3 }
  0xc6   :  { %4574 = vmatmul.msk.f32.gmra.mxu3 %vm202_vm12, %v373_v24 }
  0xc7   :  { %v313_v25 = vpop.f32.mrf.mxu0 }
  0xc8   :  { %4554 = vmatmul.msk.f32.gmra.mxu1 %vm202_vm12, %v313_v25  ;;  %4582 = vmatmul.msk.f32.gmra.mxu2 %vm202_vm12, %v313_v25  ;;  %v2270_v25 = vmul.f32 %v2269_v16, %v1920_v13 }
  0xca   :  { %4542 = vmatmul.msk.f32.gmra.mxu0 %vm202_vm12, %v193_v26  ;;  %v2273_v26 = vsub.f32 1.0, %v2272_v20  ;;  %4672 = vlog2.f32 %v2270_v25  ;;  %v1978_v25 = vadd.f32 1e-09, %v5743_v55 }
  0xcd   :  { %v376_v27 = vpop.f32.mrf.mxu3 }
  0xce   :  { %4575 = vmatmul.msk.f32.gmra.mxu3 %vm202_vm12, %v376_v27 }
  0xcf   :  { %v316_v28 = vpop.f32.mrf.mxu0 }
  0xd0   :  { %4555 = vmatmul.msk.f32.gmra.mxu1 %vm202_vm12, %v316_v28  ;;  %4583 = vmatmul.msk.f32.gmra.mxu2 %vm202_vm12, %v316_v28  ;;  %v2280_v28 = vand.u32 2147483647, %v5737_v52 }
  0xd2   :  { %4543 = vmatmul.msk.f32.gmra.mxu0 %vm202_vm12, %v194_v29  ;;  %vm5789_vm9 = vcmp.eq.f32.partialorder %v2280_v28, 8.507059e+37 }
  0xd5   :  { %v379_v30 = vpop.f32.mrf.mxu3 }
  0xd6   :  { %4576 = vmatmul.msk.f32.gmra.mxu3 %vm202_vm12, %v379_v30 }
  0xd7   :  { %v319_v31 = vpop.f32.mrf.mxu0 }
  0xd8   :  { %4556 = vmatmul.msk.f32.gmra.mxu1 %vm202_vm12, %v319_v31  ;;  %4584 = vmatmul.msk.f32.gmra.mxu2 %vm202_vm12, %v319_v31  ;;  %v3109_v31 = vsel %vm3106_vm3, %v3108_v19, %v3104_v23 }
  0xdd   :  { %v382_v33 = vpop.f32.mrf.mxu3 }
  0xde   :  { %4577 = vmatmul.msk.f32.gmra.mxu3 %vm202_vm12, %v382_v33 }
  0xdf   :  { %v322_v34 = vpop.f32.mrf.mxu0 }
  0xe0   :  { %4557 = vmatmul.msk.f32.gmra.mxu1 %vm202_vm12, %v322_v34  ;;  %4585 = vmatmul.msk.f32.gmra.mxu2 %vm202_vm12, %v322_v34 }
  0xe5   :  { %v385_v35 = vpop.f32.mrf.mxu3 }
  0xe6   :  { %4578 = vmatmul.msk.f32.gmra.mxu3 %vm202_vm12, %v385_v35 }
  0xe7   :  { %v325_v36 = vpop.f32.mrf.mxu0 }
  0xe8   :  { %4558 = vmatmul.msk.f32.gmra.mxu1 %vm202_vm12, %v325_v36  ;;  %4586 = vmatmul.msk.f32.gmra.mxu2 %vm202_vm12, %v325_v36 }
  0xee   :  { %4600 = vmatmul.msk.f32.vlgmr.msra.gmra.mxu3 %vm202_vm12, %v367_v18  ;;  %v5766_v18 = vpop.eup %4668 }
  0xef   :  { %v328_v37 = vpop.f32.mrf.mxu0  ;;  %v5771_v22 = vpop.eup %4670  ;;  %v2287_v29 = vmul.f32 %v5766_v18, %v5751_v62  ;;  %vm2292_vm15 = vweird.f32 %v5766_v18 }
  0xf0   :  { %4559 = vmatmul.msk.f32.gmra.mxu1 %vm202_vm12, %v328_v37  ;;  %4587 = vmatmul.msk.f32.gmra.mxu2 %vm202_vm12, %v328_v37  ;;  %vm5818_vm0 = vmor %vm2291_vm14, %vm2292_vm15  ;;  %v4673_v2 = vpop.eup %4672  ;;  %vm3132_vm2 = vweird.f32 %v5771_v22 }
  0xf1   :  { %v2288_v45 = vsub.f32 1.0, %v2287_v29  ;;  %vm5836_vm3 = vmor %vm3131_vm1, %vm3132_vm2  ;;  %v5841_v16 = vmul.f32 0.6931472, %v4673_v2 }
  0xf6   :  { %4601 = vmatmul.msk.f32.gmra.mxu3 %vm202_vm12, %v370_v21  ;;  %v3112_v21 = vmul.f32 %v5758_v10, %v5739_v53 }
  0xf7   :  { %v331_v32 = vpop.f32.mrf.mxu0 }
  0xf8   :  { %4560 = vmatmul.msk.f32.gmra.mxu1 %vm202_vm12, %v331_v32  ;;  %4588 = vmatmul.msk.f32.gmra.mxu2 %vm202_vm12, %v331_v32  ;;  %v3113_v34 = vsub.f32 1.0, %v3112_v21 }
  0xfa   :  { %v3114_v40 = vmul.f32 %v5758_v10, %v3113_v34 }
  0xfc   :  { %v3115_v49 = vadd.f32 %v5758_v10, %v3114_v40 }
  0xfe   :  { %4602 = vmatmul.msk.f32.gmra.mxu3 %vm202_vm12, %v373_v24  ;;  %v1976_v24 = vadd.f32 1e-09, %v5724_v41  ;;  %v3120_v41 = vand.u32 2147483647, %v5739_v53  ;;  %v3119_v48 = vsel %vm5798_vm11, %v5758_v10, %v3115_v49  ;;  %v3137_v10 = vand.u32 2147483648, %v5753_v63 }
  0xff   :  { %v334_v38 = vpop.f32.mrf.mxu0 }
 0x100   :  { %4561 = vmatmul.msk.f32.gmra.mxu1 %vm202_vm12, %v334_v38  ;;  %4589 = vmatmul.msk.f32.gmra.mxu2 %vm202_vm12, %v334_v38  ;;  %v3127_v38 = vmul.f32 %v5771_v22, %v5753_v63  ;;  %v3110_v42 = vmul.f32 %v3109_v31, %v1976_v24  ;;  %vm3121_vm13 = vcmp.eq.f32.partialorder %v3120_v41, 8.507059e+37  ;;  %v3138_v23 = vor.u32 1.1754944e-38, %v3137_v10 }
 0x102   :  { %4674 = vlog2.f32 %v3110_v42  ;;  %v3128_v5 = vsub.f32 1.0, %v3127_v38 }
 0x104   :  { %v3129_v8 = vmul.f32 %v5771_v22, %v3128_v5 }
 0x106   :  { %4603 = vmatmul.msk.f32.gmra.mxu3 %vm202_vm12, %v376_v27  ;;  %v2282_v27 = vand.u32 2147483648, %v5737_v52  ;;  %v3130_v19 = vadd.f32 %v5771_v22, %v3129_v8 }
 0x107   :  { %v337_v39 = vpop.f32.mrf.mxu0 }
 0x108   :  { %4562 = vmatmul.msk.f32.gmra.mxu1 %vm202_vm12, %v337_v39  ;;  %4590 = vmatmul.msk.f32.gmra.mxu2 %vm202_vm12, %v337_v39  ;;  %v2283_v32 = vor.u32 1.1754944e-38, %v2282_v27  ;;  %v4675_v14 = vpop.eup %4674 }
 0x10e   :  { %4604 = vmatmul.msk.f32.gmra.mxu3 %vm202_vm12, %v379_v30 }
 0x10f   :  { %v340_v44 = vpop.f32.mrf.mxu0 }
 0x110   :  { %4563 = vmatmul.msk.f32.gmra.mxu1 %vm202_vm12, %v340_v44  ;;  %4591 = vmatmul.msk.f32.gmra.mxu2 %vm202_vm12, %v340_v44  ;;  %v3122_v44 = vand.u32 2147483648, %v5739_v53  ;;  %v2289_v53 = vmul.f32 %v5766_v18, %v2288_v45 }
 0x112   :  { %v2290_v0 = vadd.f32 %v5766_v18, %v2289_v53 }
 0x114   :  { %v2294_v62 = vsel %vm5818_vm0, %v5766_v18, %v2290_v0 }
 0x116   :  { %4605 = vmatmul.msk.f32.gmra.mxu3 %vm202_vm12, %v382_v33  ;;  %v2274_v33 = vmul.f32 %v4665_v6, %v2273_v26  ;;  %v3134_v26 = vsel %vm5836_vm3, %v5771_v22, %v3130_v19 }
 0x117   :  { %v343_v51 = vpop.f32.mrf.mxu0 }
 0x118   :  { %4564 = vmatmul.msk.f32.gmra.mxu1 %vm202_vm12, %v343_v51  ;;  %4592 = vmatmul.msk.f32.gmra.mxu2 %vm202_vm12, %v343_v51  ;;  %v2275_v39 = vadd.f32 %v4665_v6, %v2274_v33  ;;  %v3123_v51 = vor.u32 1.1754944e-38, %v3122_v44  ;;  %v5883_v44 = vld [vmem:[#allocation2 + $0x1d8] sm:$0xff] }
 0x11a   :  { %v3124_v58 = vsel %vm3121_vm13, %v3123_v51, %v3119_v48 }
 0x11b   :  { %v3125_v4 = vmul.f32 %v3124_v58, %v1977_v46  ;;  %v2091_v58 = vsub.f32 1.0, %v5883_v44 }
 0x11e   :  { %4606 = vmatmul.msk.f32.gmra.mxu3 %vm202_vm12, %v385_v35  ;;  %v1921_v35 = vadd.f32 1e-09, %v5730_v47  ;;  %v2279_v47 = vsel %vm5785_vm7, %v4665_v6, %v2275_v39  ;;  %v2298_v6 = vor.u32 1.1754944e-38, %v2297_v60  ;;  %v3139_v39 = vsel %vm5853_vm5, %v3138_v23, %v3134_v26 }
 0x11f   :  { %v346_v7 = vpop.f32.mrf.mxu0  ;;  %v2284_v50 = vsel %vm5789_vm9, %v2283_v32, %v2279_v47  ;;  %v3140_v45 = vmul.f32 %v3139_v39, %v1978_v25  ;;  %v1850_v47 = vld [vmem:[#allocation2 + $0x150] sm:$0xff] }
 0x120   :  { %4565 = vmatmul.msk.f32.gmra.mxu1 %vm202_vm12, %v346_v7  ;;  %4593 = vmatmul.msk.f32.gmra.mxu2 %vm202_vm12, %v346_v7  ;;  %v2285_v56 = vmul.f32 %v2284_v50, %v1921_v35  ;;  %v2299_v18 = vsel %vm2296_vm4, %v2298_v6, %v2294_v62  ;;  %v5871_v35 = vld [vmem:[#allocation2 + $0x18] sm:$0xff]  ;;  %v2074_v0 = vsub.f32 1.0, %v1850_v47 }
 0x121   :  { %v2300_v31 = vmul.f32 %v2299_v18, %v1922_v12  ;;  %v2035_v49 = vsub.f32 1.0, %v5871_v35 }
 0x122   :  { %4676 = vlog2.f32 %v2285_v56  ;;  %v5907_v8 = vadd.f32 1e-09, %v2074_v0 }
 0x123   :  { %v6006_v27 = vadd.f32 1e-09, %v2035_v49 }
 0x124   :  { %vm2891_vm3 = vweird.f32 %v5907_v8 }
 0x127   :  { %v349_v30 = vpop.f32.mrf.mxu0 }
 0x128   :  { %4566 = vmatmul.msk.f32.gmra.mxu1 %vm202_vm12, %v349_v30  ;;  %4594 = vmatmul.msk.f32.gmra.mxu2 %vm202_vm12, %v349_v30  ;;  %v4677_v54 = vpop.eup %4676  ;;  %v5858_v30 = vmul.f32 0.6931472, %v4675_v14 }
 0x129   :  { %v5875_v38 = vmul.f32 0.6931472, %v4677_v54 }
 0x12d   :  { %v503_v52 = vpop.f32.mrf.mxu1 }
 0x12e   :  { %v744_v57 = vsub.f32 1.0, %v503_v52  ;;  %v5847_v24 = vadd.f32 1e-09, %v503_v52 }
 0x12f   :  { %v352_v61 = vpop.f32.mrf.mxu0 }
 0x130   :  { %v5822_v3 = vadd.f32 1e-09, %v744_v57  ;;  %4567 = vmatmul.msk.f32.gmra.mxu1 %vm202_vm12, %v352_v61  ;;  %4595 = vmatmul.msk.f32.gmra.mxu2 %vm202_vm12, %v352_v61  ;;  %v1906_v57 = vld [vmem:[#allocation2 + $0x310] sm:$0xff] }
 0x132   :  { %4678 = vrcp.f32 %v5822_v3  ;;  %v865_v15 = vand.u32 2147483647, %v5822_v3  ;;  %v867_v20 = vand.u32 2147483648, %v5822_v3  ;;  %vm861_vm6 = vweird.f32 %v5822_v3 }
 0x133   :  { %v604_v7 = vpop.f32.mrf.mxu2  ;;  %4680 = vlog2.f32 %v3125_v4  ;;  %v5905_v4 = vadd.f32 1e-09, %v1850_v47 }
 0x134   :  { %v745_v11 = vsub.f32 1.0, %v604_v7  ;;  %vm5864_vm8 = vcmp.eq.f32.partialorder %v865_v15, 8.507059e+37  ;;  %v868_v37 = vor.u32 1.1754944e-38, %v867_v20  ;;  %v5873_v32 = vadd.f32 1e-09, %v604_v7 }
 0x135   :  { %v506_v17 = vpop.f32.mrf.mxu1  ;;  %v2130_v7 = vsub.f32 1.0, %v1906_v57 }
 0x136   :  { %v5845_v63 = vadd.f32 1e-09, %v745_v11  ;;  %v746_v21 = vsub.f32 1.0, %v506_v17  ;;  %v5880_v42 = vadd.f32 1e-09, %v506_v17 }
 0x137   :  { %v355_v28 = vpop.f32.mrf.mxu0  ;;  %v5919_v17 = vadd.f32 1e-09, %v2130_v7 }
 0x138   :  { %v4679_v29 = vpop.eup %4678  ;;  %4682 = vrcp.f32 %v5845_v63  ;;  %4568 = vmatmul.msk.f32.gmra.mxu1 %vm202_vm12, %v355_v28  ;;  %4596 = vmatmul.msk.f32.gmra.mxu2 %vm202_vm12, %v355_v28  ;;  %v882_v33 = vand.u32 2147483648, %v5845_v63  ;;  %v5869_v34 = vadd.f32 1e-09, %v746_v21  ;;  %v880_v41 = vand.u32 2147483647, %v5845_v63 }
 0x139   :  { %v857_v55 = vmul.f32 %v4679_v29, %v5822_v3  ;;  %v4681_v36 = vpop.eup %4680  ;;  %v566_v43 = vpop.f32.mrf.mxu3  ;;  %vm862_vm7 = vweird.f32 %v4679_v29  ;;  %vm876_vm9 = vweird.f32 %v5845_v63  ;;  %v5921_v21 = vadd.f32 1e-09, %v1906_v57 }
 0x13a   :  { %4684 = vrcp.f32 %v5869_v34  ;;  %v786_v46 = vsub.f32 1.0, %v566_v43  ;;  %v883_v51 = vor.u32 1.1754944e-38, %v882_v33  ;;  %v5886_v52 = vmul.f32 0.6931472, %v4681_v36  ;;  %vm863_vm11 = vmor %vm861_vm6, %vm862_vm7 }
 0x13b   :  { %v858_v40 = vsub.f32 1.0, %v857_v55  ;;  %4686 = vlog2.f32 %v2300_v31  ;;  %v895_v48 = vand.u32 2147483647, %v5869_v34  ;;  %vm5894_vm10 = vcmp.eq.f32.partialorder %v880_v41, 8.507059e+37  ;;  %v5937_v28 = vpop.f32.mrf.mxu2 }
 0x13c   :  { %v5890_v53 = vadd.f32 1e-09, %v786_v46  ;;  %4688 = vlog2.f32 %v3140_v45  ;;  %vm891_vm13 = vweird.f32 %v5869_v34  ;;  %v897_v1 = vand.u32 2147483648, %v5869_v34 }
 0x13d   :  { %v859_v50 = vmul.f32 %v4679_v29, %v858_v40  ;;  %v5902_v2 = vadd.f32 1e-09, %v566_v43  ;;  %vm5912_vm15 = vcmp.eq.f32.partialorder %v895_v48, 8.507059e+37  ;;  %v2895_v36 = vand.u32 2147483647, %v5907_v8 }
 0x13e   :  { %v4683_v56 = vpop.eup %4682  ;;  %4690 = vrcp.f32 %v5890_v53  ;;  %v1495_v12 = vand.u32 2147483647, %v5890_v53  ;;  %v1497_v15 = vand.u32 2147483648, %v5890_v53  ;;  %v898_v20 = vor.u32 1.1754944e-38, %v897_v1 }
 0x13f   :  { %v860_v59 = vadd.f32 %v4679_v29, %v859_v50  ;;  %v872_v60 = vmul.f32 %v4683_v56, %v5845_v63  ;;  %vm877_vm14 = vweird.f32 %v4683_v56  ;;  %v358_v18 = vpop.f32.mrf.mxu0  ;;  %4692 = vrcp.f32 %v5907_v8 }
 0x140   :  { %v4685_v5 = vpop.eup %4684  ;;  %4569 = vmatmul.msk.f32.gmra.mxu1 %vm202_vm12, %v358_v18  ;;  %4597 = vmatmul.msk.f32.gmra.mxu2 %vm202_vm12, %v358_v18  ;;  %vm1491_vm0 = vweird.f32 %v5890_v53  ;;  %vm878_vm1 = vmor %vm876_vm9, %vm877_vm14  ;;  %vm5932_vm4 = vcmp.eq.f32.partialorder %v1495_v12, 8.507059e+37  ;;  %v1498_v55 = vor.u32 1.1754944e-38, %v1497_v15  ;;  %v747_v40 = vsub.f32 1.0, %v5937_v28 }
 0x141   :  { %v864_v6 = vsel %vm863_vm11, %v4679_v29, %v860_v59  ;;  %v873_v62 = vsub.f32 1.0, %v872_v60  ;;  %v4687_v9 = vpop.eup %4686  ;;  %v887_v10 = vmul.f32 %v4685_v5, %v5869_v34  ;;  %vm892_vm2 = vweird.f32 %v4685_v5 }
 0x142   :  { %v869_v3 = vsel %vm5864_vm8, %v868_v37, %v864_v6  ;;  %v4689_v23 = vpop.eup %4688  ;;  %vm893_vm5 = vmor %vm891_vm13, %vm892_vm2  ;;  %v2897_v45 = vand.u32 2147483648, %v5907_v8  ;;  %vm3731_vm8 = vweird.f32 %v5919_v17  ;;  %v3735_v46 = vand.u32 2147483647, %v5919_v17 }
 0x143   :  { %v870_v13 = vmul.f32 %v869_v3, %v5847_v24  ;;  %v874_v14 = vmul.f32 %v4683_v56, %v873_v62  ;;  %v888_v19 = vsub.f32 1.0, %v887_v10  ;;  %v5926_v24 = vmul.f32 0.6931472, %v4687_v9 }
 0x144   :  { %v4691_v25 = vpop.eup %4690  ;;  %v5943_v33 = vmul.f32 0.6931472, %v4689_v23  ;;  %v3737_v59 = vand.u32 2147483648, %v5919_v17  ;;  %v5965_v60 = vadd.f32 1e-09, %v747_v40  ;;  %vm5982_vm13 = vcmp.eq.f32.partialorder %v2895_v36, 8.507059e+37 }
 0x145   :  { %4694 = vlog2.f32 %v870_v13  ;;  %v875_v54 = vadd.f32 %v4683_v56, %v874_v14  ;;  %v889_v26 = vmul.f32 %v4685_v5, %v888_v19  ;;  %v1487_v31 = vmul.f32 %v4691_v25, %v5890_v53  ;;  %v4693_v41 = vpop.eup %4692 }
 0x146   :  { %4696 = vrcp.f32 %v5919_v17  ;;  %vm1492_vm6 = vweird.f32 %v4691_v25  ;;  %v2887_v34 = vmul.f32 %v4693_v41, %v5907_v8  ;;  %vm2892_vm9 = vweird.f32 %v4693_v41 }
 0x147   :  { %v879_v29 = vsel %vm878_vm1, %v4683_v56, %v875_v54  ;;  %v890_v22 = vadd.f32 %v4685_v5, %v889_v26  ;;  %v1488_v39 = vsub.f32 1.0, %v1487_v31  ;;  %vm5960_vm7 = vmor %vm1491_vm0, %vm1492_vm6  ;;  %vm4385_vm14 = vcmask 785408  }
 0x148   :  { %v884_v63 = vsel %vm5894_vm10, %v883_v51, %v879_v29  ;;  %v2888_v0 = vsub.f32 1.0, %v2887_v34  ;;  %vm5977_vm11 = vmor %vm2891_vm3, %vm2892_vm9  ;;  %vm5993_vm0 = vcmp.eq.f32.partialorder %v3735_v46, 8.507059e+37  ;;  %v910_v23 = vand.u32 2147483647, %v5965_v60  ;;  %v509_v46 = vpop.f32.mrf.mxu1 }
 0x149   :  { %v885_v37 = vmul.f32 %v884_v63, %v5873_v32  ;;  %v894_v43 = vsel %vm893_vm5, %v4685_v5, %v890_v22  ;;  %v1489_v50 = vmul.f32 %v4691_v25, %v1488_v39  ;;  %v6013_v22 = vadd.f32 1e-09, %v2091_v58 }
 0x14a   :  { %v899_v32 = vsel %vm5912_vm15, %v898_v20, %v894_v43  ;;  %v2889_v6 = vmul.f32 %v4693_v41, %v2888_v0  ;;  %v912_v58 = vand.u32 2147483648, %v5965_v60  ;;  %vm906_vm2 = vweird.f32 %v5965_v60 }
 0x14b   :  { %v4695_v47 = vpop.eup %4694  ;;  %4698 = vlog2.f32 %v885_v37  ;;  %v900_v48 = vmul.f32 %v899_v32, %v5880_v42  ;;  %v1490_v61 = vadd.f32 %v4691_v25, %v1489_v50  ;;  %v6034_v50 = vadd.f32 1e-09, %v5871_v35  ;;  %v1868_v35 = vld [vmem:[#allocation2 + $0x1e0] sm:$0xff] }
 0x14c   :  { %v4697_v51 = vpop.eup %4696  ;;  %v1697_v56 = vmul.f32 0.6931472, %v4695_v47  ;;  %v2890_v12 = vadd.f32 %v4693_v41, %v2889_v6  ;;  %v691_v47 = vadd.f32 1e-09, %v5937_v28  ;;  %vm2306_vm5 = vweird.f32 %v6006_v27  ;;  %v1852_v32 = vld [vmem:[#allocation2 + $0x160] sm:$0xff] }
 0x14d   :  { %v3727_v1 = vmul.f32 %v4697_v51, %v5919_v17  ;;  %4700 = vlog2.f32 %v900_v48  ;;  %vm3732_vm10 = vweird.f32 %v4697_v51  ;;  %v1494_v53 = vsel %vm5960_vm7, %v4691_v25, %v1490_v61 }
 0x14e   :  { %v4160_v5 = vadd.f32 %v5841_v16, %v1697_v56  ;;  %v4216_v42 = vadd.f32 %v5858_v30, %v1697_v56  ;;  %4702 = vrcp.f32 %v5965_v60  ;;  %v1499_v3 = vsel %vm5932_vm4, %v1498_v55, %v1494_v53  ;;  %vm5989_vm15 = vmor %vm3731_vm8, %vm3732_vm10 }
 0x14f   :  { %v3728_v62 = vsub.f32 1.0, %v3727_v1  ;;  %v2898_v30 = vor.u32 1.1754944e-38, %v2897_v45  ;;  %v1500_v11 = vmul.f32 %v1499_v3, %v5902_v2  ;;  %v3738_v2 = vor.u32 1.1754944e-38, %v3737_v59 }
 0x150   :  { %v4272_v7 = vmul.f32 -10.0, %v4160_v5  ;;  %v4328_v9 = vmul.f32 -10.0, %v4216_v42  ;;  %v2894_v19 = vsel %vm5977_vm11, %v4693_v41, %v2890_v12  ;;  %vm6029_vm4 = vcmp.eq.f32.partialorder %v910_v23, 8.507059e+37 }
 0x151   :  { %v4699_v10 = vpop.eup %4698  ;;  %v3729_v14 = vmul.f32 %v4697_v51, %v3728_v62  ;;  %4704 = vlog2.f32 %v1500_v11  ;;  %v2899_v26 = vsel %vm5982_vm13, %v2898_v30, %v2894_v19  ;;  %v6037_v56 = vadd.f32 1e-09, %v5883_v44 }
 0x152   :  { %4384 = vst [vmem:[#allocation5] sm:$0xff] %v4272_v7  ;;  %v1699_v15 = vmul.f32 0.6931472, %v4699_v10  ;;  %v2900_v55 = vmul.f32 %v2899_v26, %v5905_v4  ;;  %v748_v48 = vsub.f32 1.0, %v509_v46  ;;  %v913_v59 = vor.u32 1.1754944e-38, %v912_v58 }
 0x153   :  { %4441 = vst [vmem:[#allocation5 + $0x1c0] sm:$0xff] %v4328_v9  ;;  %v3730_v20 = vadd.f32 %v4697_v51, %v3729_v14  ;;  %v4701_v54 = vpop.eup %4700  ;;  %vm3146_vm8 = vweird.f32 %v6013_v22  ;;  %v3150_v6 = vand.u32 2147483647, %v6013_v22  ;;  %v2092_v16 = vsub.f32 1.0, %v1868_v35 }
 0x154   :  { %v4161_v17 = vadd.f32 %v5875_v38, %v1699_v15  ;;  %v4217_v25 = vadd.f32 %v5886_v52, %v1699_v15  ;;  %v4703_v29 = vpop.eup %4702  ;;  %v1701_v31 = vmul.f32 0.6931472, %v4701_v54  ;;  %4706 = vlog2.f32 %v2900_v55 }
 0x155   :  { %v3734_v63 = vsel %vm5989_vm15, %v4697_v51, %v3730_v20  ;;  %v902_v37 = vmul.f32 %v4703_v29, %v5965_v60  ;;  %4708 = vrcp.f32 %v6006_v27  ;;  %vm907_vm1 = vweird.f32 %v4703_v29 }
 0x156   :  { %v4273_v38 = vmul.f32 -10.0, %v4161_v17  ;;  %v4329_v52 = vmul.f32 -10.0, %v4217_v25  ;;  %v3739_v36 = vsel %vm5993_vm0, %v3738_v2, %v3734_v63  ;;  %v4162_v49 = vadd.f32 %v5926_v24, %v1701_v31  ;;  %vm908_vm3 = vmor %vm906_vm2, %vm907_vm1 }
 0x157   :  { %v4218_v39 = vadd.f32 %v5943_v33, %v1701_v31  ;;  %v3740_v4 = vmul.f32 %v3739_v36, %v5921_v21  ;;  %v903_v40 = vsub.f32 1.0, %v902_v37  ;;  %v4705_v41 = vpop.eup %4704  ;;  %v2310_v24 = vand.u32 2147483647, %v6006_v27  ;;  %v1812_v21 = vld [vmem:[#allocation2 + $0x20] sm:$0xff] }
 0x158   :  { %4386 = vst.msk [vmem:[#allocation5 + $0x8] sm:$0xff] %vm4385_vm14, %v4273_v38  ;;  %v4274_v43 = vmul.f32 -10.0, %v4162_v49  ;;  %v1781_v34 = vmul.f32 0.6931472, %v4705_v41  ;;  %v2312_v60 = vand.u32 2147483648, %v6006_v27  ;;  %v2036_v62 = vsub.f32 1.0, %v1812_v21 }
 0x159   :  { %4442 = vst.msk [vmem:[#allocation5 + $0x1c8] sm:$0xff] %vm4385_vm14, %v4329_v52  ;;  %v4330_v45 = vmul.f32 -10.0, %v4218_v39  ;;  %4710 = vlog2.f32 %v3740_v4  ;;  %v904_v33 = vmul.f32 %v4703_v29, %v903_v40  ;;  %vm6040_vm6 = vcmp.eq.f32.partialorder %v2310_v24, 8.507059e+37  ;;  %v6102_v24 = vpop.f32.mrf.mxu3 }
 0x15a   :  { %4712 = vrcp.f32 %v6013_v22  ;;  %4387 = vst [vmem:[#allocation5 + $0x10] sm:$0xff] %v4274_v43  ;;  %v4707_v57 = vpop.eup %4706  ;;  %v6046_v44 = vadd.f32 1e-09, %v748_v48  ;;  %v3152_v11 = vand.u32 2147483648, %v6013_v22  ;;  %v6055_v15 = vadd.f32 1e-09, %v509_v46 }
 0x15b   :  { %4443 = vst [vmem:[#allocation5 + $0x1d0] sm:$0xff] %v4330_v45  ;;  %v905_v51 = vadd.f32 %v4703_v29, %v904_v33  ;;  %v4709_v61 = vpop.eup %4708  ;;  %v4021_v0 = vmul.f32 0.6931472, %v4707_v57  ;;  %v6057_v2 = vadd.f32 1e-09, %v2036_v62  ;;  %v2313_v23 = vor.u32 1.1754944e-38, %v2312_v60 }
 0x15c   :  { %v2302_v53 = vmul.f32 %v4709_v61, %v6006_v27  ;;  %4714 = vrcp.f32 %v6046_v44  ;;  %vm2307_vm7 = vweird.f32 %v4709_v61  ;;  %vm6065_vm11 = vcmp.eq.f32.partialorder %v3150_v6, 8.507059e+37 }
 0x15d   :  { %v909_v1 = vsel %vm908_vm3, %v4703_v29, %v905_v51  ;;  %v4202_v3 = vadd.f32 %v4021_v0, %v1781_v34  ;;  %vm6061_vm10 = vmor %vm2306_vm5, %vm2307_vm7  ;;  %v6069_v17 = vadd.f32 1e-09, %v2092_v16  ;;  %v925_v29 = vand.u32 2147483647, %v6046_v44 }
 0x15e   :  { %v914_v42 = vsel %vm6029_vm4, %v913_v59, %v909_v1  ;;  %v2303_v30 = vsub.f32 1.0, %v2302_v53  ;;  %4716 = vrcp.f32 %v6057_v2  ;;  %v3153_v55 = vor.u32 1.1754944e-38, %v3152_v11 }
 0x15f   :  { %v4711_v5 = vpop.eup %4710  ;;  %v4314_v13 = vmul.f32 -10.0, %v4202_v3  ;;  %v915_v14 = vmul.f32 %v914_v42, %v691_v47  ;;  %v927_v63 = vand.u32 2147483648, %v6046_v44  ;;  %v6080_v38 = vadd.f32 1e-09, %v1812_v21 }
 0x160   :  { %v4713_v7 = vpop.eup %4712  ;;  %v4133_v9 = vmul.f32 0.6931472, %v4711_v5  ;;  %v2304_v8 = vmul.f32 %v4709_v61, %v2303_v30  ;;  %4718 = vrcp.f32 %v6069_v17  ;;  %vm921_vm15 = vweird.f32 %v6046_v44 }
 0x161   :  { %v3142_v10 = vmul.f32 %v4713_v7, %v6013_v22  ;;  %vm3147_vm9 = vweird.f32 %v4713_v7  ;;  %4427 = vst [vmem:[#allocation5 + $0x150] sm:$0xff] %v4314_v13  ;;  %4720 = vlog2.f32 %v915_v14  ;;  %v6089_v49 = vadd.f32 1e-09, %v1868_v35 }
 0x162   :  { %v4258_v12 = vadd.f32 %v4133_v9, %v1781_v34  ;;  %v2305_v25 = vadd.f32 %v4709_v61, %v2304_v8  ;;  %v4715_v31 = vpop.eup %4714  ;;  %vm6075_vm13 = vmor %vm3146_vm8, %vm3147_vm9  ;;  %v2325_v39 = vand.u32 2147483647, %v6057_v2  ;;  %vm6095_vm0 = vcmp.eq.f32.partialorder %v925_v29, 8.507059e+37 }
 0x163   :  { %v3143_v18 = vsub.f32 1.0, %v3142_v10  ;;  %v917_v37 = vmul.f32 %v4715_v31, %v6046_v44  ;;  %vm922_vm1 = vweird.f32 %v4715_v31  ;;  %v928_v45 = vor.u32 1.1754944e-38, %v927_v63 }
 0x164   :  { %v4370_v19 = vmul.f32 -10.0, %v4258_v12  ;;  %v2309_v52 = vsel %vm6061_vm10, %v4709_v61, %v2305_v25  ;;  %vm2321_vm2 = vweird.f32 %v6057_v2  ;;  %v4717_v46 = vpop.eup %4716  ;;  %v788_v47 = vsub.f32 1.0, %v6102_v24  ;;  %vm923_vm5 = vmor %vm921_vm15, %vm922_vm1  ;;  %v1908_v61 = vld [vmem:[#allocation2 + $0x320] sm:$0xff] }
 0x165   :  { %v3144_v26 = vmul.f32 %v4713_v7, %v3143_v18  ;;  %v2314_v22 = vsel %vm6040_vm6, %v2313_v23, %v2309_v52  ;;  %v918_v58 = vsub.f32 1.0, %v917_v37  ;;  %v2317_v34 = vmul.f32 %v4717_v46, %v6057_v2 }
 0x166   :  { %4483 = vst [vmem:[#allocation5 + $0x310] sm:$0xff] %v4370_v19  ;;  %v2315_v4 = vmul.f32 %v2314_v22, %v6034_v50  ;;  %v4719_v50 = vpop.eup %4718  ;;  %vm6107_vm4 = vcmp.eq.f32.partialorder %v2325_v39, 8.507059e+37  ;;  %v2327_v48 = vand.u32 2147483648, %v6057_v2  ;;  %vm3161_vm3 = vweird.f32 %v6069_v17 }
 0x167   :  { %v3145_v36 = vadd.f32 %v4713_v7, %v3144_v26  ;;  %v919_v21 = vmul.f32 %v4715_v31, %v918_v58  ;;  %v4721_v57 = vpop.eup %4720  ;;  %v3167_v28 = vand.u32 2147483648, %v6069_v17  ;;  %v2318_v60 = vsub.f32 1.0, %v2317_v34 }
 0x168   :  { %4722 = vlog2.f32 %v2315_v4  ;;  %vm2322_vm6 = vweird.f32 %v4717_v46  ;;  %v6118_v35 = vadd.f32 1e-09, %v788_v47  ;;  %v2076_v0 = vsub.f32 1.0, %v1852_v32 }
 0x169   :  { %v3149_v40 = vsel %vm6075_vm13, %v4713_v7, %v3145_v36  ;;  %v920_v59 = vadd.f32 %v4715_v31, %v919_v21  ;;  %vm3162_vm8 = vweird.f32 %v4719_v50  ;;  %v3165_v42 = vand.u32 2147483647, %v6069_v17  ;;  %vm6127_vm7 = vmor %vm2321_vm2, %vm2322_vm6 }
 0x16a   :  { %v3154_v43 = vsel %vm6065_vm11, %v3153_v55, %v3149_v40  ;;  %v1703_v53 = vmul.f32 0.6931472, %v4721_v57  ;;  %v2319_v62 = vmul.f32 %v4717_v46, %v2318_v60  ;;  %v2328_v3 = vor.u32 1.1754944e-38, %v2327_v48  ;;  %vm6133_vm9 = vmor %vm3161_vm3, %vm3162_vm8  ;;  %v1869_v57 = vld [vmem:[#allocation2 + $0x1e8] sm:$0xff] }
 0x16b   :  { %v3155_v33 = vmul.f32 %v3154_v43, %v6037_v56  ;;  %v3157_v56 = vmul.f32 %v4719_v50, %v6069_v17  ;;  %v924_v1 = vsel %vm923_vm5, %v4715_v31, %v920_v59  ;;  %v2132_v30 = vsub.f32 1.0, %v1908_v61 }
 0x16c   :  { %v929_v6 = vsel %vm6095_vm0, %v928_v45, %v924_v1  ;;  %v2320_v11 = vadd.f32 %v4717_v46, %v2319_v62  ;;  %v3168_v13 = vor.u32 1.1754944e-38, %v3167_v28  ;;  %v6137_v14 = vadd.f32 1e-09, %v2076_v0 }
 0x16d   :  { %4724 = vlog2.f32 %v3155_v33  ;;  %v3158_v5 = vsub.f32 1.0, %v3157_v56  ;;  %v930_v7 = vmul.f32 %v929_v6, %v6055_v15  ;;  %v361_v15 = vpop.f32.mrf.mxu0  ;;  %vm6139_vm10 = vcmp.eq.f32.partialorder %v3165_v42, 8.507059e+37  ;;  %v1813_v33 = vld [vmem:[#allocation2 + $0x28] sm:$0xff] }
 0x16e   :  { %4726 = vrcp.f32 %v6118_v35  ;;  %v4723_v44 = vpop.eup %4722  ;;  %v1525_v19 = vand.u32 2147483647, %v6118_v35  ;;  %4570 = vmatmul.msk.f32.gmra.mxu1 %vm202_vm12, %v361_v15  ;;  %4598 = vmatmul.msk.f32.gmra.mxu2 %vm202_vm12, %v361_v15  ;;  %v2324_v54 = vsel %vm6127_vm7, %v4717_v46, %v2320_v11  ;;  %v1527_v26 = vand.u32 2147483648, %v6118_v35 }
 0x16f   :  { %v3159_v16 = vmul.f32 %v4719_v50, %v3158_v5  ;;  %v3943_v10 = vmul.f32 0.6931472, %v4723_v44  ;;  %4728 = vlog2.f32 %v930_v7  ;;  %v2329_v17 = vsel %vm6107_vm4, %v2328_v3, %v2324_v54  ;;  %v512_v7 = vpop.f32.mrf.mxu1 }
 0x170   :  { %4730 = vrcp.f32 %v6137_v14  ;;  %v6154_v29 = vadd.f32 1e-09, %v2132_v30  ;;  %v2330_v63 = vmul.f32 %v2329_v17, %v6080_v38  ;;  %v732_v37 = vadd.f32 1e-09, %v6102_v24 }
 0x171   :  { %v3160_v18 = vadd.f32 %v4719_v50, %v3159_v16  ;;  %v4163_v23 = vadd.f32 %v3943_v10, %v1703_v53  ;;  %v6162_v39 = vadd.f32 1e-09, %v1852_v32  ;;  %v6165_v40 = vadd.f32 1e-09, %v1908_v61 }
 0x172   :  { %4732 = vlog2.f32 %v2330_v63  ;;  %v2925_v58 = vand.u32 2147483647, %v6137_v14  ;;  %vm1521_vm11 = vweird.f32 %v6118_v35  ;;  %vm6170_vm15 = vcmp.eq.f32.partialorder %v1525_v19, 8.507059e+37 }
 0x173   :  { %v4725_v8 = vpop.eup %4724  ;;  %v3164_v25 = vsel %vm6133_vm9, %v4719_v50, %v3160_v18  ;;  %v4275_v55 = vmul.f32 -10.0, %v4163_v23  ;;  %v1528_v24 = vor.u32 1.1754944e-38, %v1527_v26  ;;  %v2927_v46 = vand.u32 2147483648, %v6137_v14 }
 0x174   :  { %v4055_v20 = vmul.f32 0.6931472, %v4725_v8  ;;  %v4727_v31 = vpop.eup %4726  ;;  %v3169_v52 = vsel %vm6139_vm10, %v3168_v13, %v3164_v25  ;;  %vm2921_vm0 = vweird.f32 %v6137_v14  ;;  %v3765_v32 = vand.u32 2147483647, %v6154_v29 }
 0x175   :  { %v3170_v36 = vmul.f32 %v3169_v52, %v6089_v49  ;;  %v1517_v22 = vmul.f32 %v4727_v31, %v6118_v35  ;;  %4388 = vst.msk [vmem:[#allocation5 + $0x18] sm:$0xff] %vm4385_vm14, %v4275_v55  ;;  %v4729_v38 = vpop.eup %4728  ;;  %vm1522_vm13 = vweird.f32 %v4727_v31  ;;  %v610_v49 = vpop.f32.mrf.mxu2  ;;  %vm6185_vm2 = vcmp.eq.f32.partialorder %v2925_v58, 8.507059e+37  ;;  %v6225_v55 = vld [vmem:[#allocation2 + $0x30] sm:$0xff] }
 0x176   :  { %v4219_v27 = vadd.f32 %v4055_v20, %v1703_v53  ;;  %v4731_v43 = vpop.eup %4730  ;;  %v1705_v50 = vmul.f32 0.6931472, %v4729_v38  ;;  %vm6181_vm1 = vmor %vm1521_vm11, %vm1522_vm13  ;;  %vm3761_vm4 = vweird.f32 %v6154_v29  ;;  %v749_v48 = vsub.f32 1.0, %v610_v49 }
 0x177   :  { %4734 = vlog2.f32 %v3170_v36  ;;  %v1518_v41 = vsub.f32 1.0, %v1517_v22  ;;  %v2917_v47 = vmul.f32 %v4731_v43, %v6137_v14  ;;  %vm2922_vm3 = vweird.f32 %v4731_v43 }
 0x178   :  { %v4331_v4 = vmul.f32 -10.0, %v4219_v27  ;;  %4736 = vrcp.f32 %v6154_v29  ;;  %v2037_v28 = vsub.f32 1.0, %v1813_v33  ;;  %v4733_v60 = vpop.eup %4732  ;;  %v2928_v61 = vor.u32 1.1754944e-38, %v2927_v46  ;;  %vm6206_vm6 = vmor %vm2921_vm0, %vm2922_vm3 }
 0x179   :  { %v1519_v21 = vmul.f32 %v4727_v31, %v1518_v41  ;;  %v2918_v56 = vsub.f32 1.0, %v2917_v47  ;;  %v3767_v35 = vand.u32 2147483648, %v6154_v29  ;;  %v6191_v0 = vadd.f32 1e-09, %v610_v49 }
 0x17a   :  { %4444 = vst.msk [vmem:[#allocation5 + $0x1d8] sm:$0xff] %vm4385_vm14, %v4331_v4  ;;  %v6193_v1 = vadd.f32 1e-09, %v749_v48  ;;  %v3945_v42 = vmul.f32 0.6931472, %v4733_v60  ;;  %vm6197_vm5 = vcmp.eq.f32.partialorder %v3765_v32, 8.507059e+37 }
 0x17b   :  { %v1520_v59 = vadd.f32 %v4727_v31, %v1519_v21  ;;  %v2919_v6 = vmul.f32 %v4731_v43, %v2918_v56  ;;  %v2093_v44 = vsub.f32 1.0, %v1869_v57  ;;  %v6211_v10 = vadd.f32 1e-09, %v2037_v28 }
 0x17c   :  { %4738 = vrcp.f32 %v6193_v1  ;;  %v4164_v11 = vadd.f32 %v3945_v42, %v1705_v50  ;;  %v3768_v18 = vor.u32 1.1754944e-38, %v3767_v35  ;;  %v750_v2 = vsub.f32 1.0, %v512_v7 }
 0x17d   :  { %v4735_v5 = vpop.eup %4734  ;;  %v1524_v53 = vsel %vm6181_vm1, %v4727_v31, %v1520_v59  ;;  %v2920_v13 = vadd.f32 %v4731_v43, %v2919_v6  ;;  %v940_v17 = vand.u32 2147483647, %v6193_v1  ;;  %v6219_v25 = vadd.f32 1e-09, %v1813_v33  ;;  %v1870_v59 = vld [vmem:[#allocation2 + $0x1f0] sm:$0xff] }
 0x17e   :  { %v4737_v9 = vpop.eup %4736  ;;  %v4057_v3 = vmul.f32 0.6931472, %v4735_v5  ;;  %v1529_v16 = vsel %vm6170_vm15, %v1528_v24, %v1524_v53  ;;  %v4276_v19 = vmul.f32 -10.0, %v4164_v11  ;;  %v6222_v27 = vadd.f32 1e-09, %v2093_v44 }
 0x17f   :  { %v1530_v12 = vmul.f32 %v1529_v16, %v732_v37  ;;  %v3757_v15 = vmul.f32 %v4737_v9, %v6154_v29  ;;  %vm3762_vm8 = vweird.f32 %v4737_v9  ;;  %v2924_v14 = vsel %vm6206_vm6, %v4731_v43, %v2920_v13 }
 0x180   :  { %v4220_v8 = vadd.f32 %v4057_v3, %v1705_v50  ;;  %v2929_v54 = vsel %vm6185_vm2, %v2928_v61, %v2924_v14  ;;  %4389 = vst [vmem:[#allocation5 + $0x20] sm:$0xff] %v4276_v19  ;;  %vm6230_vm7 = vmor %vm3761_vm4, %vm3762_vm8  ;;  %v942_v36 = vand.u32 2147483648, %v6193_v1  ;;  %v6235_v37 = vadd.f32 1e-09, %v1869_v57 }
 0x181   :  { %4740 = vlog2.f32 %v1530_v12  ;;  %v3758_v20 = vsub.f32 1.0, %v3757_v15  ;;  %v2930_v26 = vmul.f32 %v2929_v54, %v6162_v39  ;;  %v6237_v22 = vadd.f32 1e-09, %v750_v2 }
 0x182   :  { %v4332_v23 = vmul.f32 -10.0, %v4220_v8  ;;  %4742 = vrcp.f32 %v6211_v10  ;;  %v4739_v63 = vpop.eup %4738  ;;  %v6240_v58 = vadd.f32 1e-09, %v512_v7  ;;  %vm936_vm9 = vweird.f32 %v6193_v1 }
 0x183   :  { %v3759_v31 = vmul.f32 %v4737_v9, %v3758_v20  ;;  %4744 = vlog2.f32 %v2930_v26  ;;  %v932_v4 = vmul.f32 %v4739_v63, %v6193_v1  ;;  %v2340_v29 = vand.u32 2147483647, %v6211_v10 }
 0x184   :  { %4445 = vst [vmem:[#allocation5 + $0x1e0] sm:$0xff] %v4332_v23  ;;  %4746 = vrcp.f32 %v6222_v27  ;;  %v2038_v38 = vsub.f32 1.0, %v6225_v55  ;;  %vm6248_vm10 = vcmp.eq.f32.partialorder %v940_v17, 8.507059e+37  ;;  %v2342_v24 = vand.u32 2147483648, %v6211_v10 }
 0x185   :  { %v3760_v39 = vadd.f32 %v4737_v9, %v3759_v31  ;;  %v933_v43 = vsub.f32 1.0, %v932_v4  ;;  %v943_v33 = vor.u32 1.1754944e-38, %v942_v36  ;;  %v3180_v21 = vand.u32 2147483647, %v6222_v27 }
 0x186   :  { %4748 = vrcp.f32 %v6237_v22  ;;  %vm937_vm11 = vweird.f32 %v4739_v63  ;;  %v3182_v34 = vand.u32 2147483648, %v6222_v27  ;;  %vm2336_vm13 = vweird.f32 %v6211_v10 }
 0x187   :  { %v4741_v41 = vpop.eup %4740  ;;  %v3764_v49 = vsel %vm6230_vm7, %v4737_v9, %v3760_v39  ;;  %v934_v50 = vmul.f32 %v4739_v63, %v933_v43  ;;  %vm6261_vm15 = vcmp.eq.f32.partialorder %v2340_v29, 8.507059e+37  ;;  %v2343_v60 = vor.u32 1.1754944e-38, %v2342_v24  ;;  %vm938_vm1 = vmor %vm936_vm9, %vm937_vm11 }
 0x188   :  { %v3769_v46 = vsel %vm6197_vm5, %v3768_v18, %v3764_v49  ;;  %v4743_v47 = vpop.eup %4742  ;;  %v1785_v51 = vmul.f32 0.6931472, %v4741_v41  ;;  %vm3176_vm0 = vweird.f32 %v6222_v27  ;;  %vm6268_vm4 = vcmp.eq.f32.partialorder %v3180_v21, 8.507059e+37 }
 0x189   :  { %v3770_v32 = vmul.f32 %v3769_v46, %v6165_v40  ;;  %v2332_v48 = vmul.f32 %v4743_v47, %v6211_v10  ;;  %v4745_v56 = vpop.eup %4744  ;;  %v935_v28 = vadd.f32 %v4739_v63, %v934_v50  ;;  %vm2337_vm2 = vweird.f32 %v4743_v47  ;;  %v572_v50 = vpop.f32.mrf.mxu3 }
 0x18a   :  { %v4747_v40 = vpop.eup %4746  ;;  %v4025_v61 = vmul.f32 0.6931472, %v4745_v56  ;;  %v3183_v6 = vor.u32 1.1754944e-38, %v3182_v34  ;;  %vm951_vm3 = vweird.f32 %v6237_v22  ;;  %v2094_v62 = vsub.f32 1.0, %v1870_v59  ;;  %vm6281_vm5 = vmor %vm2336_vm13, %vm2337_vm2  ;;  %v1910_v34 = vld [vmem:[#allocation2 + $0x330] sm:$0xff] }
 0x18b   :  { %4750 = vlog2.f32 %v3770_v32  ;;  %v2333_v35 = vsub.f32 1.0, %v2332_v48  ;;  %v939_v42 = vsel %vm938_vm1, %v4739_v63, %v935_v28  ;;  %v3172_v53 = vmul.f32 %v4747_v40, %v6222_v27 }
 0x18c   :  { %v4749_v44 = vpop.eup %4748  ;;  %v4204_v7 = vadd.f32 %v4025_v61, %v1785_v51  ;;  %v944_v9 = vsel %vm6248_vm10, %v943_v33, %v939_v42  ;;  %v6276_v3 = vadd.f32 1e-09, %v2038_v38  ;;  %vm3177_vm6 = vweird.f32 %v4747_v40 }
 0x18d   :  { %v2334_v1 = vmul.f32 %v4743_v47, %v2333_v35  ;;  %v945_v16 = vmul.f32 %v944_v9, %v6191_v0  ;;  %v3173_v11 = vsub.f32 1.0, %v3172_v53  ;;  %v947_v12 = vmul.f32 %v4749_v44, %v6237_v22  ;;  %vm6296_vm8 = vmor %vm3176_vm0, %vm3177_vm6 }
 0x18e   :  { %v4316_v13 = vmul.f32 -10.0, %v4204_v7  ;;  %v6286_v8 = vadd.f32 1e-09, %v2094_v62  ;;  %4752 = vrcp.f32 %v6276_v3  ;;  %v955_v0 = vand.u32 2147483647, %v6237_v22 }
 0x18f   :  { %v2335_v15 = vadd.f32 %v4743_v47, %v2334_v1  ;;  %v3174_v2 = vmul.f32 %v4747_v40, %v3173_v11  ;;  %v948_v19 = vsub.f32 1.0, %v947_v12  ;;  %v957_v10 = vand.u32 2147483648, %v6237_v22  ;;  %v613_v12 = vpop.f32.mrf.mxu2 }
 0x190   :  { %4429 = vst [vmem:[#allocation5 + $0x160] sm:$0xff] %v4316_v13  ;;  %4754 = vlog2.f32 %v945_v16  ;;  %vm952_vm7 = vweird.f32 %v4749_v44  ;;  %v2355_v52 = vand.u32 2147483647, %v6276_v3  ;;  %v2357_v36 = vand.u32 2147483648, %v6276_v3 }
 0x191   :  { %v4751_v18 = vpop.eup %4750  ;;  %v2339_v20 = vsel %vm6281_vm5, %v4743_v47, %v2335_v15  ;;  %v3175_v17 = vadd.f32 %v4747_v40, %v3174_v2  ;;  %v949_v26 = vmul.f32 %v4749_v44, %v948_v19  ;;  %4756 = vrcp.f32 %v6286_v8  ;;  %vm953_vm9 = vmor %vm951_vm3, %vm952_vm7  ;;  %v1854_v47 = vld [vmem:[#allocation2 + $0x170] sm:$0xff]  ;;  %v364_v19 = vpop.f32.mrf.mxu0 }
 0x192   :  { %v4137_v14 = vmul.f32 0.6931472, %v4751_v18  ;;  %v2344_v54 = vsel %vm6261_vm15, %v2343_v60, %v2339_v20  ;;  %v1926_v4 = vadd.f32 1e-09, %v6225_v55  ;;  %v6309_v29 = vadd.f32 1e-09, %v1870_v59  ;;  %4571 = vmatmul.msk.f32.gmra.mxu1 %vm202_vm12, %v364_v19  ;;  %4599 = vmatmul.msk.f32.gmra.mxu2 %vm202_vm12, %v364_v19 }
 0x193   :  { %v2345_v63 = vmul.f32 %v2344_v54, %v6219_v25  ;;  %v3179_v27 = vsel %vm6296_vm8, %v4747_v40, %v3175_v17  ;;  %v950_v39 = vadd.f32 %v4749_v44, %v949_v26  ;;  %v958_v25 = vor.u32 1.1754944e-38, %v957_v10 }
 0x194   :  { %v4260_v31 = vadd.f32 %v4137_v14, %v1785_v51  ;;  %v4753_v38 = vpop.eup %4752  ;;  %v3184_v49 = vsel %vm6268_vm4, %v3183_v6, %v3179_v27  ;;  %vm956_vm10 = vcmp.eq.f32.partialorder %v955_v0, 8.507059e+37  ;;  %vm2351_vm11 = vweird.f32 %v6276_v3 }
 0x195   :  { %4758 = vlog2.f32 %v2345_v63  ;;  %v3185_v43 = vmul.f32 %v3184_v49, %v6235_v37  ;;  %v954_v45 = vsel %vm953_vm9, %v4749_v44, %v950_v39  ;;  %v2347_v24 = vmul.f32 %v4753_v38, %v6276_v3  ;;  %v1815_v49 = vld [vmem:[#allocation2 + $0x38] sm:$0xff] }
 0x196   :  { %v4372_v41 = vmul.f32 -10.0, %v4260_v31  ;;  %v4755_v55 = vpop.eup %4754  ;;  %v959_v46 = vsel %vm956_vm10, %v958_v25, %v954_v45  ;;  %vm6319_vm13 = vcmp.eq.f32.partialorder %v2355_v52, 8.507059e+37  ;;  %v2358_v21 = vor.u32 1.1754944e-38, %v2357_v36 }
 0x197   :  { %v4757_v22 = vpop.eup %4756  ;;  %4760 = vlog2.f32 %v3185_v43  ;;  %v960_v32 = vmul.f32 %v959_v46, %v6240_v58  ;;  %v2348_v37 = vsub.f32 1.0, %v2347_v24  ;;  %vm2352_vm15 = vweird.f32 %v4753_v38 }
 0x198   :  { %4485 = vst [vmem:[#allocation5 + $0x320] sm:$0xff] %v4372_v41  ;;  %v3187_v51 = vmul.f32 %v4757_v22, %v6286_v8  ;;  %v3195_v48 = vand.u32 2147483647, %v6286_v8  ;;  %v3197_v57 = vand.u32 2147483648, %v6286_v8  ;;  %v790_v59 = vsub.f32 1.0, %v572_v50  ;;  %vm6330_vm1 = vmor %vm2351_vm11, %vm2352_vm15 }
 0x199   :  { %v1707_v56 = vmul.f32 0.6931472, %v4755_v55  ;;  %v2349_v28 = vmul.f32 %v4753_v38, %v2348_v37  ;;  %vm3191_vm0 = vweird.f32 %v6286_v8  ;;  %v2078_v60 = vsub.f32 1.0, %v1854_v47 }
 0x19a   :  { %v3188_v61 = vsub.f32 1.0, %v3187_v51  ;;  %vm3192_vm2 = vweird.f32 %v4757_v22  ;;  %v6334_v35 = vadd.f32 1e-09, %v790_v59  ;;  %v2134_v5 = vsub.f32 1.0, %v1910_v34 }
 0x19b   :  { %v4759_v40 = vpop.eup %4758  ;;  %4762 = vlog2.f32 %v960_v32  ;;  %v2350_v53 = vadd.f32 %v4753_v38, %v2349_v28  ;;  %v6336_v6 = vadd.f32 1e-09, %v2078_v60  ;;  %vm6338_vm4 = vcmp.eq.f32.partialorder %v3195_v48, 8.507059e+37  ;;  %vm6347_vm3 = vmor %vm3191_vm0, %vm3192_vm2 }
 0x19c   :  { %v3947_v42 = vmul.f32 0.6931472, %v4759_v40  ;;  %v3189_v62 = vmul.f32 %v4757_v22, %v3188_v61  ;;  %v3198_v7 = vor.u32 1.1754944e-38, %v3197_v57  ;;  %4764 = vrcp.f32 %v6334_v35 }
 0x19d   :  { %v4761_v9 = vpop.eup %4760  ;;  %v2354_v3 = vsel %vm6330_vm1, %v4753_v38, %v2350_v53  ;;  %v6351_v30 = vadd.f32 1e-09, %v572_v50  ;;  %v6353_v11 = vadd.f32 1e-09, %v1854_v47  ;;  %v6357_v2 = vadd.f32 1e-09, %v2134_v5 }
 0x19e   :  { %v4165_v1 = vadd.f32 %v3947_v42, %v1707_v56  ;;  %v4059_v13 = vmul.f32 0.6931472, %v4761_v9  ;;  %v2359_v15 = vsel %vm6319_vm13, %v2358_v21, %v2354_v3  ;;  %v3190_v18 = vadd.f32 %v4757_v22, %v3189_v62  ;;  %v1871_v21 = vld [vmem:[#allocation2 + $0x1f8] sm:$0xff] }
 0x19f   :  { %v2360_v10 = vmul.f32 %v2359_v15, %v1926_v4  ;;  %v1555_v8 = vand.u32 2147483647, %v6334_v35  ;;  %4766 = vrcp.f32 %v6336_v6  ;;  %v1557_v23 = vand.u32 2147483648, %v6334_v35 }
 0x1a0   :  { %v4277_v0 = vmul.f32 -10.0, %v4165_v1  ;;  %v4221_v14 = vadd.f32 %v4059_v13, %v1707_v56  ;;  %v3194_v20 = vsel %vm6347_vm3, %v4757_v22, %v3190_v18  ;;  %v751_v54 = vsub.f32 1.0, %v613_v12 }
 0x1a1   :  { %v4763_v17 = vpop.eup %4762  ;;  %v3199_v26 = vsel %vm6338_vm4, %v3198_v7, %v3194_v20  ;;  %4768 = vlog2.f32 %v2360_v10  ;;  %v6369_v31 = vadd.f32 1e-09, %v1910_v34  ;;  %v6371_v63 = vadd.f32 1e-09, %v613_v12 }
 0x1a2   :  { %4390 = vst.msk [vmem:[#allocation5 + $0x28] sm:$0xff] %vm4385_vm14, %v4277_v0  ;;  %v4765_v52 = vpop.eup %4764  ;;  %v4333_v36 = vmul.f32 -10.0, %v4221_v14  ;;  %v3200_v27 = vmul.f32 %v3199_v26, %v6309_v29  ;;  %v2955_v39 = vand.u32 2147483647, %v6336_v6  ;;  %4770 = vrcp.f32 %v6357_v2 }
 0x1a3   :  { %v1547_v4 = vmul.f32 %v4765_v52, %v6334_v35  ;;  %vm1551_vm12 = vweird.f32 %v6334_v35  ;;  %vm6378_vm5 = vcmp.eq.f32.partialorder %v1555_v8, 8.507059e+37  ;;  %v2957_v41 = vand.u32 2147483648, %v6336_v6 }
 0x1a4   :  { %4446 = vst.msk [vmem:[#allocation5 + $0x1e8] sm:$0xff] %vm4385_vm14, %v4333_v36  ;;  %v1709_v25 = vmul.f32 0.6931472, %v4763_v17  ;;  %4772 = vlog2.f32 %v3200_v27  ;;  %v1558_v29 = vor.u32 1.1754944e-38, %v1557_v23  ;;  %v6384_v43 = vadd.f32 1e-09, %v751_v54  ;;  %v515_v36 = vpop.f32.mrf.mxu1 }
 0x1a5   :  { %v4767_v45 = vpop.eup %4766  ;;  %v1548_v24 = vsub.f32 1.0, %v1547_v4  ;;  %vm1552_vm6 = vweird.f32 %v4765_v52  ;;  %vm2951_vm8 = vweird.f32 %v6336_v6  ;;  %v3795_v55 = vand.u32 2147483647, %v6357_v2 }
 0x1a6   :  { %v2947_v46 = vmul.f32 %v4767_v45, %v6336_v6  ;;  %vm6389_vm7 = vcmp.eq.f32.partialorder %v2955_v39, 8.507059e+37  ;;  %vm3791_vm9 = vweird.f32 %v6357_v2  ;;  %v2039_v47 = vsub.f32 1.0, %v1815_v49  ;;  %vm6399_vm10 = vmor %vm1551_vm12, %vm1552_vm6 }
 0x1a7   :  { %v4769_v22 = vpop.eup %4768  ;;  %v1549_v32 = vmul.f32 %v4765_v52, %v1548_v24  ;;  %v2958_v37 = vor.u32 1.1754944e-38, %v2957_v41  ;;  %v3797_v50 = vand.u32 2147483648, %v6357_v2  ;;  %4774 = vrcp.f32 %v6384_v43  ;;  %v1816_v24 = vld [vmem:[#allocation2 + $0x40] sm:$0xff] }
 0x1a8   :  { %v4771_v34 = vpop.eup %4770  ;;  %v3949_v51 = vmul.f32 0.6931472, %v4769_v22  ;;  %v2948_v57 = vsub.f32 1.0, %v2947_v46  ;;  %vm2952_vm11 = vweird.f32 %v4767_v45  ;;  %v6403_v59 = vadd.f32 1e-09, %v1815_v49  ;;  %v1872_v22 = vld [vmem:[#allocation2 + $0x200] sm:$0xff] }
 0x1a9   :  { %v1550_v56 = vadd.f32 %v4765_v52, %v1549_v32  ;;  %v3787_v28 = vmul.f32 %v4771_v34, %v6357_v2  ;;  %vm6406_vm13 = vcmp.eq.f32.partialorder %v3795_v55, 8.507059e+37  ;;  %v2095_v40 = vsub.f32 1.0, %v1871_v21  ;;  %vm6417_vm15 = vmor %vm2951_vm8, %vm2952_vm11 }
 0x1aa   :  { %v4773_v58 = vpop.eup %4772  ;;  %v4166_v61 = vadd.f32 %v3949_v51, %v1709_v25  ;;  %v2949_v5 = vmul.f32 %v4767_v45, %v2948_v57  ;;  %v970_v35 = vand.u32 2147483647, %v6384_v43  ;;  %v6411_v42 = vadd.f32 1e-09, %v2039_v47 }
 0x1ab   :  { %v4061_v53 = vmul.f32 0.6931472, %v4773_v58  ;;  %v1554_v62 = vsel %vm6399_vm10, %v4765_v52, %v1550_v56  ;;  %v3788_v7 = vsub.f32 1.0, %v3787_v28  ;;  %vm3792_vm0 = vweird.f32 %v4771_v34 }
 0x1ac   :  { %v4278_v9 = vmul.f32 -10.0, %v4166_v61  ;;  %v1559_v1 = vsel %vm6378_vm5, %v1558_v29, %v1554_v62  ;;  %v2950_v3 = vadd.f32 %v4767_v45, %v2949_v5  ;;  %4776 = vrcp.f32 %v6411_v42  ;;  %vm6431_vm1 = vmor %vm3791_vm9, %vm3792_vm0 }
 0x1ad   :  { %v4775_v16 = vpop.eup %4774  ;;  %v4222_v12 = vadd.f32 %v4061_v53, %v1709_v25  ;;  %v1560_v13 = vmul.f32 %v1559_v1, %v6351_v30  ;;  %v3789_v15 = vmul.f32 %v4771_v34, %v3788_v7  ;;  %v6425_v18 = vadd.f32 1e-09, %v2095_v40 }
 0x1ae   :  { %4391 = vst [vmem:[#allocation5 + $0x30] sm:$0xff] %v4278_v9  ;;  %v2954_v6 = vsel %vm6417_vm15, %v4767_v45, %v2950_v3  ;;  %v3798_v0 = vor.u32 1.1754944e-38, %v3797_v50  ;;  %v962_v10 = vmul.f32 %v4775_v16, %v6384_v43  ;;  %v972_v8 = vand.u32 2147483648, %v6384_v43 }
 0x1af   :  { %v4334_v14 = vmul.f32 -10.0, %v4222_v12  ;;  %4778 = vlog2.f32 %v1560_v13  ;;  %v2959_v30 = vsel %vm6389_vm7, %v2958_v37, %v2954_v6  ;;  %v3790_v20 = vadd.f32 %v4771_v34, %v3789_v15 }
 0x1b0   :  { %v2960_v23 = vmul.f32 %v2959_v30, %v6353_v11  ;;  %v963_v54 = vsub.f32 1.0, %v962_v10  ;;  %v6440_v17 = vadd.f32 1e-09, %v1871_v21  ;;  %v2370_v2 = vand.u32 2147483647, %v6411_v42 }
 0x1b1   :  { %4447 = vst [vmem:[#allocation5 + $0x1f0] sm:$0xff] %v4334_v14  ;;  %v3794_v26 = vsel %vm6431_vm1, %v4771_v34, %v3790_v20  ;;  %vm966_vm2 = vweird.f32 %v6384_v43  ;;  %vm6446_vm4 = vcmp.eq.f32.partialorder %v970_v35, 8.507059e+37  ;;  %4780 = vrcp.f32 %v6425_v18 }
 0x1b2   :  { %v4777_v27 = vpop.eup %4776  ;;  %v3799_v11 = vsel %vm6406_vm13, %v3798_v0, %v3794_v26  ;;  %4782 = vlog2.f32 %v2960_v23  ;;  %v964_v39 = vmul.f32 %v4775_v16, %v963_v54  ;;  %vm967_vm3 = vweird.f32 %v4775_v16 }
 0x1b3   :  { %v3800_v4 = vmul.f32 %v3799_v11, %v6369_v31  ;;  %v973_v38 = vor.u32 1.1754944e-38, %v972_v8  ;;  %v2362_v41 = vmul.f32 %v4777_v27, %v6411_v42  ;;  %vm2366_vm12 = vweird.f32 %v6411_v42  ;;  %vm968_vm6 = vmor %vm966_vm2, %vm967_vm3  ;;  %v575_v11 = vpop.f32.mrf.mxu3 }
 0x1b4   :  { %v965_v49 = vadd.f32 %v4775_v16, %v964_v39  ;;  %vm6456_vm5 = vcmp.eq.f32.partialorder %v2370_v2, 8.507059e+37  ;;  %v2372_v29 = vand.u32 2147483648, %v6411_v42  ;;  %v752_v45 = vsub.f32 1.0, %v515_v36 }
 0x1b5   :  { %v4779_v55 = vpop.eup %4778  ;;  %4784 = vlog2.f32 %v3800_v4  ;;  %v2363_v31 = vsub.f32 1.0, %v2362_v41  ;;  %vm2367_vm8 = vweird.f32 %v4777_v27  ;;  %v3210_v46 = vand.u32 2147483647, %v6425_v18 }
 0x1b6   :  { %v969_v33 = vsel %vm968_vm6, %v4775_v16, %v965_v49  ;;  %vm3206_vm7 = vweird.f32 %v6425_v18  ;;  %v3212_v21 = vand.u32 2147483648, %v6425_v18  ;;  %v6466_v47 = vadd.f32 1e-09, %v752_v45  ;;  %vm6473_vm9 = vmor %vm2366_vm12, %vm2367_vm8  ;;  %v1856_v49 = vld [vmem:[#allocation2 + $0x180] sm:$0xff] }
 0x1b7   :  { %v4781_v32 = vpop.eup %4780  ;;  %v1789_v37 = vmul.f32 0.6931472, %v4779_v55  ;;  %v974_v50 = vsel %vm6446_vm4, %v973_v38, %v969_v33  ;;  %v2364_v34 = vmul.f32 %v4777_v27, %v2363_v31  ;;  %v2040_v43 = vsub.f32 1.0, %v1816_v24  ;;  %v1912_v45 = vld [vmem:[#allocation2 + $0x340] sm:$0xff]  ;;  %v6672_v38 = vld [vmem:[#allocation2 + $0x210] sm:$0xff] }
 0x1b8   :  { %v4783_v51 = vpop.eup %4782  ;;  %v975_v48 = vmul.f32 %v974_v50, %v6371_v63  ;;  %v2373_v56 = vor.u32 1.1754944e-38, %v2372_v29  ;;  %v3202_v28 = vmul.f32 %v4781_v32, %v6425_v18  ;;  %4786 = vrcp.f32 %v6466_v47 }
 0x1b9   :  { %v4029_v60 = vmul.f32 0.6931472, %v4783_v51  ;;  %v2365_v40 = vadd.f32 %v4777_v27, %v2364_v34  ;;  %vm6479_vm10 = vcmp.eq.f32.partialorder %v3210_v46, 8.507059e+37  ;;  %v2096_v61 = vsub.f32 1.0, %v1872_v22 }
 0x1ba   :  { %v3203_v5 = vsub.f32 1.0, %v3202_v28  ;;  %vm3207_vm11 = vweird.f32 %v4781_v32  ;;  %v6483_v63 = vadd.f32 1e-09, %v515_v36  ;;  %v6485_v35 = vadd.f32 1e-09, %v2040_v43 }
 0x1bb   :  { %v4785_v42 = vpop.eup %4784  ;;  %v4206_v53 = vadd.f32 %v4029_v60, %v1789_v37  ;;  %4788 = vlog2.f32 %v975_v48  ;;  %v2369_v62 = vsel %vm6473_vm9, %v4777_v27, %v2365_v40  ;;  %v3213_v44 = vor.u32 1.1754944e-38, %v3212_v21  ;;  %vm6495_vm13 = vmor %vm3206_vm7, %vm3207_vm11 }
 0x1bc   :  { %v4141_v7 = vmul.f32 0.6931472, %v4785_v42  ;;  %v2374_v9 = vsel %vm6456_vm5, %v2373_v56, %v2369_v62  ;;  %v3204_v1 = vmul.f32 %v4781_v32, %v3203_v5  ;;  %v985_v3 = vand.u32 2147483647, %v6466_v47 }
 0x1bd   :  { %v4318_v16 = vmul.f32 -10.0, %v4206_v53  ;;  %v2375_v12 = vmul.f32 %v2374_v9, %v6403_v59  ;;  %v6499_v15 = vadd.f32 1e-09, %v2096_v61  ;;  %4790 = vrcp.f32 %v6485_v35 }
 0x1be   :  { %v4787_v6 = vpop.eup %4786  ;;  %v4262_v19 = vadd.f32 %v4141_v7, %v1789_v37  ;;  %v3205_v0 = vadd.f32 %v4781_v32, %v3204_v1  ;;  %v987_v10 = vand.u32 2147483648, %v6466_v47  ;;  %v6503_v8 = vadd.f32 1e-09, %v1816_v24 }
 0x1bf   :  { %4431 = vst [vmem:[#allocation5 + $0x170] sm:$0xff] %v4318_v16  ;;  %4792 = vlog2.f32 %v2375_v12  ;;  %v977_v59 = vmul.f32 %v4787_v6, %v6466_v47  ;;  %v6506_v18 = vadd.f32 1e-09, %v1872_v22  ;;  %v2385_v14 = vand.u32 2147483647, %v6485_v35 }
 0x1c0   :  { %v4374_v30 = vmul.f32 -10.0, %v4262_v19  ;;  %v3209_v20 = vsel %vm6495_vm13, %v4781_v32, %v3205_v0  ;;  %vm981_vm15 = vweird.f32 %v6466_v47  ;;  %v2387_v23 = vand.u32 2147483648, %v6485_v35 }
 0x1c1   :  { %v4789_v54 = vpop.eup %4788  ;;  %v3214_v2 = vsel %vm6479_vm10, %v3213_v44, %v3209_v20  ;;  %v978_v26 = vsub.f32 1.0, %v977_v59  ;;  %vm6515_vm0 = vcmp.eq.f32.partialorder %v985_v3, 8.507059e+37  ;;  %4794 = vrcp.f32 %v6499_v15  ;;  %v616_v59 = vpop.f32.mrf.mxu2 }
 0x1c2   :  { %4487 = vst [vmem:[#allocation5 + $0x330] sm:$0xff] %v4374_v30  ;;  %v3215_v36 = vmul.f32 %v3214_v2, %v6440_v17  ;;  %vm982_vm1 = vweird.f32 %v4787_v6  ;;  %v988_v27 = vor.u32 1.1754944e-38, %v987_v10  ;;  %vm2381_vm2 = vweird.f32 %v6485_v35 }
 0x1c3   :  { %v4791_v39 = vpop.eup %4790  ;;  %v979_v4 = vmul.f32 %v4787_v6, %v978_v26  ;;  %vm6522_vm4 = vcmp.eq.f32.partialorder %v2385_v14, 8.507059e+37  ;;  %vm3221_vm3 = vweird.f32 %v6499_v15  ;;  %v792_v41 = vsub.f32 1.0, %v575_v11  ;;  %vm983_vm12 = vmor %vm981_vm15, %vm982_vm1 }
 0x1c4   :  { %v1711_v25 = vmul.f32 0.6931472, %v4789_v54  ;;  %4796 = vlog2.f32 %v3215_v36  ;;  %v2377_v29 = vmul.f32 %v4791_v39, %v6485_v35  ;;  %v2388_v17 = vor.u32 1.1754944e-38, %v2387_v23 }
 0x1c5   :  { %v4793_v24 = vpop.eup %4792  ;;  %v980_v55 = vadd.f32 %v4787_v6, %v979_v4  ;;  %v3225_v31 = vand.u32 2147483647, %v6499_v15  ;;  %v3227_v46 = vand.u32 2147483648, %v6499_v15  ;;  %v6530_v33 = vadd.f32 1e-09, %v792_v41  ;;  %v1817_v4 = vld [vmem:[#allocation2 + $0x48] sm:$0xff] }
 0x1c6   :  { %v3951_v21 = vmul.f32 0.6931472, %v4793_v24  ;;  %v2378_v22 = vsub.f32 1.0, %v2377_v29  ;;  %vm2382_vm5 = vweird.f32 %v4791_v39  ;;  %v2080_v32 = vsub.f32 1.0, %v1856_v49  ;;  %v1873_v29 = vld [vmem:[#allocation2 + $0x208] sm:$0xff] }
 0x1c7   :  { %v4795_v37 = vpop.eup %4794  ;;  %v984_v50 = vsel %vm983_vm12, %v4787_v6, %v980_v55  ;;  %v6535_v34 = vadd.f32 1e-09, %v575_v11  ;;  %4798 = vrcp.f32 %v6530_v33  ;;  %v2136_v43 = vsub.f32 1.0, %v1912_v45  ;;  %vm6544_vm6 = vmor %vm2381_vm2, %vm2382_vm5 }
 0x1c8   :  { %v4167_v51 = vadd.f32 %v3951_v21, %v1711_v25  ;;  %v989_v48 = vsel %vm6515_vm0, %v988_v27, %v984_v50  ;;  %v2379_v57 = vmul.f32 %v4791_v39, %v2378_v22  ;;  %v3217_v56 = vmul.f32 %v4795_v37, %v6499_v15 }
 0x1c9   :  { %v990_v47 = vmul.f32 %v989_v48, %v6483_v63  ;;  %vm3222_vm8 = vweird.f32 %v4795_v37  ;;  %v6548_v60 = vadd.f32 1e-09, %v1856_v49  ;;  %v6550_v40 = vadd.f32 1e-09, %v1912_v45 }
 0x1ca   :  { %v4797_v58 = vpop.eup %4796  ;;  %v4279_v61 = vmul.f32 -10.0, %v4167_v51  ;;  %v2380_v5 = vadd.f32 %v4791_v39, %v2379_v57  ;;  %v3218_v42 = vsub.f32 1.0, %v3217_v56  ;;  %v6552_v53 = vadd.f32 1e-09, %v2080_v32  ;;  %vm6569_vm9 = vmor %vm3221_vm3, %vm3222_vm8 }
 0x1cb   :  { %v4063_v62 = vmul.f32 0.6931472, %v4797_v58  ;;  %4800 = vlog2.f32 %v990_v47  ;;  %vm6554_vm7 = vcmp.eq.f32.partialorder %v3225_v31, 8.507059e+37  ;;  %v6558_v35 = vadd.f32 1e-09, %v2136_v43 }
 0x1cc   :  { %4392 = vst.msk [vmem:[#allocation5 + $0x38] sm:$0xff] %vm4385_vm14, %v4279_v61  ;;  %v2384_v44 = vsel %vm6544_vm6, %v4791_v39, %v2380_v5  ;;  %v3219_v7 = vmul.f32 %v4795_v37, %v3218_v42  ;;  %v3228_v9 = vor.u32 1.1754944e-38, %v3227_v46  ;;  %4802 = vrcp.f32 %v6552_v53 }
 0x1cd   :  { %v4799_v1 = vpop.eup %4798  ;;  %v4223_v3 = vadd.f32 %v4063_v62, %v1711_v25  ;;  %v2389_v16 = vsel %vm6522_vm4, %v2388_v17, %v2384_v44  ;;  %vm1581_vm10 = vweird.f32 %v6530_v33  ;;  %v1585_v13 = vand.u32 2147483647, %v6530_v33 }
 0x1ce   :  { %v2390_v6 = vmul.f32 %v2389_v16, %v6503_v8  ;;  %v3220_v19 = vadd.f32 %v4795_v37, %v3219_v7  ;;  %v1577_v0 = vmul.f32 %v4799_v1, %v6530_v33  ;;  %v1587_v10 = vand.u32 2147483648, %v6530_v33 }
 0x1cf   :  { %v4335_v14 = vmul.f32 -10.0, %v4223_v3  ;;  %v2985_v30 = vand.u32 2147483647, %v6552_v53  ;;  %v2987_v15 = vand.u32 2147483648, %v6552_v53  ;;  %4804 = vrcp.f32 %v6558_v35 }
 0x1d0   :  { %v3224_v20 = vsel %vm6569_vm9, %v4795_v37, %v3220_v19  ;;  %4806 = vlog2.f32 %v2390_v6  ;;  %v1578_v23 = vsub.f32 1.0, %v1577_v0  ;;  %vm1582_vm11 = vweird.f32 %v4799_v1 }
 0x1d1   :  { %v4801_v8 = vpop.eup %4800  ;;  %4448 = vst.msk [vmem:[#allocation5 + $0x1f8] sm:$0xff] %vm4385_vm14, %v4335_v14  ;;  %v3229_v54 = vsel %vm6554_vm7, %v3228_v9, %v3224_v20  ;;  %vm6586_vm13 = vcmp.eq.f32.partialorder %v1585_v13, 8.507059e+37  ;;  %v6590_v26 = vadd.f32 1e-09, %v616_v59  ;;  %v753_v52 = vsub.f32 1.0, %v616_v59  ;;  %vm6596_vm0 = vmor %vm1581_vm10, %vm1582_vm11 }
 0x1d2   :  { %v4803_v36 = vpop.eup %4802  ;;  %v3230_v27 = vmul.f32 %v3229_v54, %v6506_v18  ;;  %v1579_v11 = vmul.f32 %v4799_v1, %v1578_v23  ;;  %v1588_v39 = vor.u32 1.1754944e-38, %v1587_v10  ;;  %vm2981_vm15 = vweird.f32 %v6552_v53 }
 0x1d3   :  { %v2977_v41 = vmul.f32 %v4803_v36, %v6552_v53  ;;  %vm6601_vm1 = vcmp.eq.f32.partialorder %v2985_v30, 8.507059e+37  ;;  %v2988_v25 = vor.u32 1.1754944e-38, %v2987_v15  ;;  %v3825_v18 = vand.u32 2147483647, %v6558_v35  ;;  %v6655_v30 = vpop.f32.mrf.mxu1 }
 0x1d4   :  { %4808 = vlog2.f32 %v3230_v27  ;;  %v1580_v17 = vadd.f32 %v4799_v1, %v1579_v11  ;;  %v3827_v45 = vand.u32 2147483648, %v6558_v35  ;;  %v6607_v24 = vadd.f32 1e-09, %v753_v52  ;;  %v1818_v11 = vld [vmem:[#allocation2 + $0x50] sm:$0xff] }
 0x1d5   :  { %v4805_v55 = vpop.eup %4804  ;;  %v1713_v31 = vmul.f32 0.6931472, %v4801_v8  ;;  %v2978_v46 = vsub.f32 1.0, %v2977_v41  ;;  %vm2982_vm2 = vweird.f32 %v4803_v36  ;;  %v2041_v33 = vsub.f32 1.0, %v1817_v4 }
 0x1d6   :  { %v4807_v21 = vpop.eup %4806  ;;  %v1584_v22 = vsel %vm6596_vm0, %v4799_v1, %v1580_v17  ;;  %v3817_v32 = vmul.f32 %v4805_v55, %v6558_v35  ;;  %4810 = vrcp.f32 %v6607_v24  ;;  %v2097_v37 = vsub.f32 1.0, %v1873_v29  ;;  %vm6619_vm3 = vmor %vm2981_vm15, %vm2982_vm2 }
 0x1d7   :  { %v3953_v50 = vmul.f32 0.6931472, %v4807_v21  ;;  %v1589_v43 = vsel %vm6586_vm13, %v1588_v39, %v1584_v22  ;;  %v2979_v51 = vmul.f32 %v4803_v36, %v2978_v46  ;;  %vm3821_vm4 = vweird.f32 %v6558_v35 }
 0x1d8   :  { %v1590_v48 = vmul.f32 %v1589_v43, %v6535_v34  ;;  %v3818_v56 = vsub.f32 1.0, %v3817_v32  ;;  %vm3822_vm12 = vweird.f32 %v4805_v55  ;;  %v6623_v47 = vadd.f32 1e-09, %v1817_v4 }
 0x1d9   :  { %v4168_v28 = vadd.f32 %v3953_v50, %v1713_v31  ;;  %v2980_v58 = vadd.f32 %v4803_v36, %v2979_v51  ;;  %vm6625_vm5 = vcmp.eq.f32.partialorder %v3825_v18, 8.507059e+37  ;;  %v6629_v5 = vadd.f32 1e-09, %v2041_v33  ;;  %vm6637_vm6 = vmor %vm3821_vm4, %vm3822_vm12 }
 0x1da   :  { %v4809_v42 = vpop.eup %4808  ;;  %4812 = vlog2.f32 %v1590_v48  ;;  %v3819_v34 = vmul.f32 %v4805_v55, %v3818_v56  ;;  %v3828_v53 = vor.u32 1.1754944e-38, %v3827_v45  ;;  %v6631_v62 = vadd.f32 1e-09, %v2097_v37 }
 0x1db   :  { %v4065_v63 = vmul.f32 0.6931472, %v4809_v42  ;;  %v4280_v44 = vmul.f32 -10.0, %v4168_v28  ;;  %v2984_v7 = vsel %vm6619_vm3, %v4803_v36, %v2980_v58  ;;  %4814 = vrcp.f32 %v6629_v5 }
 0x1dc   :  { %v4811_v1 = vpop.eup %4810  ;;  %v2989_v3 = vsel %vm6601_vm1, %v2988_v25, %v2984_v7  ;;  %v3820_v16 = vadd.f32 %v4805_v55, %v3819_v34  ;;  %v1000_v12 = vand.u32 2147483647, %v6607_v24  ;;  %v1002_v13 = vand.u32 2147483648, %v6607_v24 }
 0x1dd   :  { %v4224_v6 = vadd.f32 %v4065_v63, %v1713_v31  ;;  %4393 = vst [vmem:[#allocation5 + $0x40] sm:$0xff] %v4280_v44  ;;  %v2990_v19 = vmul.f32 %v2989_v3, %v6548_v60  ;;  %v992_v35 = vmul.f32 %v4811_v1, %v6607_v24  ;;  %v6648_v0 = vadd.f32 1e-09, %v1873_v29 }
 0x1de   :  { %v3824_v10 = vsel %vm6637_vm6, %v4805_v55, %v3820_v16  ;;  %v2400_v59 = vand.u32 2147483647, %v6629_v5  ;;  %v2402_v14 = vand.u32 2147483648, %v6629_v5  ;;  %4816 = vrcp.f32 %v6631_v62 }
 0x1df   :  { %v4336_v15 = vmul.f32 -10.0, %v4224_v6  ;;  %v3829_v20 = vsel %vm6625_vm5, %v3828_v53, %v3824_v10  ;;  %4818 = vlog2.f32 %v2990_v19  ;;  %v993_v60 = vsub.f32 1.0, %v992_v35 }
 0x1e0   :  { %v4813_v23 = vpop.eup %4812  ;;  %v3830_v8 = vmul.f32 %v3829_v20, %v6550_v40  ;;  %vm996_vm8 = vweird.f32 %v6607_v24  ;;  %vm6661_vm7 = vcmp.eq.f32.partialorder %v1000_v12, 8.507059e+37  ;;  %v1003_v2 = vor.u32 1.1754944e-38, %v1002_v13 }
 0x1e1   :  { %v4815_v52 = vpop.eup %4814  ;;  %4449 = vst [vmem:[#allocation5 + $0x200] sm:$0xff] %v4336_v15  ;;  %v994_v36 = vmul.f32 %v4811_v1, %v993_v60  ;;  %vm997_vm9 = vweird.f32 %v4811_v1  ;;  %vm2396_vm10 = vweird.f32 %v6629_v5  ;;  %v754_v27 = vsub.f32 1.0, %v6655_v30 }
 0x1e2   :  { %4820 = vlog2.f32 %v3830_v8  ;;  %v2392_v39 = vmul.f32 %v4815_v52, %v6629_v5  ;;  %vm6668_vm11 = vcmp.eq.f32.partialorder %v2400_v59, 8.507059e+37  ;;  %v2403_v4 = vor.u32 1.1754944e-38, %v2402_v14  ;;  %vm998_vm13 = vmor %vm996_vm8, %vm997_vm9  ;;  %v1858_v8 = vld [vmem:[#allocation2 + $0x190] sm:$0xff] }
 0x1e3   :  { %v1793_v41 = vmul.f32 0.6931472, %v4813_v23  ;;  %v995_v49 = vadd.f32 %v4811_v1, %v994_v36  ;;  %v3240_v25 = vand.u32 2147483647, %v6631_v62  ;;  %v6675_v18 = vadd.f32 1e-09, %v754_v27 }
 0x1e4   :  { %v4817_v29 = vpop.eup %4816  ;;  %v2393_v17 = vsub.f32 1.0, %v2392_v39  ;;  %vm2397_vm15 = vweird.f32 %v4815_v52  ;;  %v3242_v45 = vand.u32 2147483648, %v6631_v62  ;;  %v2042_v55 = vsub.f32 1.0, %v1818_v11 }
 0x1e5   :  { %v4819_v31 = vpop.eup %4818  ;;  %v999_v46 = vsel %vm998_vm13, %v4811_v1, %v995_v49  ;;  %v3232_v33 = vmul.f32 %v4817_v29, %v6631_v62  ;;  %4822 = vrcp.f32 %v6675_v18  ;;  %v2098_v21 = vsub.f32 1.0, %v6672_v38  ;;  %vm6689_vm1 = vmor %vm2396_vm10, %vm2397_vm15 }
 0x1e6   :  { %v4033_v22 = vmul.f32 0.6931472, %v4819_v31  ;;  %v1004_v32 = vsel %vm6661_vm7, %v1003_v2, %v999_v46  ;;  %v2394_v37 = vmul.f32 %v4815_v52, %v2393_v17  ;;  %vm3236_vm0 = vweird.f32 %v6631_v62 }
 0x1e7   :  { %v1005_v24 = vmul.f32 %v1004_v32, %v6590_v26  ;;  %v3233_v43 = vsub.f32 1.0, %v3232_v33  ;;  %vm3237_vm2 = vweird.f32 %v4817_v29  ;;  %vm6693_vm4 = vcmp.eq.f32.partialorder %v3240_v25, 8.507059e+37 }
 0x1e8   :  { %v4821_v48 = vpop.eup %4820  ;;  %v4208_v57 = vadd.f32 %v4033_v22, %v1793_v41  ;;  %v2395_v56 = vadd.f32 %v4815_v52, %v2394_v37  ;;  %v3243_v28 = vor.u32 1.1754944e-38, %v3242_v45  ;;  %v6697_v58 = vadd.f32 1e-09, %v2042_v55  ;;  %vm6705_vm3 = vmor %vm3236_vm0, %vm3237_vm2 }
 0x1e9   :  { %v4145_v61 = vmul.f32 0.6931472, %v4821_v48  ;;  %4824 = vlog2.f32 %v1005_v24  ;;  %v3234_v26 = vmul.f32 %v4817_v29, %v3233_v43  ;;  %v6699_v5 = vadd.f32 1e-09, %v2098_v21 }
 0x1ea   :  { %v4320_v42 = vmul.f32 -10.0, %v4208_v57  ;;  %v2399_v34 = vsel %vm6689_vm1, %v4815_v52, %v2395_v56  ;;  %v1015_v63 = vand.u32 2147483647, %v6675_v18  ;;  %4826 = vrcp.f32 %v6697_v58  ;;  %v1914_v52 = vld [vmem:[#allocation2 + $0x350] sm:$0xff] }
 0x1eb   :  { %v4823_v44 = vpop.eup %4822  ;;  %v4264_v7 = vadd.f32 %v4145_v61, %v1793_v41  ;;  %v2404_v9 = vsel %vm6668_vm11, %v2403_v4, %v2399_v34  ;;  %v3235_v1 = vadd.f32 %v4817_v29, %v3234_v26  ;;  %v1017_v3 = vand.u32 2147483648, %v6675_v18 }
 0x1ec   :  { %4433 = vst [vmem:[#allocation5 + $0x180] sm:$0xff] %v4320_v42  ;;  %v2405_v16 = vmul.f32 %v2404_v9, %v6623_v47  ;;  %v698_v62 = vadd.f32 1e-09, %v6655_v30  ;;  %v1007_v12 = vmul.f32 %v4823_v44, %v6675_v18  ;;  %v2417_v19 = vand.u32 2147483648, %v6697_v58  ;;  %v1819_v30 = vld [vmem:[#allocation2 + $0x58] sm:$0xff] }
 0x1ed   :  { %v4376_v13 = vmul.f32 -10.0, %v4264_v7  ;;  %v3239_v6 = vsel %vm6705_vm3, %v4817_v29, %v3235_v1  ;;  %4828 = vrcp.f32 %v6699_v5  ;;  %v1930_v59 = vadd.f32 1e-09, %v1818_v11 }
 0x1ee   :  { %v3244_v35 = vsel %vm6693_vm4, %v3243_v28, %v3239_v6  ;;  %4830 = vlog2.f32 %v2405_v16  ;;  %v1008_v10 = vsub.f32 1.0, %v1007_v12  ;;  %vm1011_vm12 = vweird.f32 %v6675_v18 }
 0x1ef   :  { %v4825_v14 = vpop.eup %4824  ;;  %4489 = vst [vmem:[#allocation5 + $0x340] sm:$0xff] %v4376_v13  ;;  %v3245_v47 = vmul.f32 %v3244_v35, %v6648_v0  ;;  %vm6725_vm5 = vcmp.eq.f32.partialorder %v1015_v63, 8.507059e+37  ;;  %v1018_v15 = vor.u32 1.1754944e-38, %v1017_v3  ;;  %vm1012_vm6 = vweird.f32 %v4823_v44  ;;  %v578_v0 = vpop.f32.mrf.mxu3 }
 0x1f0   :  { %v4827_v20 = vpop.eup %4826  ;;  %v1009_v60 = vmul.f32 %v4823_v44, %v1008_v10  ;;  %vm2411_vm8 = vweird.f32 %v6697_v58  ;;  %v2415_v23 = vand.u32 2147483647, %v6697_v58  ;;  %v2418_v2 = vor.u32 1.1754944e-38, %v2417_v19  ;;  %vm1013_vm9 = vmor %vm1011_vm12, %vm1012_vm6  ;;  %v619_v13 = vpop.f32.mrf.mxu2 }
 0x1f1   :  { %4832 = vlog2.f32 %v3245_v47  ;;  %v2407_v54 = vmul.f32 %v4827_v20, %v6697_v58  ;;  %vm3251_vm7 = vweird.f32 %v6699_v5  ;;  %v1715_v36 = vmul.f32 0.6931472, %v4825_v14 }
 0x1f2   :  { %v1010_v27 = vadd.f32 %v4823_v44, %v1009_v60  ;;  %v3255_v11 = vand.u32 2147483647, %v6699_v5  ;;  %v794_v39 = vsub.f32 1.0, %v578_v0  ;;  %vm2412_vm10 = vweird.f32 %v4827_v20 }
 0x1f3   :  { %v4829_v40 = vpop.eup %4828  ;;  %v2408_v4 = vsub.f32 1.0, %v2407_v54  ;;  %v3257_v41 = vand.u32 2147483648, %v6699_v5  ;;  %v2082_v49 = vsub.f32 1.0, %v1858_v8  ;;  %v2138_v55 = vsub.f32 1.0, %v1914_v52  ;;  %vm6745_vm13 = vmor %vm2411_vm8, %vm2412_vm10 }
 0x1f4   :  { %v4831_v25 = vpop.eup %4830  ;;  %v1014_v29 = vsel %vm1013_vm9, %v4823_v44, %v1010_v27  ;;  %v3247_v17 = vmul.f32 %v4829_v40, %v6699_v5  ;;  %v6739_v45 = vadd.f32 1e-09, %v794_v39  ;;  %vm3252_vm11 = vweird.f32 %v4829_v40 }
 0x1f5   :  { %v3955_v31 = vmul.f32 0.6931472, %v4831_v25  ;;  %v1019_v46 = vsel %vm6725_vm5, %v1018_v15, %v1014_v29  ;;  %v2409_v33 = vmul.f32 %v4827_v20, %v2408_v4  ;;  %v6750_v32 = vadd.f32 1e-09, %v2082_v49  ;;  %vm6764_vm1 = vmor %vm3251_vm7, %vm3252_vm11  ;;  %v1875_v49 = vld [vmem:[#allocation2 + $0x218] sm:$0xff] }
 0x1f6   :  { %v1020_v18 = vmul.f32 %v1019_v46, %v698_v62  ;;  %v3248_v22 = vsub.f32 1.0, %v3247_v17  ;;  %4834 = vrcp.f32 %v6739_v45  ;;  %v1986_v50 = vadd.f32 1e-09, %v6672_v38 }
 0x1f7   :  { %v4833_v37 = vpop.eup %4832  ;;  %v4169_v24 = vadd.f32 %v3955_v31, %v1715_v36  ;;  %v2410_v43 = vadd.f32 %v4827_v20, %v2409_v33  ;;  %vm2416_vm15 = vcmp.eq.f32.partialorder %v2415_v23, 8.507059e+37  ;;  %vm6753_vm0 = vcmp.eq.f32.partialorder %v3255_v11, 8.507059e+37 }
 0x1f8   :  { %v4067_v51 = vmul.f32 0.6931472, %v4833_v37  ;;  %v3249_v48 = vmul.f32 %v4829_v40, %v3248_v22  ;;  %v6757_v56 = vadd.f32 1e-09, %v2138_v55  ;;  %4836 = vlog2.f32 %v1020_v18 }
 0x1f9   :  { %v4281_v28 = vmul.f32 -10.0, %v4169_v24  ;;  %v2414_v58 = vsel %vm6745_vm13, %v4827_v20, %v2410_v43  ;;  %v3258_v61 = vor.u32 1.1754944e-38, %v3257_v41  ;;  %4838 = vrcp.f32 %v6750_v32 }
 0x1fa   :  { %v4225_v26 = vadd.f32 %v4067_v51, %v1715_v36  ;;  %v2419_v42 = vsel %vm2416_vm15, %v2418_v2, %v2414_v58  ;;  %v3250_v34 = vadd.f32 %v4829_v40, %v3249_v48  ;;  %v738_v63 = vadd.f32 1e-09, %v578_v0 }
 0x1fb   :  { %4394 = vst.msk [vmem:[#allocation5 + $0x48] sm:$0xff] %vm4385_vm14, %v4281_v28  ;;  %v2420_v53 = vmul.f32 %v2419_v42, %v1930_v59  ;;  %v1615_v44 = vand.u32 2147483647, %v6739_v45  ;;  %v1617_v7 = vand.u32 2147483648, %v6739_v45  ;;  %v6774_v3 = vadd.f32 1e-09, %v1858_v8 }
 0x1fc   :  { %v4835_v9 = vpop.eup %4834  ;;  %v4337_v5 = vmul.f32 -10.0, %v4225_v26  ;;  %v3254_v1 = vsel %vm6764_vm1, %v4829_v40, %v3250_v34  ;;  %4840 = vrcp.f32 %v6757_v56  ;;  %v3015_v12 = vand.u32 2147483647, %v6750_v32 }
 0x1fd   :  { %v3259_v16 = vsel %vm6753_vm0, %v3258_v61, %v3254_v1  ;;  %4842 = vlog2.f32 %v2420_v53  ;;  %v1607_v62 = vmul.f32 %v4835_v9, %v6739_v45  ;;  %vm1611_vm2 = vweird.f32 %v6739_v45 }
 0x1fe   :  { %4450 = vst.msk [vmem:[#allocation5 + $0x208] sm:$0xff] %vm4385_vm14, %v4337_v5  ;;  %v3260_v6 = vmul.f32 %v3259_v16, %v1986_v50  ;;  %v6783_v19 = vadd.f32 1e-09, %v1914_v52  ;;  %v3017_v35 = vand.u32 2147483648, %v6750_v32  ;;  %v4837_v10 = vpop.eup %4836  ;;  %vm1612_vm4 = vweird.f32 %v4835_v9 }
 0x1ff   :  { %v1608_v59 = vsub.f32 1.0, %v1607_v62  ;;  %vm6786_vm3 = vcmp.eq.f32.partialorder %v1615_v44, 8.507059e+37  ;;  %v1618_v47 = vor.u32 1.1754944e-38, %v1617_v7  ;;  %v4839_v15 = vpop.eup %4838  ;;  %vm3011_vm12 = vweird.f32 %v6750_v32  ;;  %vm6801_vm8 = vmor %vm1611_vm2, %vm1612_vm4 }
 0x200   :  { %4844 = vlog2.f32 %v3260_v6  ;;  %vm3851_vm5 = vweird.f32 %v6757_v56  ;;  %v755_v20 = vsub.f32 1.0, %v619_v13  ;;  %v3007_v23 = vmul.f32 %v4839_v15, %v6750_v32 }
 0x201   :  { %v1609_v60 = vmul.f32 %v4835_v9, %v1608_v59  ;;  %vm6793_vm6 = vcmp.eq.f32.partialorder %v3015_v12, 8.507059e+37  ;;  %v3855_v54 = vand.u32 2147483647, %v6757_v56  ;;  %v1717_v0 = vmul.f32 0.6931472, %v4837_v10 }
 0x202   :  { %v4841_v2 = vpop.eup %4840  ;;  %v3018_v36 = vor.u32 1.1754944e-38, %v3017_v35  ;;  %v6805_v27 = vadd.f32 1e-09, %v755_v20  ;;  %v2043_v11 = vsub.f32 1.0, %v1819_v30  ;;  %v3008_v4 = vsub.f32 1.0, %v3007_v23  ;;  %v1820_v20 = vld [vmem:[#allocation2 + $0x60] sm:$0xff] }
 0x203   :  { %v4843_v39 = vpop.eup %4842  ;;  %v1610_v40 = vadd.f32 %v4835_v9, %v1609_v60  ;;  %vm3012_vm7 = vweird.f32 %v4839_v15  ;;  %v3847_v41 = vmul.f32 %v4841_v2, %v6757_v56  ;;  %v3857_v29 = vand.u32 2147483648, %v6757_v56 }
 0x204   :  { %v3957_v25 = vmul.f32 0.6931472, %v4843_v39  ;;  %v6809_v17 = vadd.f32 1e-09, %v619_v13  ;;  %4846 = vrcp.f32 %v6805_v27  ;;  %v3009_v55 = vmul.f32 %v4839_v15, %v3008_v4  ;;  %vm6818_vm10 = vmor %vm3011_vm12, %vm3012_vm7  ;;  %v521_v13 = vpop.f32.mrf.mxu1 }
 0x205   :  { %v1614_v45 = vsel %vm6801_vm8, %v4835_v9, %v1610_v40  ;;  %v3848_v31 = vsub.f32 1.0, %v3847_v41  ;;  %vm3852_vm9 = vweird.f32 %v4841_v2  ;;  %v2099_v22 = vsub.f32 1.0, %v1875_v49 }
 0x206   :  { %v4845_v46 = vpop.eup %4844  ;;  %v4170_v33 = vadd.f32 %v3957_v25, %v1717_v0  ;;  %v1619_v18 = vsel %vm6786_vm3, %v1618_v47, %v1614_v45  ;;  %v6822_v37 = vadd.f32 1e-09, %v2043_v11  ;;  %v3010_v43 = vadd.f32 %v4839_v15, %v3009_v55  ;;  %vm6826_vm11 = vmor %vm3851_vm5, %vm3852_vm9 }
 0x207   :  { %v4069_v24 = vmul.f32 0.6931472, %v4845_v46  ;;  %v1620_v50 = vmul.f32 %v1619_v18, %v738_v63  ;;  %v3849_v51 = vmul.f32 %v4841_v2, %v3848_v31  ;;  %vm6830_vm13 = vcmp.eq.f32.partialorder %v3855_v54, 8.507059e+37  ;;  %v1876_v54 = vld [vmem:[#allocation2 + $0x220] sm:$0xff] }
 0x208   :  { %v4282_v48 = vmul.f32 -10.0, %v4170_v33  ;;  %v3858_v28 = vor.u32 1.1754944e-38, %v3857_v29  ;;  %4848 = vrcp.f32 %v6822_v37  ;;  %v3014_v38 = vsel %vm6818_vm10, %v4839_v15, %v3010_v43 }
 0x209   :  { %v4226_v58 = vadd.f32 %v4069_v24, %v1717_v0  ;;  %4850 = vlog2.f32 %v1620_v50  ;;  %v3850_v61 = vadd.f32 %v4841_v2, %v3849_v51  ;;  %v3019_v56 = vsel %vm6793_vm6, %v3018_v36, %v3014_v38  ;;  %v6900_v38 = vpop.f32.mrf.mxu2 }
 0x20a   :  { %v4847_v26 = vpop.eup %4846  ;;  %4395 = vst [vmem:[#allocation5 + $0x50] sm:$0xff] %v4282_v48  ;;  %v1030_v42 = vand.u32 2147483647, %v6805_v27  ;;  %v6840_v34 = vadd.f32 1e-09, %v2099_v22  ;;  %v3020_v63 = vmul.f32 %v3019_v56, %v6774_v3  ;;  %v1032_v5 = vand.u32 2147483648, %v6805_v27 }
 0x20b   :  { %v4338_v53 = vmul.f32 -10.0, %v4226_v58  ;;  %v3854_v44 = vsel %vm6826_vm11, %v4841_v2, %v3850_v61  ;;  %v1022_v7 = vmul.f32 %v4847_v26, %v6805_v27  ;;  %v1931_v1 = vadd.f32 1e-09, %v1819_v30  ;;  %v6902_v61 = vld [vmem:[#allocation2 + $0x68] sm:$0xff]  ;;  %v1860_v30 = vld [vmem:[#allocation2 + $0x1a0] sm:$0xff] }
 0x20c   :  { %v3859_v9 = vsel %vm6830_vm13, %v3858_v28, %v3854_v44  ;;  %v2430_v16 = vand.u32 2147483647, %v6822_v37  ;;  %4852 = vlog2.f32 %v3020_v63  ;;  %v2432_v3 = vand.u32 2147483648, %v6822_v37 }
 0x20d   :  { %4451 = vst [vmem:[#allocation5 + $0x210] sm:$0xff] %v4338_v53  ;;  %v3860_v62 = vmul.f32 %v3859_v9, %v6783_v19  ;;  %v1023_v12 = vsub.f32 1.0, %v1022_v7  ;;  %vm1026_vm15 = vweird.f32 %v6805_v27  ;;  %vm6853_vm0 = vcmp.eq.f32.partialorder %v1030_v42, 8.507059e+37 }
 0x20e   :  { %v4849_v6 = vpop.eup %4848  ;;  %v6857_v10 = vadd.f32 1e-09, %v1875_v49  ;;  %4854 = vrcp.f32 %v6840_v34  ;;  %vm1027_vm1 = vweird.f32 %v4847_v26  ;;  %v1033_v47 = vor.u32 1.1754944e-38, %v1032_v5 }
 0x20f   :  { %v4851_v59 = vpop.eup %4850  ;;  %4856 = vlog2.f32 %v3860_v62  ;;  %v1024_v14 = vmul.f32 %v4847_v26, %v1023_v12  ;;  %v2422_v19 = vmul.f32 %v4849_v6, %v6822_v37  ;;  %vm2426_vm2 = vweird.f32 %v6822_v37  ;;  %vm1028_vm12 = vmor %vm1026_vm15, %vm1027_vm1 }
 0x210   :  { %vm6862_vm4 = vcmp.eq.f32.partialorder %v2430_v16, 8.507059e+37  ;;  %v756_v15 = vsub.f32 1.0, %v521_v13  ;;  %vm2427_vm3 = vweird.f32 %v4849_v6  ;;  %v2433_v8 = vor.u32 1.1754944e-38, %v2432_v3 }
 0x211   :  { %v1025_v60 = vadd.f32 %v4847_v26, %v1024_v14  ;;  %v2423_v23 = vsub.f32 1.0, %v2422_v19  ;;  %v1797_v2 = vmul.f32 0.6931472, %v4851_v59  ;;  %vm3266_vm5 = vweird.f32 %v6840_v34  ;;  %vm6878_vm6 = vmor %vm2426_vm2, %vm2427_vm3 }
 0x212   :  { %v3270_v0 = vand.u32 2147483647, %v6840_v34  ;;  %v6870_v52 = vadd.f32 1e-09, %v756_v15  ;;  %v4853_v36 = vpop.eup %4852  ;;  %v3272_v40 = vand.u32 2147483648, %v6840_v34  ;;  %v2044_v4 = vsub.f32 1.0, %v1820_v20 }
 0x213   :  { %v1029_v11 = vsel %vm1028_vm12, %v4847_v26, %v1025_v60  ;;  %v2424_v39 = vmul.f32 %v4849_v6, %v2423_v23  ;;  %v4037_v49 = vmul.f32 0.6931472, %v4853_v36  ;;  %v6882_v29 = vadd.f32 1e-09, %v521_v13  ;;  %v1916_v15 = vld [vmem:[#allocation2 + $0x360] sm:$0xff] }
 0x214   :  { %v4855_v41 = vpop.eup %4854  ;;  %v1034_v25 = vsel %vm6853_vm0, %v1033_v47, %v1029_v11  ;;  %4858 = vrcp.f32 %v6870_v52  ;;  %v2100_v33 = vsub.f32 1.0, %v1876_v54  ;;  %vm6887_vm7 = vcmp.eq.f32.partialorder %v3270_v0, 8.507059e+37  ;;  %v581_v47 = vpop.f32.mrf.mxu3 }
 0x215   :  { %v4857_v45 = vpop.eup %4856  ;;  %v1035_v55 = vmul.f32 %v1034_v25, %v6809_v17  ;;  %v2425_v31 = vadd.f32 %v4849_v6, %v2424_v39  ;;  %v3262_v46 = vmul.f32 %v4855_v41, %v6840_v34  ;;  %v4210_v21 = vadd.f32 %v4037_v49, %v1797_v2 }
 0x216   :  { %v4149_v18 = vmul.f32 0.6931472, %v4857_v45  ;;  %vm3267_vm8 = vweird.f32 %v4855_v41  ;;  %v6893_v50 = vadd.f32 1e-09, %v2044_v4  ;;  %v3273_v48 = vor.u32 1.1754944e-38, %v3272_v40 }
 0x217   :  { %4860 = vlog2.f32 %v1035_v55  ;;  %v2429_v37 = vsel %vm6878_vm6, %v4849_v6, %v2425_v31  ;;  %v3263_v24 = vsub.f32 1.0, %v3262_v46  ;;  %v4322_v17 = vmul.f32 -10.0, %v4210_v21  ;;  %vm6907_vm9 = vmor %vm3266_vm5, %vm3267_vm8 }
 0x218   :  { %v4266_v43 = vadd.f32 %v4149_v18, %v1797_v2  ;;  %v2434_v51 = vsel %vm6862_vm4, %v2433_v8, %v2429_v37  ;;  %v1045_v28 = vand.u32 2147483647, %v6870_v52  ;;  %v6898_v58 = vadd.f32 1e-09, %v2100_v33 }
 0x219   :  { %v2435_v57 = vmul.f32 %v2434_v51, %v1931_v1  ;;  %v3264_v32 = vmul.f32 %v4855_v41, %v3263_v24  ;;  %4435 = vst [vmem:[#allocation5 + $0x190] sm:$0xff] %v4322_v17  ;;  %v1047_v53 = vand.u32 2147483648, %v6870_v52  ;;  %v6912_v63 = vadd.f32 1e-09, %v1820_v20 }
 0x21a   :  { %v4859_v26 = vpop.eup %4858  ;;  %v4378_v56 = vmul.f32 -10.0, %v4266_v43  ;;  %4862 = vrcp.f32 %v6893_v50  ;;  %v2445_v9 = vand.u32 2147483647, %v6893_v50  ;;  %v6917_v5 = vadd.f32 1e-09, %v1876_v54 }
 0x21b   :  { %v3265_v44 = vadd.f32 %v4855_v41, %v3264_v32  ;;  %4864 = vlog2.f32 %v2435_v57  ;;  %v1037_v7 = vmul.f32 %v4859_v26, %v6870_v52  ;;  %v757_v34 = vsub.f32 1.0, %v6900_v38 }
 0x21c   :  { %4491 = vst [vmem:[#allocation5 + $0x350] sm:$0xff] %v4378_v56  ;;  %4866 = vrcp.f32 %v6898_v58  ;;  %v2045_v1 = vsub.f32 1.0, %v6902_v61  ;;  %vm1041_vm10 = vweird.f32 %v6870_v52  ;;  %vm6925_vm11 = vcmp.eq.f32.partialorder %v1045_v28, 8.507059e+37 }
 0x21d   :  { %v4861_v16 = vpop.eup %4860  ;;  %v3269_v62 = vsel %vm6907_vm9, %v4855_v41, %v3265_v44  ;;  %v1038_v12 = vsub.f32 1.0, %v1037_v7  ;;  %vm1042_vm13 = vweird.f32 %v4859_v26  ;;  %v1048_v6 = vor.u32 1.1754944e-38, %v1047_v53 }
 0x21e   :  { %v3274_v13 = vsel %vm6887_vm7, %v3273_v48, %v3269_v62  ;;  %vm2441_vm15 = vweird.f32 %v6893_v50  ;;  %vm6933_vm0 = vcmp.eq.f32.partialorder %v2445_v9, 8.507059e+37  ;;  %v2447_v19 = vand.u32 2147483648, %v6893_v50  ;;  %vm1043_vm2 = vmor %vm1041_vm10, %vm1042_vm13  ;;  %v6970_v48 = vld [vmem:[#allocation2 + $0x228] sm:$0xff] }
 0x21f   :  { %v3275_v35 = vmul.f32 %v3274_v13, %v6857_v10  ;;  %v1039_v59 = vmul.f32 %v4859_v26, %v1038_v12  ;;  %v1719_v60 = vmul.f32 0.6931472, %v4861_v16  ;;  %vm3281_vm1 = vweird.f32 %v6898_v58 }
 0x220   :  { %v4863_v20 = vpop.eup %4862  ;;  %v3285_v23 = vand.u32 2147483647, %v6898_v58  ;;  %v796_v8 = vsub.f32 1.0, %v581_v47  ;;  %v3287_v0 = vand.u32 2147483648, %v6898_v58  ;;  %v2084_v40 = vsub.f32 1.0, %v1860_v30 }
 0x221   :  { %v4865_v54 = vpop.eup %4864  ;;  %4868 = vlog2.f32 %v3275_v35  ;;  %v1040_v10 = vadd.f32 %v4859_v26, %v1039_v59  ;;  %v2437_v2 = vmul.f32 %v4863_v20, %v6893_v50  ;;  %v2140_v4 = vsub.f32 1.0, %v1916_v15 }
 0x222   :  { %v4867_v36 = vpop.eup %4866  ;;  %v3959_v11 = vmul.f32 0.6931472, %v4865_v54  ;;  %v6945_v39 = vadd.f32 1e-09, %v796_v8  ;;  %vm2442_vm4 = vweird.f32 %v4863_v20  ;;  %v6950_v55 = vadd.f32 1e-09, %v581_v47 }
 0x223   :  { %v1044_v41 = vsel %vm1043_vm2, %v4859_v26, %v1040_v10  ;;  %v2438_v49 = vsub.f32 1.0, %v2437_v2  ;;  %v3277_v25 = vmul.f32 %v4867_v36, %v6898_v58  ;;  %vm3282_vm3 = vweird.f32 %v4867_v36  ;;  %vm6956_vm12 = vmor %vm2441_vm15, %vm2442_vm4 }
 0x224   :  { %v4171_v27 = vadd.f32 %v3959_v11, %v1719_v60  ;;  %v1049_v45 = vsel %vm6925_vm11, %v1048_v6, %v1044_v41  ;;  %4870 = vrcp.f32 %v6945_v39  ;;  %v2448_v21 = vor.u32 1.1754944e-38, %v2447_v19  ;;  %vm6975_vm6 = vmor %vm3281_vm1, %vm3282_vm3 }
 0x225   :  { %v1050_v52 = vmul.f32 %v1049_v45, %v6882_v29  ;;  %v2439_v31 = vmul.f32 %v4863_v20, %v2438_v49  ;;  %v3278_v46 = vsub.f32 1.0, %v3277_v25  ;;  %v6960_v22 = vadd.f32 1e-09, %v2084_v40 }
 0x226   :  { %v4283_v33 = vmul.f32 -10.0, %v4171_v27  ;;  %v6962_v37 = vadd.f32 1e-09, %v2140_v4  ;;  %vm6964_vm5 = vcmp.eq.f32.partialorder %v3285_v23, 8.507059e+37  ;;  %v6968_v51 = vadd.f32 1e-09, %v1860_v30 }
 0x227   :  { %v4869_v24 = vpop.eup %4868  ;;  %v2440_v43 = vadd.f32 %v4863_v20, %v2439_v31  ;;  %v3279_v17 = vmul.f32 %v4867_v36, %v3278_v46  ;;  %v3288_v32 = vor.u32 1.1754944e-38, %v3287_v0  ;;  %v1645_v28 = vand.u32 2147483647, %v6945_v39 }
 0x228   :  { %v4071_v50 = vmul.f32 0.6931472, %v4869_v24  ;;  %4396 = vst.msk [vmem:[#allocation5 + $0x58] sm:$0xff] %vm4385_vm14, %v4283_v33  ;;  %4872 = vrcp.f32 %v6960_v22  ;;  %v6983_v42 = vadd.f32 1e-09, %v1916_v15  ;;  %v2101_v7 = vsub.f32 1.0, %v6970_v48 }
 0x229   :  { %4874 = vlog2.f32 %v1050_v52  ;;  %v2444_v26 = vsel %vm6956_vm12, %v4863_v20, %v2440_v43  ;;  %v3280_v56 = vadd.f32 %v4867_v36, %v3279_v17  ;;  %v1647_v12 = vand.u32 2147483648, %v6945_v39 }
 0x22a   :  { %v4871_v53 = vpop.eup %4870  ;;  %v4227_v44 = vadd.f32 %v4071_v50, %v1719_v60  ;;  %v2449_v58 = vsel %vm6933_vm0, %v2448_v21, %v2444_v26  ;;  %4876 = vrcp.f32 %v6962_v37  ;;  %vm1641_vm8 = vweird.f32 %v6945_v39 }
 0x22b   :  { %v2450_v9 = vmul.f32 %v2449_v58, %v6912_v63  ;;  %v3284_v16 = vsel %vm6975_vm6, %v4867_v36, %v3280_v56  ;;  %v1637_v62 = vmul.f32 %v4871_v53, %v6945_v39  ;;  %vm6997_vm7 = vcmp.eq.f32.partialorder %v1645_v28, 8.507059e+37 }
 0x22c   :  { %v4339_v3 = vmul.f32 -10.0, %v4227_v44  ;;  %v3289_v13 = vsel %vm6964_vm5, %v3288_v32, %v3284_v16  ;;  %vm1642_vm9 = vweird.f32 %v4871_v53  ;;  %v3045_v14 = vand.u32 2147483647, %v6960_v22  ;;  %v524_v32 = vpop.f32.mrf.mxu1 }
 0x22d   :  { %v3290_v35 = vmul.f32 %v3289_v13, %v6917_v5  ;;  %4878 = vlog2.f32 %v2450_v9  ;;  %v1638_v63 = vsub.f32 1.0, %v1637_v62  ;;  %v3047_v19 = vand.u32 2147483648, %v6960_v22  ;;  %vm7012_vm10 = vmor %vm1641_vm8, %vm1642_vm9 }
 0x22e   :  { %v4873_v59 = vpop.eup %4872  ;;  %4452 = vst.msk [vmem:[#allocation5 + $0x218] sm:$0xff] %vm4385_vm14, %v4339_v3  ;;  %v7007_v47 = vadd.f32 1e-09, %v757_v34  ;;  %v1648_v20 = vor.u32 1.1754944e-38, %v1647_v12  ;;  %vm3041_vm11 = vweird.f32 %v6960_v22  ;;  %v3885_v8 = vand.u32 2147483647, %v6962_v37 }
 0x22f   :  { %v4875_v30 = vpop.eup %4874  ;;  %4880 = vlog2.f32 %v3290_v35  ;;  %v1639_v15 = vmul.f32 %v4871_v53, %v1638_v63  ;;  %v3037_v5 = vmul.f32 %v4873_v59, %v6960_v22  ;;  %v3887_v34 = vand.u32 2147483648, %v6962_v37 }
 0x230   :  { %v4877_v60 = vpop.eup %4876  ;;  %4882 = vrcp.f32 %v7007_v47  ;;  %vm3042_vm13 = vweird.f32 %v4873_v59  ;;  %v1721_v0 = vmul.f32 0.6931472, %v4875_v30  ;;  %vm7021_vm15 = vcmp.eq.f32.partialorder %v3045_v14, 8.507059e+37 }
 0x231   :  { %v1640_v54 = vadd.f32 %v4871_v53, %v1639_v15  ;;  %v3038_v10 = vsub.f32 1.0, %v3037_v5  ;;  %v3877_v2 = vmul.f32 %v4877_v60, %v6962_v37  ;;  %v3048_v11 = vor.u32 1.1754944e-38, %v3047_v19  ;;  %vm7032_vm2 = vmor %vm3041_vm11, %vm3042_vm13  ;;  %v7093_v15 = vld [vmem:[#allocation2 + $0x230] sm:$0xff] }
 0x232   :  { %vm3881_vm0 = vweird.f32 %v6962_v37  ;;  %vm3882_vm1 = vweird.f32 %v4877_v60  ;;  %vm7036_vm4 = vcmp.eq.f32.partialorder %v3885_v8, 8.507059e+37  ;;  %v3888_v52 = vor.u32 1.1754944e-38, %v3887_v34 }
 0x233   :  { %v4879_v39 = vpop.eup %4878  ;;  %v1644_v40 = vsel %vm7012_vm10, %v4871_v53, %v1640_v54  ;;  %v3039_v4 = vmul.f32 %v4873_v59, %v3038_v10  ;;  %v3878_v41 = vsub.f32 1.0, %v3877_v2  ;;  %v7043_v21 = vadd.f32 1e-09, %v2045_v1  ;;  %vm7047_vm3 = vmor %vm3881_vm0, %vm3882_vm1 }
 0x234   :  { %v3961_v49 = vmul.f32 0.6931472, %v4879_v39  ;;  %v1649_v25 = vsel %vm6997_vm7, %v1648_v20, %v1644_v40  ;;  %v1060_v29 = vand.u32 2147483647, %v7007_v47  ;;  %v1062_v50 = vand.u32 2147483648, %v7007_v47 }
 0x235   :  { %v4881_v31 = vpop.eup %4880  ;;  %v1650_v46 = vmul.f32 %v1649_v25, %v6950_v55  ;;  %v3040_v33 = vadd.f32 %v4873_v59, %v3039_v4  ;;  %v3879_v18 = vmul.f32 %v4877_v60, %v3878_v41  ;;  %v7060_v56 = vadd.f32 1e-09, %v2101_v7 }
 0x236   :  { %v4883_v24 = vpop.eup %4882  ;;  %v4073_v22 = vmul.f32 0.6931472, %v4881_v31  ;;  %v4172_v43 = vadd.f32 %v3961_v49, %v1721_v0  ;;  %v758_v62 = vsub.f32 1.0, %v524_v32  ;;  %v2460_v3 = vand.u32 2147483647, %v7043_v21 }
 0x237   :  { %4884 = vlog2.f32 %v1650_v46  ;;  %v3044_v55 = vsel %vm7032_vm2, %v4873_v59, %v3040_v33  ;;  %v3880_v57 = vadd.f32 %v4877_v60, %v3879_v18  ;;  %v1052_v1 = vmul.f32 %v4883_v24, %v7007_v47 }
 0x238   :  { %v4228_v28 = vadd.f32 %v4073_v22, %v1721_v0  ;;  %v4284_v26 = vmul.f32 -10.0, %v4172_v43  ;;  %v3049_v37 = vsel %vm7021_vm15, %v3048_v11, %v3044_v55  ;;  %4886 = vrcp.f32 %v7043_v21 }
 0x239   :  { %v3050_v53 = vmul.f32 %v3049_v37, %v6968_v51  ;;  %v3884_v44 = vsel %vm7047_vm3, %v4877_v60, %v3880_v57  ;;  %v1053_v58 = vsub.f32 1.0, %v1052_v1  ;;  %vm1057_vm12 = vweird.f32 %v4883_v24  ;;  %v7070_v51 = vld [vmem:[#allocation2 + $0x70] sm:$0xff] }
 0x23a   :  { %v4340_v9 = vmul.f32 -10.0, %v4228_v28  ;;  %4397 = vst [vmem:[#allocation5 + $0x60] sm:$0xff] %v4284_v26  ;;  %v3889_v16 = vsel %vm7036_vm4, %v3888_v52, %v3884_v44  ;;  %v701_v13 = vadd.f32 1e-09, %v6900_v38  ;;  %vm1056_vm5 = vweird.f32 %v7007_v47 }
 0x23b   :  { %v3890_v12 = vmul.f32 %v3889_v16, %v6983_v42  ;;  %4888 = vlog2.f32 %v3050_v53  ;;  %v1054_v7 = vmul.f32 %v4883_v24, %v1053_v58  ;;  %v7075_v6 = vadd.f32 1e-09, %v6902_v61  ;;  %vm1058_vm8 = vmor %vm1056_vm5, %vm1057_vm12 }
 0x23c   :  { %4453 = vst [vmem:[#allocation5 + $0x220] sm:$0xff] %v4340_v9  ;;  %4890 = vrcp.f32 %v7060_v56  ;;  %vm1061_vm6 = vcmp.eq.f32.partialorder %v1060_v29, 8.507059e+37  ;;  %v7079_v42 = vadd.f32 1e-09, %v6970_v48  ;;  %v1063_v59 = vor.u32 1.1754944e-38, %v1062_v50 }
 0x23d   :  { %v4885_v35 = vpop.eup %4884  ;;  %4892 = vlog2.f32 %v3890_v12  ;;  %v1055_v63 = vadd.f32 %v4883_v24, %v1054_v7  ;;  %v7082_v14 = vadd.f32 1e-09, %v524_v32  ;;  %v7084_v38 = vadd.f32 1e-09, %v758_v62 }
 0x23e   :  { %v2046_v19 = vsub.f32 1.0, %v7070_v51  ;;  %v4887_v61 = vpop.eup %4886  ;;  %vm2456_vm7 = vweird.f32 %v7043_v21  ;;  %vm7088_vm9 = vcmp.eq.f32.partialorder %v2460_v3, 8.507059e+37  ;;  %v2462_v48 = vand.u32 2147483648, %v7043_v21 }
 0x23f   :  { %v1059_v47 = vsel %vm1058_vm8, %v4883_v24, %v1055_v63  ;;  %v1801_v20 = vmul.f32 0.6931472, %v4885_v35  ;;  %v2452_v60 = vmul.f32 %v4887_v61, %v7043_v21  ;;  %4894 = vrcp.f32 %v7084_v38  ;;  %v584_v63 = vpop.f32.mrf.mxu3 }
 0x240   :  { %v1064_v5 = vsel %vm1061_vm6, %v1063_v59, %v1059_v47  ;;  %vm2457_vm10 = vweird.f32 %v4887_v61  ;;  %vm3296_vm11 = vweird.f32 %v7060_v56  ;;  %v3300_v34 = vand.u32 2147483647, %v7060_v56  ;;  %v1862_v59 = vld [vmem:[#allocation2 + $0x1b0] sm:$0xff] }
 0x241   :  { %v4889_v23 = vpop.eup %4888  ;;  %v1065_v8 = vmul.f32 %v1064_v5, %v701_v13  ;;  %v2453_v2 = vsub.f32 1.0, %v2452_v60  ;;  %v2102_v0 = vsub.f32 1.0, %v7093_v15  ;;  %v7100_v36 = vadd.f32 1e-09, %v2046_v19  ;;  %vm7108_vm13 = vmor %vm2456_vm7, %vm2457_vm10 }
 0x242   :  { %v4891_v54 = vpop.eup %4890  ;;  %v4041_v10 = vmul.f32 0.6931472, %v4889_v23  ;;  %v2463_v39 = vor.u32 1.1754944e-38, %v2462_v48  ;;  %v3302_v4 = vand.u32 2147483648, %v7060_v56  ;;  %v1075_v41 = vand.u32 2147483647, %v7084_v38 }
 0x243   :  { %v4893_v11 = vpop.eup %4892  ;;  %v3292_v40 = vmul.f32 %v4891_v54, %v7060_v56  ;;  %4896 = vlog2.f32 %v1065_v8  ;;  %v2454_v27 = vmul.f32 %v4887_v61, %v2453_v2  ;;  %vm3297_vm15 = vweird.f32 %v4891_v54 }
 0x244   :  { %v4153_v49 = vmul.f32 0.6931472, %v4893_v11  ;;  %v4212_v25 = vadd.f32 %v4041_v10, %v1801_v20  ;;  %v7112_v31 = vadd.f32 1e-09, %v2102_v0  ;;  %4898 = vrcp.f32 %v7100_v36  ;;  %vm7126_vm1 = vmor %vm3296_vm11, %vm3297_vm15 }
 0x245   :  { %v3293_v52 = vsub.f32 1.0, %v3292_v40  ;;  %v4895_v46 = vpop.eup %4894  ;;  %v2455_v24 = vadd.f32 %v4887_v61, %v2454_v27  ;;  %v1077_v22 = vand.u32 2147483648, %v7084_v38  ;;  %vm7116_vm0 = vcmp.eq.f32.partialorder %v3300_v34, 8.507059e+37 }
 0x246   :  { %v4268_v33 = vadd.f32 %v4153_v49, %v1801_v20  ;;  %v4324_v18 = vmul.f32 -10.0, %v4212_v25  ;;  %v3303_v21 = vor.u32 1.1754944e-38, %v3302_v4  ;;  %v1067_v29 = vmul.f32 %v4895_v46, %v7084_v38 }
 0x247   :  { %v3294_v43 = vmul.f32 %v4891_v54, %v3293_v52  ;;  %v2459_v55 = vsel %vm7108_vm13, %v4887_v61, %v2455_v24  ;;  %v7131_v1 = vadd.f32 1e-09, %v7070_v51  ;;  %4900 = vrcp.f32 %v7112_v31 }
 0x248   :  { %v4380_v50 = vmul.f32 -10.0, %v4268_v33  ;;  %4437 = vst [vmem:[#allocation5 + $0x1a0] sm:$0xff] %v4324_v18  ;;  %v2464_v32 = vsel %vm7088_vm9, %v2463_v39, %v2459_v55  ;;  %v1068_v26 = vsub.f32 1.0, %v1067_v29  ;;  %v2477_v37 = vand.u32 2147483648, %v7100_v36 }
 0x249   :  { %v3295_v28 = vadd.f32 %v4891_v54, %v3294_v43  ;;  %v4897_v53 = vpop.eup %4896  ;;  %v2465_v56 = vmul.f32 %v2464_v32, %v7075_v6  ;;  %vm1071_vm2 = vweird.f32 %v7084_v38  ;;  %vm7139_vm4 = vcmp.eq.f32.partialorder %v1075_v41, 8.507059e+37 }
 0x24a   :  { %4493 = vst [vmem:[#allocation5 + $0x360] sm:$0xff] %v4380_v50  ;;  %v1078_v58 = vor.u32 1.1754944e-38, %v1077_v22  ;;  %v4899_v9 = vpop.eup %4898  ;;  %v1069_v62 = vmul.f32 %v4895_v46, %v1068_v26  ;;  %vm1072_vm3 = vweird.f32 %v4895_v46  ;;  %vm2471_vm12 = vweird.f32 %v7100_v36 }
 0x24b   :  { %v3299_v16 = vsel %vm7126_vm1, %v4891_v54, %v3295_v28  ;;  %4902 = vlog2.f32 %v2465_v56  ;;  %v2467_v7 = vmul.f32 %v4899_v9, %v7100_v36  ;;  %v2475_v3 = vand.u32 2147483647, %v7100_v36  ;;  %vm1073_vm5 = vmor %vm1071_vm2, %vm1072_vm3 }
 0x24c   :  { %v3304_v12 = vsel %vm7116_vm0, %v3303_v21, %v3299_v16  ;;  %v1723_v51 = vmul.f32 0.6931472, %v4897_v53  ;;  %v1070_v6 = vadd.f32 %v4895_v46, %v1069_v62  ;;  %v2478_v35 = vor.u32 1.1754944e-38, %v2477_v37 }
 0x24d   :  { %v3305_v13 = vmul.f32 %v3304_v12, %v7079_v42  ;;  %v4901_v19 = vpop.eup %4900  ;;  %v2468_v61 = vsub.f32 1.0, %v2467_v7  ;;  %vm2472_vm6 = vweird.f32 %v4899_v9  ;;  %vm3311_vm8 = vweird.f32 %v7112_v31  ;;  %v1918_v42 = vld [vmem:[#allocation2 + $0x370] sm:$0xff] }
 0x24e   :  { %v798_v47 = vsub.f32 1.0, %v584_v63  ;;  %v1074_v30 = vsel %vm1073_vm5, %v4895_v46, %v1070_v6  ;;  %v3307_v48 = vmul.f32 %v4901_v19, %v7112_v31  ;;  %v3317_v20 = vand.u32 2147483648, %v7112_v31  ;;  %vm7163_vm7 = vmor %vm2471_vm12, %vm2472_vm6 }
 0x24f   :  { %4904 = vlog2.f32 %v3305_v13  ;;  %v1079_v5 = vsel %vm7139_vm4, %v1078_v58, %v1074_v30  ;;  %v2469_v60 = vmul.f32 %v4899_v9, %v2468_v61  ;;  %v2086_v38 = vsub.f32 1.0, %v1862_v59  ;;  %v1879_v13 = vld [vmem:[#allocation2 + $0x238] sm:$0xff] }
 0x250   :  { %v7158_v23 = vadd.f32 1e-09, %v798_v47  ;;  %v1080_v8 = vmul.f32 %v1079_v5, %v7082_v14  ;;  %v3308_v54 = vsub.f32 1.0, %v3307_v48  ;;  %vm3312_vm9 = vweird.f32 %v4901_v19 }
 0x251   :  { %v3315_v10 = vand.u32 2147483647, %v7112_v31  ;;  %v4903_v2 = vpop.eup %4902  ;;  %v2470_v0 = vadd.f32 %v4899_v9, %v2469_v60  ;;  %vm2476_vm10 = vcmp.eq.f32.partialorder %v2475_v3, 8.507059e+37  ;;  %v2142_v11 = vsub.f32 1.0, %v1918_v42  ;;  %vm7176_vm11 = vmor %vm3311_vm8, %vm3312_vm9  ;;  %v625_v31 = vpop.f32.mrf.mxu2 }
 0x252   :  { %4906 = vrcp.f32 %v7158_v23  ;;  %v3963_v39 = vmul.f32 0.6931472, %v4903_v2  ;;  %v1990_v40 = vadd.f32 1e-09, %v7093_v15  ;;  %v3309_v14 = vmul.f32 %v4901_v19, %v3308_v54 }
 0x253   :  { %v7170_v4 = vadd.f32 1e-09, %v584_v63  ;;  %4908 = vlog2.f32 %v1080_v8  ;;  %v2474_v36 = vsel %vm7163_vm7, %v4899_v9, %v2470_v0  ;;  %v3318_v49 = vor.u32 1.1754944e-38, %v3317_v20 }
 0x254   :  { %v7180_v25 = vadd.f32 1e-09, %v2086_v38  ;;  %v4173_v45 = vadd.f32 %v3963_v39, %v1723_v51  ;;  %v2479_v52 = vsel %vm2476_vm10, %v2478_v35, %v2474_v36  ;;  %v3310_v15 = vadd.f32 %v4901_v19, %v3309_v14 }
 0x255   :  { %v4905_v27 = vpop.eup %4904  ;;  %vm3316_vm13 = vcmp.eq.f32.partialorder %v3315_v10, 8.507059e+37  ;;  %v2480_v33 = vmul.f32 %v2479_v52, %v7131_v1  ;;  %v7183_v18 = vadd.f32 1e-09, %v2142_v11  ;;  %v1675_v43 = vand.u32 2147483647, %v7158_v23 }
 0x256   :  { %v4075_v46 = vmul.f32 0.6931472, %v4905_v27  ;;  %4910 = vrcp.f32 %v7180_v25  ;;  %v4285_v24 = vmul.f32 -10.0, %v4173_v45  ;;  %v3314_v22 = vsel %vm7176_vm11, %v4901_v19, %v3310_v15 }
 0x257   :  { %v7189_v17 = vadd.f32 1e-09, %v1862_v59  ;;  %v3319_v50 = vsel %vm3316_vm13, %v3318_v49, %v3314_v22  ;;  %4912 = vlog2.f32 %v2480_v33  ;;  %v1677_v55 = vand.u32 2147483648, %v7158_v23 }
 0x258   :  { %v4907_v21 = vpop.eup %4906  ;;  %v4229_v29 = vadd.f32 %v4075_v46, %v1723_v51  ;;  %4398 = vst.msk [vmem:[#allocation5 + $0x68] sm:$0xff] %vm4385_vm14, %v4285_v24  ;;  %v3320_v57 = vmul.f32 %v3319_v50, %v1990_v40  ;;  %v7194_v32 = vadd.f32 1e-09, %v1918_v42  ;;  %v7196_v28 = vadd.f32 1e-09, %v625_v31  ;;  %v1823_v51 = vld [vmem:[#allocation2 + $0x78] sm:$0xff] }
 0x259   :  { %v1667_v1 = vmul.f32 %v4907_v21, %v7158_v23  ;;  %v4909_v26 = vpop.eup %4908  ;;  %v3075_v53 = vand.u32 2147483647, %v7180_v25  ;;  %v3077_v56 = vand.u32 2147483648, %v7180_v25  ;;  %4914 = vrcp.f32 %v7183_v18 }
 0x25a   :  { %v4341_v37 = vmul.f32 -10.0, %v4229_v29  ;;  %4916 = vlog2.f32 %v3320_v57  ;;  %vm1671_vm15 = vweird.f32 %v7158_v23  ;;  %vm1672_vm0 = vweird.f32 %v4907_v21 }
 0x25b   :  { %v1668_v44 = vsub.f32 1.0, %v1667_v1  ;;  %vm7203_vm1 = vcmp.eq.f32.partialorder %v1675_v43, 8.507059e+37  ;;  %v1678_v16 = vor.u32 1.1754944e-38, %v1677_v55  ;;  %vm3071_vm2 = vweird.f32 %v7180_v25  ;;  %vm7212_vm3 = vmor %vm1671_vm15, %vm1672_vm0 }
 0x25c   :  { %v4911_v58 = vpop.eup %4910  ;;  %4454 = vst.msk [vmem:[#allocation5 + $0x228] sm:$0xff] %vm4385_vm14, %v4341_v37  ;;  %v759_v62 = vsub.f32 1.0, %v625_v31  ;;  %v1725_v12 = vmul.f32 0.6931472, %v4909_v26  ;;  %vm3911_vm4 = vweird.f32 %v7183_v18  ;;  %vm7216_vm12 = vcmp.eq.f32.partialorder %v3075_v53, 8.507059e+37 }
 0x25d   :  { %v1669_v7 = vmul.f32 %v4907_v21, %v1668_v44  ;;  %v3067_v3 = vmul.f32 %v4911_v58, %v7180_v25  ;;  %v4913_v6 = vpop.eup %4912  ;;  %v3078_v59 = vor.u32 1.1754944e-38, %v3077_v56  ;;  %v3915_v19 = vand.u32 2147483647, %v7183_v18  ;;  %v527_v25 = vpop.f32.mrf.mxu1 }
 0x25e   :  { %v7221_v61 = vadd.f32 1e-09, %v759_v62  ;;  %v3965_v47 = vmul.f32 0.6931472, %v4913_v6  ;;  %vm3072_vm5 = vweird.f32 %v4911_v58  ;;  %v3917_v42 = vand.u32 2147483648, %v7183_v18 }
 0x25f   :  { %v1670_v30 = vadd.f32 %v4907_v21, %v1669_v7  ;;  %v3068_v48 = vsub.f32 1.0, %v3067_v3  ;;  %v4915_v20 = vpop.eup %4914  ;;  %v2047_v5 = vsub.f32 1.0, %v1823_v51  ;;  %v2103_v60 = vsub.f32 1.0, %v1879_v13  ;;  %vm7232_vm6 = vmor %vm3071_vm2, %vm3072_vm5 }
 0x260   :  { %4918 = vrcp.f32 %v7221_v61  ;;  %v4917_v23 = vpop.eup %4916  ;;  %v4174_v38 = vadd.f32 %v3965_v47, %v1725_v12  ;;  %v3907_v54 = vmul.f32 %v4915_v20, %v7183_v18  ;;  %vm3912_vm8 = vweird.f32 %v4915_v20 }
 0x261   :  { %v1674_v8 = vsel %vm7212_vm3, %v4907_v21, %v1670_v30  ;;  %v3069_v34 = vmul.f32 %v4911_v58, %v3068_v48  ;;  %v4077_v10 = vmul.f32 0.6931472, %v4917_v23  ;;  %vm7236_vm7 = vcmp.eq.f32.partialorder %v3915_v19, 8.507059e+37  ;;  %vm7253_vm9 = vmor %vm3911_vm4, %vm3912_vm8  ;;  %v1880_v48 = vld [vmem:[#allocation2 + $0x240] sm:$0xff] }
 0x262   :  { %v1679_v2 = vsel %vm7203_vm1, %v1678_v16, %v1674_v8  ;;  %v4286_v39 = vmul.f32 -10.0, %v4174_v38  ;;  %v3908_v36 = vsub.f32 1.0, %v3907_v54  ;;  %v3918_v49 = vor.u32 1.1754944e-38, %v3917_v42  ;;  %v1824_v16 = vld [vmem:[#allocation2 + $0x80] sm:$0xff] }
 0x263   :  { %v1680_v40 = vmul.f32 %v1679_v2, %v7170_v4  ;;  %v3070_v14 = vadd.f32 %v4911_v58, %v3069_v34  ;;  %v4230_v41 = vadd.f32 %v4077_v10, %v1725_v12  ;;  %v7241_v27 = vadd.f32 1e-09, %v2047_v5 }
 0x264   :  { %v7243_v45 = vadd.f32 1e-09, %v2103_v60  ;;  %4399 = vst [vmem:[#allocation5 + $0x70] sm:$0xff] %v4286_v39  ;;  %v3909_v15 = vmul.f32 %v4915_v20, %v3908_v36  ;;  %v1090_v46 = vand.u32 2147483647, %v7221_v61  ;;  %v1092_v22 = vand.u32 2147483648, %v7221_v61 }
 0x265   :  { %4920 = vlog2.f32 %v1680_v40  ;;  %v3074_v52 = vsel %vm7232_vm6, %v4911_v58, %v3070_v14  ;;  %v4342_v31 = vmul.f32 -10.0, %v4230_v41  ;;  %v760_v50 = vsub.f32 1.0, %v527_v25 }
 0x266   :  { %v4919_v33 = vpop.eup %4918  ;;  %v3079_v4 = vsel %vm7216_vm12, %v3078_v59, %v3074_v52  ;;  %4922 = vrcp.f32 %v7241_v27  ;;  %v3910_v21 = vadd.f32 %v4915_v20, %v3909_v15  ;;  %v7261_v55 = vadd.f32 1e-09, %v1823_v51 }
 0x267   :  { %v3080_v43 = vmul.f32 %v3079_v4, %v7189_v17  ;;  %v1082_v29 = vmul.f32 %v4919_v33, %v7221_v61  ;;  %4455 = vst [vmem:[#allocation5 + $0x230] sm:$0xff] %v4342_v31  ;;  %v7263_v57 = vadd.f32 1e-09, %v1879_v13  ;;  %4924 = vrcp.f32 %v7243_v45 }
 0x268   :  { %v3914_v18 = vsel %vm7253_vm9, %v4915_v20, %v3910_v21  ;;  %v7268_v26 = vadd.f32 1e-09, %v527_v25  ;;  %vm1086_vm10 = vweird.f32 %v7221_v61  ;;  %vm7273_vm11 = vcmp.eq.f32.partialorder %v1090_v46, 8.507059e+37  ;;  %v7321_v25 = vpop.f32.mrf.mxu3 }
 0x269   :  { %4926 = vlog2.f32 %v3080_v43  ;;  %v1083_v1 = vsub.f32 1.0, %v1082_v29  ;;  %v3919_v17 = vsel %vm7236_vm7, %v3918_v49, %v3914_v18  ;;  %v1093_v53 = vor.u32 1.1754944e-38, %v1092_v22 }
 0x26a   :  { %v3920_v44 = vmul.f32 %v3919_v17, %v7194_v32  ;;  %vm1087_vm13 = vweird.f32 %v4919_v33  ;;  %v7278_v9 = vadd.f32 1e-09, %v760_v50  ;;  %vm2486_vm15 = vweird.f32 %v7241_v27 }
 0x26b   :  { %v4921_v56 = vpop.eup %4920  ;;  %v1084_v58 = vmul.f32 %v4919_v33, %v1083_v1  ;;  %v2490_v12 = vand.u32 2147483647, %v7241_v27  ;;  %v2492_v7 = vand.u32 2147483648, %v7241_v27  ;;  %vm3326_vm0 = vweird.f32 %v7243_v45  ;;  %vm1088_vm1 = vmor %vm1086_vm10, %vm1087_vm13 }
 0x26c   :  { %v4923_v62 = vpop.eup %4922  ;;  %4928 = vlog2.f32 %v3920_v44  ;;  %v3330_v32 = vand.u32 2147483647, %v7243_v45  ;;  %v1805_v6 = vmul.f32 0.6931472, %v4921_v56  ;;  %v3332_v35 = vand.u32 2147483648, %v7243_v45  ;;  %v1851_v44 = vld [vmem:[#allocation2 + $0x158] sm:$0xff] }
 0x26d   :  { %v1085_v3 = vadd.f32 %v4919_v33, %v1084_v58  ;;  %v2482_v51 = vmul.f32 %v4923_v62, %v7241_v27  ;;  %v4925_v13 = vpop.eup %4924  ;;  %4930 = vrcp.f32 %v7278_v9  ;;  %v2048_v63 = vsub.f32 1.0, %v1824_v16 }
 0x26e   :  { %vm2487_vm2 = vweird.f32 %v4923_v62  ;;  %v3322_v30 = vmul.f32 %v4925_v13, %v7243_v45  ;;  %vm7293_vm4 = vcmp.eq.f32.partialorder %v2490_v12, 8.507059e+37  ;;  %v2493_v61 = vor.u32 1.1754944e-38, %v2492_v7 }
 0x26f   :  { %v4927_v59 = vpop.eup %4926  ;;  %v1089_v19 = vsel %vm1088_vm1, %v4919_v33, %v1085_v3  ;;  %v2483_v47 = vsub.f32 1.0, %v2482_v51  ;;  %vm3327_vm3 = vweird.f32 %v4925_v13  ;;  %vm7300_vm12 = vmor %vm2486_vm15, %vm2487_vm2  ;;  %vm7304_vm5 = vcmp.eq.f32.partialorder %v3330_v32, 8.507059e+37  ;;  %v7356_v32 = vld [vmem:[#allocation2 + $0x318] sm:$0xff] }
 0x270   :  { %v4045_v20 = vmul.f32 0.6931472, %v4927_v59  ;;  %v1094_v42 = vsel %vm7273_vm11, %v1093_v53, %v1089_v19  ;;  %v3323_v38 = vsub.f32 1.0, %v3322_v30  ;;  %v2104_v10 = vsub.f32 1.0, %v1880_v48  ;;  %vm7314_vm6 = vmor %vm3326_vm0, %vm3327_vm3 }
 0x271   :  { %v1095_v60 = vmul.f32 %v1094_v42, %v7196_v28  ;;  %v2484_v23 = vmul.f32 %v4923_v62, %v2483_v47  ;;  %v7308_v2 = vadd.f32 1e-09, %v2048_v63  ;;  %v3333_v39 = vor.u32 1.1754944e-38, %v3332_v35 }
 0x272   :  { %v4214_v8 = vadd.f32 %v4045_v20, %v1805_v6  ;;  %v4929_v0 = vpop.eup %4928  ;;  %v3324_v28 = vmul.f32 %v4925_v13, %v3323_v38  ;;  %v7310_v40 = vadd.f32 1e-09, %v1824_v16  ;;  %v7318_v27 = vadd.f32 1e-09, %v2104_v10 }
 0x273   :  { %v2485_v11 = vadd.f32 %v4923_v62, %v2484_v23  ;;  %v4931_v14 = vpop.eup %4930  ;;  %v4157_v36 = vmul.f32 0.6931472, %v4929_v0  ;;  %4932 = vrcp.f32 %v7308_v2  ;;  %v1105_v31 = vand.u32 2147483647, %v7278_v9 }
 0x274   :  { %v4326_v41 = vmul.f32 -10.0, %v4214_v8  ;;  %4934 = vlog2.f32 %v1095_v60  ;;  %v3325_v15 = vadd.f32 %v4925_v13, %v3324_v28  ;;  %v1097_v46 = vmul.f32 %v4931_v14, %v7278_v9 }
 0x275   :  { %v2489_v52 = vsel %vm7300_vm12, %v4923_v62, %v2485_v11  ;;  %v4270_v33 = vadd.f32 %v4157_v36, %v1805_v6  ;;  %v1107_v4 = vand.u32 2147483648, %v7278_v9  ;;  %v787_v21 = vsub.f32 1.0, %v7321_v25 }
 0x276   :  { %4439 = vst [vmem:[#allocation5 + $0x1b0] sm:$0xff] %v4326_v41  ;;  %v2494_v45 = vsel %vm7293_vm4, %v2493_v61, %v2489_v52  ;;  %v3329_v22 = vsel %vm7314_vm6, %v4925_v13, %v3325_v15  ;;  %v1098_v43 = vsub.f32 1.0, %v1097_v46  ;;  %v2505_v18 = vand.u32 2147483647, %v7308_v2 }
 0x277   :  { %v2495_v24 = vmul.f32 %v2494_v45, %v7261_v55  ;;  %v4382_v29 = vmul.f32 -10.0, %v4270_v33  ;;  %v3334_v50 = vsel %vm7304_vm5, %v3333_v39, %v3329_v22  ;;  %4936 = vrcp.f32 %v7318_v27 }
 0x278   :  { %v3335_v1 = vmul.f32 %v3334_v50, %v7263_v57  ;;  %v1099_v17 = vmul.f32 %v4931_v14, %v1098_v43  ;;  %vm1102_vm8 = vweird.f32 %v4931_v14  ;;  %vm1101_vm7 = vweird.f32 %v7278_v9 }
 0x279   :  { %4938 = vlog2.f32 %v2495_v24  ;;  %v4933_v55 = vpop.eup %4932  ;;  %4495 = vst [vmem:[#allocation5 + $0x370] sm:$0xff] %v4382_v29  ;;  %vm7340_vm9 = vcmp.eq.f32.partialorder %v1105_v31, 8.507059e+37  ;;  %v1108_v53 = vor.u32 1.1754944e-38, %v1107_v4  ;;  %v2507_v56 = vand.u32 2147483648, %v7308_v2  ;;  %vm1103_vm10 = vmor %vm1101_vm7, %vm1102_vm8  ;;  %v7399_v24 = vpop.f32.mrf.mxu2 }
 0x27a   :  { %v4935_v58 = vpop.eup %4934  ;;  %4940 = vlog2.f32 %v3335_v1  ;;  %v1100_v16 = vadd.f32 %v4931_v14, %v1099_v17  ;;  %v7345_v62 = vadd.f32 1e-09, %v1880_v48  ;;  %v2497_v57 = vmul.f32 %v4933_v55, %v7308_v2  ;;  %v7409_v1 = vld [vmem:[#allocation2 + $0x88] sm:$0xff] }
 0x27b   :  { %vm2501_vm11 = vweird.f32 %v7308_v2  ;;  %vm7349_vm13 = vcmp.eq.f32.partialorder %v2505_v18, 8.507059e+37  ;;  %v3347_v12 = vand.u32 2147483648, %v7318_v27  ;;  %v7354_v7 = vadd.f32 1e-09, %v787_v21 }
 0x27c   :  { %v1104_v3 = vsel %vm1103_vm10, %v4931_v14, %v1100_v16  ;;  %v2498_v51 = vsub.f32 1.0, %v2497_v57  ;;  %vm2502_vm15 = vweird.f32 %v4933_v55  ;;  %v2075_v13 = vsub.f32 1.0, %v1851_v44 }
 0x27d   :  { %v4937_v6 = vpop.eup %4936  ;;  %v1727_v35 = vmul.f32 0.6931472, %v4935_v58  ;;  %v1109_v63 = vsel %vm7340_vm9, %v1108_v53, %v1104_v3  ;;  %v2508_v59 = vor.u32 1.1754944e-38, %v2507_v56  ;;  %4942 = vrcp.f32 %v7354_v7  ;;  %vm7366_vm1 = vmor %vm2501_vm11, %vm2502_vm15  ;;  %v1881_v53 = vld [vmem:[#allocation2 + $0x248] sm:$0xff] }
 0x27e   :  { %v1110_v47 = vmul.f32 %v1109_v63, %v7268_v26  ;;  %v2499_v30 = vmul.f32 %v4933_v55, %v2498_v51  ;;  %v3337_v48 = vmul.f32 %v4937_v6, %v7318_v27  ;;  %vm3341_vm0 = vweird.f32 %v7318_v27 }
 0x27f   :  { %v4939_v19 = vpop.eup %4938  ;;  %v3345_v5 = vand.u32 2147483647, %v7318_v27  ;;  %v3348_v61 = vor.u32 1.1754944e-38, %v3347_v12  ;;  %v2131_v60 = vsub.f32 1.0, %v7356_v32  ;;  %vm3342_vm2 = vweird.f32 %v4937_v6 }
 0x280   :  { %v3967_v20 = vmul.f32 0.6931472, %v4939_v19  ;;  %v4941_v23 = vpop.eup %4940  ;;  %v2500_v38 = vadd.f32 %v4933_v55, %v2499_v30  ;;  %v3338_v26 = vsub.f32 1.0, %v3337_v48  ;;  %v7372_v8 = vadd.f32 1e-09, %v2075_v13  ;;  %vm7384_vm4 = vmor %vm3341_vm0, %vm3342_vm2 }
 0x281   :  { %v4079_v34 = vmul.f32 0.6931472, %v4941_v23  ;;  %4944 = vlog2.f32 %v1110_v47  ;;  %v7374_v10 = vadd.f32 1e-09, %v2131_v60  ;;  %v1510_v11 = vand.u32 2147483647, %v7354_v7 }
 0x282   :  { %v4175_v54 = vadd.f32 %v3967_v20, %v1727_v35  ;;  %v2504_v2 = vsel %vm7366_vm1, %v4933_v55, %v2500_v38  ;;  %v3339_v0 = vmul.f32 %v4937_v6, %v3338_v26  ;;  %4946 = vrcp.f32 %v7372_v8 }
 0x283   :  { %v4943_v28 = vpop.eup %4942  ;;  %v4231_v39 = vadd.f32 %v4079_v34, %v1727_v35  ;;  %v2509_v36 = vsel %vm7349_vm13, %v2508_v59, %v2504_v2  ;;  %v1512_v49 = vand.u32 2147483648, %v7354_v7  ;;  %vm3346_vm3 = vcmp.eq.f32.partialorder %v3345_v5, 8.507059e+37 }
 0x284   :  { %v4287_v14 = vmul.f32 -10.0, %v4175_v54  ;;  %v2510_v52 = vmul.f32 %v2509_v36, %v7310_v40  ;;  %v3340_v15 = vadd.f32 %v4937_v6, %v3339_v0  ;;  %v1502_v46 = vmul.f32 %v4943_v28, %v7354_v7 }
 0x285   :  { %v4343_v33 = vmul.f32 -10.0, %v4231_v39  ;;  %v731_v45 = vadd.f32 1e-09, %v7321_v25  ;;  %v7393_v31 = vadd.f32 1e-09, %v1851_v44  ;;  %4948 = vrcp.f32 %v7374_v10 }
 0x286   :  { %4400 = vst.msk [vmem:[#allocation5 + $0x78] sm:$0xff] %vm4385_vm14, %v4287_v14  ;;  %v3344_v27 = vsel %vm7384_vm4, %v4937_v6, %v3340_v15  ;;  %4950 = vlog2.f32 %v2510_v52  ;;  %v1503_v4 = vsub.f32 1.0, %v1502_v46  ;;  %v2912_v40 = vand.u32 2147483648, %v7372_v8  ;;  %v7456_v46 = vpop.f32.mrf.mxu1 }
 0x287   :  { %v4945_v22 = vpop.eup %4944  ;;  %4456 = vst.msk [vmem:[#allocation5 + $0x238] sm:$0xff] %vm4385_vm14, %v4343_v33  ;;  %v3349_v43 = vsel %vm3346_vm3, %v3348_v61, %v3344_v27  ;;  %vm1506_vm12 = vweird.f32 %v7354_v7  ;;  %vm7403_vm5 = vcmp.eq.f32.partialorder %v1510_v11, 8.507059e+37  ;;  %v1513_v21 = vor.u32 1.1754944e-38, %v1512_v49 }
 0x288   :  { %v4947_v29 = vpop.eup %4946  ;;  %v3350_v50 = vmul.f32 %v3349_v43, %v7345_v62  ;;  %v1504_v18 = vmul.f32 %v4943_v28, %v1503_v4  ;;  %vm1507_vm6 = vweird.f32 %v4943_v28  ;;  %vm2906_vm8 = vweird.f32 %v7372_v8 }
 0x289   :  { %v2902_v17 = vmul.f32 %v4947_v29, %v7372_v8  ;;  %v2910_v55 = vand.u32 2147483647, %v7372_v8  ;;  %vm3746_vm7 = vweird.f32 %v7374_v10  ;;  %v761_v37 = vsub.f32 1.0, %v7399_v24  ;;  %vm1508_vm9 = vmor %vm1506_vm12, %vm1507_vm6 }
 0x28a   :  { %v1729_v56 = vmul.f32 0.6931472, %v4945_v22  ;;  %4952 = vlog2.f32 %v3350_v50  ;;  %v1505_v44 = vadd.f32 %v4943_v28, %v1504_v18  ;;  %v2913_v58 = vor.u32 1.1754944e-38, %v2912_v40  ;;  %v1826_v18 = vld [vmem:[#allocation2 + $0x90] sm:$0xff] }
 0x28b   :  { %v4949_v16 = vpop.eup %4948  ;;  %v2903_v62 = vsub.f32 1.0, %v2902_v17  ;;  %vm2907_vm10 = vweird.f32 %v4947_v29  ;;  %v7417_v57 = vadd.f32 1e-09, %v761_v37  ;;  %v2049_v9 = vsub.f32 1.0, %v7409_v1 }
 0x28c   :  { %v4951_v12 = vpop.eup %4950  ;;  %v1509_v3 = vsel %vm1508_vm9, %v4943_v28, %v1505_v44  ;;  %v3742_v51 = vmul.f32 %v4949_v16, %v7374_v10  ;;  %v3752_v13 = vand.u32 2147483648, %v7374_v10  ;;  %v2105_v6 = vsub.f32 1.0, %v1881_v53  ;;  %vm7427_vm11 = vmor %vm2906_vm8, %vm2907_vm10 }
 0x28d   :  { %v3969_v35 = vmul.f32 0.6931472, %v4951_v12  ;;  %v1514_v63 = vsel %vm7403_vm5, %v1513_v21, %v1509_v3  ;;  %v2904_v59 = vmul.f32 %v4947_v29, %v2903_v62  ;;  %4954 = vrcp.f32 %v7417_v57  ;;  %v1882_v62 = vld [vmem:[#allocation2 + $0x250] sm:$0xff] }
 0x28e   :  { %v1515_v7 = vmul.f32 %v1514_v63, %v731_v45  ;;  %v3743_v47 = vsub.f32 1.0, %v3742_v51  ;;  %vm3747_vm13 = vweird.f32 %v4949_v16  ;;  %v3750_v30 = vand.u32 2147483647, %v7374_v10 }
 0x28f   :  { %v4176_v48 = vadd.f32 %v3969_v35, %v1729_v56  ;;  %v2905_v20 = vadd.f32 %v4947_v29, %v2904_v59  ;;  %vm2911_vm15 = vcmp.eq.f32.partialorder %v2910_v55, 8.507059e+37  ;;  %v7432_v42 = vadd.f32 1e-09, %v2049_v9  ;;  %vm7442_vm0 = vmor %vm3746_vm7, %vm3747_vm13 }
 0x290   :  { %v4953_v5 = vpop.eup %4952  ;;  %v2019_v61 = vadd.f32 1e-09, %v7356_v32  ;;  %v3744_v60 = vmul.f32 %v4949_v16, %v3743_v47  ;;  %v3753_v23 = vor.u32 1.1754944e-38, %v3752_v13  ;;  %v7435_v38 = vadd.f32 1e-09, %v2105_v6 }
 0x291   :  { %v4081_v26 = vmul.f32 0.6931472, %v4953_v5  ;;  %v4288_v8 = vmul.f32 -10.0, %v4176_v48  ;;  %4956 = vlog2.f32 %v1515_v7  ;;  %v2909_v34 = vsel %vm7427_vm11, %v4947_v29, %v2905_v20 }
 0x292   :  { %v2914_v2 = vsel %vm2911_vm15, %v2913_v58, %v2909_v34  ;;  %v3745_v0 = vadd.f32 %v4949_v16, %v3744_v60  ;;  %vm3751_vm1 = vcmp.eq.f32.partialorder %v3750_v30, 8.507059e+37  ;;  %4958 = vrcp.f32 %v7432_v42 }
 0x293   :  { %v4955_v32 = vpop.eup %4954  ;;  %v4232_v11 = vadd.f32 %v4081_v26, %v1729_v56  ;;  %4401 = vst [vmem:[#allocation5 + $0x80] sm:$0xff] %v4288_v8  ;;  %v2915_v28 = vmul.f32 %v2914_v2, %v7393_v31  ;;  %v1120_v39 = vand.u32 2147483647, %v7417_v57  ;;  %v1122_v14 = vand.u32 2147483648, %v7417_v57 }
 0x294   :  { %v3749_v10 = vsel %vm7442_vm0, %v4949_v16, %v3745_v0  ;;  %v705_v36 = vadd.f32 1e-09, %v7399_v24  ;;  %v1112_v41 = vmul.f32 %v4955_v32, %v7417_v57  ;;  %4960 = vrcp.f32 %v7435_v38 }
 0x295   :  { %v4344_v49 = vmul.f32 -10.0, %v4232_v11  ;;  %v3754_v52 = vsel %vm3751_vm1, %v3753_v23, %v3749_v10  ;;  %4962 = vlog2.f32 %v2915_v28  ;;  %v2520_v15 = vand.u32 2147483647, %v7432_v42 }
 0x296   :  { %v3755_v33 = vmul.f32 %v3754_v52, %v2019_v61  ;;  %v1113_v45 = vsub.f32 1.0, %v1112_v41  ;;  %v7459_v31 = vadd.f32 1e-09, %v7409_v1  ;;  %v7461_v27 = vadd.f32 1e-09, %v1881_v53 }
 0x297   :  { %v4957_v4 = vpop.eup %4956  ;;  %4457 = vst [vmem:[#allocation5 + $0x240] sm:$0xff] %v4344_v49  ;;  %vm1116_vm2 = vweird.f32 %v7417_v57  ;;  %vm7464_vm4 = vcmp.eq.f32.partialorder %v1120_v39, 8.507059e+37  ;;  %v1123_v24 = vor.u32 1.1754944e-38, %v1122_v14  ;;  %vm2516_vm3 = vweird.f32 %v7432_v42 }
 0x298   :  { %v4959_v22 = vpop.eup %4958  ;;  %4964 = vlog2.f32 %v3755_v33  ;;  %v1114_v43 = vmul.f32 %v4955_v32, %v1113_v45  ;;  %vm1117_vm12 = vweird.f32 %v4955_v32  ;;  %v762_v25 = vsub.f32 1.0, %v7456_v46  ;;  %v670_v33 = vpop.f32.mrf.mxu3 }
 0x299   :  { %v2512_v21 = vmul.f32 %v4959_v22, %v7432_v42  ;;  %vm7471_vm5 = vcmp.eq.f32.partialorder %v2520_v15, 8.507059e+37  ;;  %v2522_v50 = vand.u32 2147483648, %v7432_v42  ;;  %vm3356_vm6 = vweird.f32 %v7435_v38  ;;  %vm1118_vm8 = vmor %vm1116_vm2, %vm1117_vm12 }
 0x29a   :  { %v4961_v1 = vpop.eup %4960  ;;  %v1783_v17 = vmul.f32 0.6931472, %v4957_v4  ;;  %v1115_v55 = vadd.f32 %v4955_v32, %v1114_v43  ;;  %v3360_v37 = vand.u32 2147483647, %v7435_v38  ;;  %v7478_v53 = vadd.f32 1e-09, %v762_v25 }
 0x29b   :  { %v4963_v56 = vpop.eup %4962  ;;  %v2513_v44 = vsub.f32 1.0, %v2512_v21  ;;  %vm2517_vm7 = vweird.f32 %v4959_v22  ;;  %v3352_v58 = vmul.f32 %v4961_v1, %v7435_v38  ;;  %v3362_v16 = vand.u32 2147483648, %v7435_v38  ;;  %v1853_v25 = vld [vmem:[#allocation2 + $0x168] sm:$0xff] }
 0x29c   :  { %v4023_v9 = vmul.f32 0.6931472, %v4963_v56  ;;  %v1119_v12 = vsel %vm1118_vm8, %v4955_v32, %v1115_v55  ;;  %4966 = vrcp.f32 %v7478_v53  ;;  %v2050_v3 = vsub.f32 1.0, %v1826_v18  ;;  %vm7490_vm10 = vmor %vm2516_vm3, %vm2517_vm7 }
 0x29d   :  { %v1124_v51 = vsel %vm7464_vm4, %v1123_v24, %v1119_v12  ;;  %v2514_v13 = vmul.f32 %v4959_v22, %v2513_v44  ;;  %v3353_v6 = vsub.f32 1.0, %v3352_v58  ;;  %vm3357_vm9 = vweird.f32 %v4961_v1 }
 0x29e   :  { %v4965_v57 = vpop.eup %4964  ;;  %v4203_v35 = vadd.f32 %v4023_v9, %v1783_v17  ;;  %v1125_v63 = vmul.f32 %v1124_v51, %v705_v36  ;;  %v2523_v7 = vor.u32 1.1754944e-38, %v2522_v50  ;;  %v2106_v19 = vsub.f32 1.0, %v1882_v62  ;;  %vm7500_vm13 = vmor %vm3356_vm6, %vm3357_vm9 }
 0x29f   :  { %v4135_v47 = vmul.f32 0.6931472, %v4965_v57  ;;  %v2515_v30 = vadd.f32 %v4959_v22, %v2514_v13  ;;  %v3354_v48 = vmul.f32 %v4961_v1, %v3353_v6  ;;  %vm7494_vm11 = vcmp.eq.f32.partialorder %v3360_v37, 8.507059e+37 }
 0x2a0   :  { %v4315_v5 = vmul.f32 -10.0, %v4203_v35  ;;  %v3363_v42 = vor.u32 1.1754944e-38, %v3362_v16  ;;  %v1135_v60 = vand.u32 2147483647, %v7478_v53  ;;  %v7505_v23 = vadd.f32 1e-09, %v2050_v3 }
 0x2a1   :  { %v4259_v26 = vadd.f32 %v4135_v47, %v1783_v17  ;;  %4968 = vlog2.f32 %v1125_v63  ;;  %v2519_v8 = vsel %vm7490_vm10, %v4959_v22, %v2515_v30  ;;  %v3355_v34 = vadd.f32 %v4961_v1, %v3354_v48 }
 0x2a2   :  { %v4967_v54 = vpop.eup %4966  ;;  %4428 = vst.msk [vmem:[#allocation5 + $0x158] sm:$0xff] %vm4385_vm14, %v4315_v5  ;;  %v2524_v38 = vsel %vm7471_vm5, %v2523_v7, %v2519_v8  ;;  %v1137_v2 = vand.u32 2147483648, %v7478_v53  ;;  %v7513_v0 = vadd.f32 1e-09, %v2106_v19  ;;  %4970 = vrcp.f32 %v7505_v23 }
 0x2a3   :  { %v4371_v32 = vmul.f32 -10.0, %v4259_v26  ;;  %v2525_v11 = vmul.f32 %v2524_v38, %v7459_v31  ;;  %v3359_v28 = vsel %vm7500_vm13, %v4961_v1, %v3355_v34  ;;  %v1127_v39 = vmul.f32 %v4967_v54, %v7478_v53  ;;  %v1909_v1 = vld [vmem:[#allocation2 + $0x328] sm:$0xff] }
 0x2a4   :  { %v3364_v14 = vsel %vm7494_vm11, %v3363_v42, %v3359_v28  ;;  %v706_v10 = vadd.f32 1e-09, %v7456_v46  ;;  %v7523_v36 = vadd.f32 1e-09, %v1826_v18  ;;  %v2535_v41 = vand.u32 2147483647, %v7505_v23  ;;  %v631_v42 = vpop.f32.mrf.mxu2 }
 0x2a5   :  { %4484 = vst.msk [vmem:[#allocation5 + $0x318] sm:$0xff] %vm4385_vm14, %v4371_v32  ;;  %v3365_v49 = vmul.f32 %v3364_v14, %v7461_v27  ;;  %4972 = vlog2.f32 %v2525_v11  ;;  %v1128_v52 = vsub.f32 1.0, %v1127_v39  ;;  %v2537_v15 = vand.u32 2147483648, %v7505_v23 }
 0x2a6   :  { %vm1131_vm15 = vweird.f32 %v7478_v53  ;;  %vm7530_vm0 = vcmp.eq.f32.partialorder %v1135_v60, 8.507059e+37  ;;  %v7534_v46 = vadd.f32 1e-09, %v1882_v62  ;;  %4974 = vrcp.f32 %v7513_v0 }
 0x2a7   :  { %v4969_v31 = vpop.eup %4968  ;;  %4976 = vlog2.f32 %v3365_v49  ;;  %v1129_v4 = vmul.f32 %v4967_v54, %v1128_v52  ;;  %vm1132_vm1 = vweird.f32 %v4967_v54  ;;  %v1138_v27 = vor.u32 1.1754944e-38, %v1137_v2 }
 0x2a8   :  { %v4971_v40 = vpop.eup %4970  ;;  %vm2531_vm2 = vweird.f32 %v7505_v23  ;;  %vm7538_vm4 = vcmp.eq.f32.partialorder %v2535_v41, 8.507059e+37  ;;  %v3375_v22 = vand.u32 2147483647, %v7513_v0  ;;  %v789_v43 = vsub.f32 1.0, %v670_v33  ;;  %vm1133_vm3 = vmor %vm1131_vm15, %vm1132_vm1 }
 0x2a9   :  { %v1130_v21 = vadd.f32 %v4967_v54, %v1129_v4  ;;  %v2527_v29 = vmul.f32 %v4971_v40, %v7505_v23  ;;  %v2538_v50 = vor.u32 1.1754944e-38, %v2537_v15  ;;  %v3377_v18 = vand.u32 2147483648, %v7513_v0 }
 0x2aa   :  { %v1731_v17 = vmul.f32 0.6931472, %v4969_v31  ;;  %vm3371_vm12 = vweird.f32 %v7513_v0  ;;  %v7548_v55 = vadd.f32 1e-09, %v670_v33  ;;  %v7550_v37 = vadd.f32 1e-09, %v789_v43 }
 0x2ab   :  { %v4973_v56 = vpop.eup %4972  ;;  %v1134_v44 = vsel %vm1133_vm3, %v4967_v54, %v1130_v21  ;;  %v2528_v58 = vsub.f32 1.0, %v2527_v29  ;;  %vm2532_vm5 = vweird.f32 %v4971_v40  ;;  %v2077_v16 = vsub.f32 1.0, %v1853_v25 }
 0x2ac   :  { %v4975_v62 = vpop.eup %4974  ;;  %v3971_v9 = vmul.f32 0.6931472, %v4973_v56  ;;  %v1139_v12 = vsel %vm7530_vm0, %v1138_v27, %v1134_v44  ;;  %vm7554_vm6 = vcmp.eq.f32.partialorder %v3375_v22, 8.507059e+37  ;;  %4978 = vrcp.f32 %v7550_v37  ;;  %vm7562_vm8 = vmor %vm2531_vm2, %vm2532_vm5 }
 0x2ad   :  { %v4977_v53 = vpop.eup %4976  ;;  %v1140_v51 = vmul.f32 %v1139_v12, %v706_v10  ;;  %v2529_v13 = vmul.f32 %v4971_v40, %v2528_v58  ;;  %v3367_v6 = vmul.f32 %v4975_v62, %v7513_v0  ;;  %v2133_v57 = vsub.f32 1.0, %v1909_v1  ;;  %v1827_v10 = vld [vmem:[#allocation2 + $0x98] sm:$0xff] }
 0x2ae   :  { %v4083_v35 = vmul.f32 0.6931472, %v4977_v53  ;;  %v4177_v63 = vadd.f32 %v3971_v9, %v1731_v17  ;;  %v3378_v7 = vor.u32 1.1754944e-38, %v3377_v18  ;;  %v7566_v19 = vadd.f32 1e-09, %v1853_v25  ;;  %v1883_v18 = vld [vmem:[#allocation2 + $0x258] sm:$0xff] }
 0x2af   :  { %v2530_v47 = vadd.f32 %v4971_v40, %v2529_v13  ;;  %v3368_v30 = vsub.f32 1.0, %v3367_v6  ;;  %vm3372_vm7 = vweird.f32 %v4975_v62  ;;  %v7568_v48 = vadd.f32 1e-09, %v2077_v16 }
 0x2b0   :  { %v4233_v20 = vadd.f32 %v4083_v35, %v1731_v17  ;;  %v4289_v5 = vmul.f32 -10.0, %v4177_v63  ;;  %4980 = vlog2.f32 %v1140_v51  ;;  %v7570_v61 = vadd.f32 1e-09, %v1909_v1  ;;  %vm7583_vm9 = vmor %vm3371_vm12, %vm3372_vm7 }
 0x2b1   :  { %v2534_v60 = vsel %vm7562_vm8, %v4971_v40, %v2530_v47  ;;  %v3369_v23 = vmul.f32 %v4975_v62, %v3368_v30  ;;  %v7574_v26 = vadd.f32 1e-09, %v2133_v57  ;;  %4982 = vrcp.f32 %v7568_v48  ;;  %v533_v47 = vpop.f32.mrf.mxu1 }
 0x2b2   :  { %v4979_v8 = vpop.eup %4978  ;;  %v4345_v34 = vmul.f32 -10.0, %v4233_v20  ;;  %4402 = vst.msk [vmem:[#allocation5 + $0x88] sm:$0xff] %vm4385_vm14, %v4289_v5  ;;  %v2539_v54 = vsel %vm7538_vm4, %v2538_v50, %v2534_v60  ;;  %v1540_v2 = vand.u32 2147483647, %v7550_v37  ;;  %v1542_v32 = vand.u32 2147483648, %v7550_v37 }
 0x2b3   :  { %v2540_v11 = vmul.f32 %v2539_v54, %v7523_v36  ;;  %v3370_v28 = vadd.f32 %v4975_v62, %v3369_v23  ;;  %v1532_v39 = vmul.f32 %v4979_v8, %v7550_v37  ;;  %v763_v14 = vsub.f32 1.0, %v631_v42 }
 0x2b4   :  { %4458 = vst.msk [vmem:[#allocation5 + $0x248] sm:$0xff] %vm4385_vm14, %v4345_v34  ;;  %4984 = vrcp.f32 %v7574_v26  ;;  %v7593_v0 = vadd.f32 1e-09, %v631_v42  ;;  %v7595_v41 = vadd.f32 1e-09, %v1827_v10  ;;  %vm1536_vm10 = vweird.f32 %v7550_v37 }
 0x2b5   :  { %v3374_v49 = vsel %vm7583_vm9, %v4975_v62, %v3370_v28  ;;  %4986 = vlog2.f32 %v2540_v11  ;;  %v1533_v52 = vsub.f32 1.0, %v1532_v39  ;;  %vm1537_vm11 = vweird.f32 %v4979_v8 }
 0x2b6   :  { %v4981_v36 = vpop.eup %4980  ;;  %v3379_v15 = vsel %vm7554_vm6, %v3378_v7, %v3374_v49  ;;  %vm7602_vm13 = vcmp.eq.f32.partialorder %v1540_v2, 8.507059e+37  ;;  %v1543_v45 = vor.u32 1.1754944e-38, %v1542_v32  ;;  %v2942_v40 = vand.u32 2147483648, %v7568_v48  ;;  %vm1538_vm1 = vmor %vm1536_vm10, %vm1537_vm11 }
 0x2b7   :  { %v4983_v31 = vpop.eup %4982  ;;  %v3380_v4 = vmul.f32 %v3379_v15, %v7534_v46  ;;  %v1534_v27 = vmul.f32 %v4979_v8, %v1533_v52  ;;  %v7608_v24 = vadd.f32 1e-09, %v763_v14  ;;  %vm2936_vm15 = vweird.f32 %v7568_v48 }
 0x2b8   :  { %v2932_v22 = vmul.f32 %v4983_v31, %v7568_v48  ;;  %v2940_v43 = vand.u32 2147483647, %v7568_v48  ;;  %vm3776_vm0 = vweird.f32 %v7574_v26  ;;  %v1733_v25 = vmul.f32 0.6931472, %v4981_v36 }
 0x2b9   :  { %4988 = vlog2.f32 %v3380_v4  ;;  %v1535_v21 = vadd.f32 %v4979_v8, %v1534_v27  ;;  %v3782_v29 = vand.u32 2147483648, %v7574_v26  ;;  %vm2937_vm2 = vweird.f32 %v4983_v31 }
 0x2ba   :  { %v4985_v50 = vpop.eup %4984  ;;  %v2933_v46 = vsub.f32 1.0, %v2932_v22  ;;  %4990 = vrcp.f32 %v7608_v24  ;;  %v2051_v1 = vsub.f32 1.0, %v1827_v10  ;;  %v2943_v44 = vor.u32 1.1754944e-38, %v2942_v40  ;;  %vm7626_vm3 = vmor %vm2936_vm15, %vm2937_vm2 }
 0x2bb   :  { %v4987_v17 = vpop.eup %4986  ;;  %v1539_v56 = vsel %vm1538_vm1, %v4979_v8, %v1535_v21  ;;  %v3772_v58 = vmul.f32 %v4985_v50, %v7574_v26  ;;  %v3780_v16 = vand.u32 2147483647, %v7574_v26  ;;  %vm3777_vm4 = vweird.f32 %v4985_v50  ;;  %v1828_v21 = vld [vmem:[#allocation2 + $0xa0] sm:$0xff] }
 0x2bc   :  { %v3973_v62 = vmul.f32 0.6931472, %v4987_v17  ;;  %v1544_v9 = vsel %vm7602_vm13, %v1543_v45, %v1539_v56  ;;  %v2934_v12 = vmul.f32 %v4983_v31, %v2933_v46  ;;  %v2107_v51 = vsub.f32 1.0, %v1883_v18  ;;  %vm7640_vm5 = vmor %vm3776_vm0, %vm3777_vm4 }
 0x2bd   :  { %v1545_v37 = vmul.f32 %v1544_v9, %v7548_v55  ;;  %v3773_v53 = vsub.f32 1.0, %v3772_v58  ;;  %v7630_v13 = vadd.f32 1e-09, %v2051_v1  ;;  %vm2941_vm12 = vcmp.eq.f32.partialorder %v2940_v43, 8.507059e+37  ;;  %v1884_v1 = vld [vmem:[#allocation2 + $0x260] sm:$0xff] }
 0x2be   :  { %v4178_v6 = vadd.f32 %v3973_v62, %v1733_v25  ;;  %v2935_v57 = vadd.f32 %v4983_v31, %v2934_v12  ;;  %v3783_v35 = vor.u32 1.1754944e-38, %v3782_v29  ;;  %v1150_v7 = vand.u32 2147483647, %v7608_v24 }
 0x2bf   :  { %v4989_v63 = vpop.eup %4988  ;;  %4992 = vlog2.f32 %v1545_v37  ;;  %v3774_v59 = vmul.f32 %v4985_v50, %v3773_v53  ;;  %v7633_v55 = vadd.f32 1e-09, %v2107_v51  ;;  %vm3781_vm6 = vcmp.eq.f32.partialorder %v3780_v16, 8.507059e+37 }
 0x2c0   :  { %v4991_v30 = vpop.eup %4990  ;;  %v4085_v48 = vmul.f32 0.6931472, %v4989_v63  ;;  %v4290_v20 = vmul.f32 -10.0, %v4178_v6  ;;  %v2939_v5 = vsel %vm7626_vm3, %v4983_v31, %v2935_v57  ;;  %4994 = vrcp.f32 %v7630_v13 }
 0x2c1   :  { %v2944_v60 = vsel %vm2941_vm12, %v2943_v44, %v2939_v5  ;;  %v3775_v23 = vadd.f32 %v4985_v50, %v3774_v59  ;;  %v1142_v8 = vmul.f32 %v4991_v30, %v7608_v24  ;;  %v1152_v38 = vand.u32 2147483648, %v7608_v24 }
 0x2c2   :  { %v4234_v34 = vadd.f32 %v4085_v48, %v1733_v25  ;;  %4403 = vst [vmem:[#allocation5 + $0x90] sm:$0xff] %v4290_v20  ;;  %v2945_v54 = vmul.f32 %v2944_v60, %v7566_v19  ;;  %v764_v2 = vsub.f32 1.0, %v533_v47  ;;  %v7650_v11 = vadd.f32 1e-09, %v1883_v18 }
 0x2c3   :  { %v3779_v26 = vsel %vm7640_vm5, %v4985_v50, %v3775_v23  ;;  %v1143_v32 = vsub.f32 1.0, %v1142_v8  ;;  %4996 = vrcp.f32 %v7633_v55  ;;  %vm7653_vm8 = vcmp.eq.f32.partialorder %v1150_v7, 8.507059e+37 }
 0x2c4   :  { %v4346_v28 = vmul.f32 -10.0, %v4234_v34  ;;  %v3784_v39 = vsel %vm3781_vm6, %v3783_v35, %v3779_v26  ;;  %4998 = vlog2.f32 %v2945_v54  ;;  %vm1147_vm7 = vweird.f32 %v4991_v30 }
 0x2c5   :  { %v4993_v10 = vpop.eup %4992  ;;  %v3785_v19 = vmul.f32 %v3784_v39, %v7570_v61  ;;  %v1144_v49 = vmul.f32 %v4991_v30, %v1143_v32  ;;  %v7658_v52 = vadd.f32 1e-09, %v533_v47  ;;  %vm1146_vm9 = vweird.f32 %v7608_v24 }
 0x2c6   :  { %v4995_v36 = vpop.eup %4994  ;;  %4459 = vst [vmem:[#allocation5 + $0x250] sm:$0xff] %v4346_v28  ;;  %v1153_v15 = vor.u32 1.1754944e-38, %v1152_v38  ;;  %v2550_v33 = vand.u32 2147483647, %v7630_v13  ;;  %v7662_v45 = vadd.f32 1e-09, %v764_v2  ;;  %vm1148_vm10 = vmor %vm1146_vm9, %vm1147_vm7  ;;  %vm2546_vm11 = vweird.f32 %v7630_v13 }
 0x2c7   :  { %5000 = vlog2.f32 %v3785_v19  ;;  %v1145_v31 = vadd.f32 %v4991_v30, %v1144_v49  ;;  %v2542_v4 = vmul.f32 %v4995_v36, %v7630_v13  ;;  %v2552_v27 = vand.u32 2147483648, %v7630_v13 }
 0x2c8   :  { %v1787_v61 = vmul.f32 0.6931472, %v4993_v10  ;;  %v3390_v40 = vand.u32 2147483647, %v7633_v55  ;;  %5002 = vrcp.f32 %v7662_v45  ;;  %vm2547_vm13 = vweird.f32 %v4995_v36  ;;  %v1855_v10 = vld [vmem:[#allocation2 + $0x178] sm:$0xff] }
 0x2c9   :  { %v4997_v24 = vpop.eup %4996  ;;  %v1149_v22 = vsel %vm1148_vm10, %v4991_v30, %v1145_v31  ;;  %v2543_v43 = vsub.f32 1.0, %v2542_v4  ;;  %v3392_v25 = vand.u32 2147483648, %v7633_v55  ;;  %vm7672_vm15 = vcmp.eq.f32.partialorder %v2550_v33, 8.507059e+37  ;;  %vm7681_vm1 = vmor %vm2546_vm11, %vm2547_vm13  ;;  %v1911_v31 = vld [vmem:[#allocation2 + $0x338] sm:$0xff] }
 0x2ca   :  { %v4999_v29 = vpop.eup %4998  ;;  %v1154_v50 = vsel %vm7653_vm8, %v1153_v15, %v1149_v22  ;;  %v3382_v18 = vmul.f32 %v4997_v24, %v7633_v55  ;;  %vm3386_vm0 = vweird.f32 %v7633_v55  ;;  %v2553_v58 = vor.u32 1.1754944e-38, %v2552_v27 }
 0x2cb   :  { %v4027_v17 = vmul.f32 0.6931472, %v4999_v29  ;;  %v1155_v56 = vmul.f32 %v1154_v50, %v7593_v0  ;;  %v2544_v44 = vmul.f32 %v4995_v36, %v2543_v43  ;;  %vm3387_vm2 = vweird.f32 %v4997_v24 }
 0x2cc   :  { %v3383_v62 = vsub.f32 1.0, %v3382_v18  ;;  %vm7685_vm4 = vcmp.eq.f32.partialorder %v3390_v40, 8.507059e+37  ;;  %v2052_v12 = vsub.f32 1.0, %v1828_v21  ;;  %v3393_v51 = vor.u32 1.1754944e-38, %v3392_v25  ;;  %vm7696_vm3 = vmor %vm3386_vm0, %vm3387_vm2 }
 0x2cd   :  { %v5001_v37 = vpop.eup %5000  ;;  %v4205_v3 = vadd.f32 %v4027_v17, %v1787_v61  ;;  %v2545_v53 = vadd.f32 %v4995_v36, %v2544_v44  ;;  %v2108_v0 = vsub.f32 1.0, %v1884_v1  ;;  %5004 = vlog2.f32 %v1155_v56 }
 0x2ce   :  { %v5003_v6 = vpop.eup %5002  ;;  %v4139_v57 = vmul.f32 0.6931472, %v5001_v37  ;;  %v3384_v13 = vmul.f32 %v4997_v24, %v3383_v62  ;;  %v7689_v35 = vadd.f32 1e-09, %v2052_v12  ;;  %v1165_v30 = vand.u32 2147483647, %v7662_v45 }
 0x2cf   :  { %v4317_v63 = vmul.f32 -10.0, %v4205_v3  ;;  %v2549_v59 = vsel %vm7681_vm1, %v4995_v36, %v2545_v53  ;;  %v1157_v47 = vmul.f32 %v5003_v6, %v7662_v45  ;;  %v1167_v42 = vand.u32 2147483648, %v7662_v45 }
 0x2d0   :  { %v4261_v48 = vadd.f32 %v4139_v57, %v1787_v61  ;;  %v2554_v20 = vsel %vm7672_vm15, %v2553_v58, %v2549_v59  ;;  %v3385_v5 = vadd.f32 %v4997_v24, %v3384_v13  ;;  %v7707_v23 = vadd.f32 1e-09, %v2108_v0 }
 0x2d1   :  { %4430 = vst.msk [vmem:[#allocation5 + $0x168] sm:$0xff] %vm4385_vm14, %v4317_v63  ;;  %v2555_v60 = vmul.f32 %v2554_v20, %v7595_v41  ;;  %v1158_v55 = vsub.f32 1.0, %v1157_v47  ;;  %5006 = vrcp.f32 %v7689_v35  ;;  %vm1161_vm12 = vweird.f32 %v7662_v45  ;;  %v673_v41 = vpop.f32.mrf.mxu3 }
 0x2d2   :  { %v4373_v8 = vmul.f32 -10.0, %v4261_v48  ;;  %v3389_v34 = vsel %vm7696_vm3, %v4997_v24, %v3385_v5  ;;  %vm1162_vm5 = vweird.f32 %v5003_v6  ;;  %v2565_v2 = vand.u32 2147483647, %v7689_v35 }
 0x2d3   :  { %v3394_v54 = vsel %vm7685_vm4, %v3393_v51, %v3389_v34  ;;  %5008 = vlog2.f32 %v2555_v60  ;;  %v1159_v38 = vmul.f32 %v5003_v6, %v1158_v55  ;;  %v5005_v26 = vpop.eup %5004  ;;  %vm7718_vm6 = vcmp.eq.f32.partialorder %v1165_v30, 8.507059e+37  ;;  %vm7731_vm8 = vmor %vm1161_vm12, %vm1162_vm5 }
 0x2d4   :  { %4486 = vst.msk [vmem:[#allocation5 + $0x328] sm:$0xff] %vm4385_vm14, %v4373_v8  ;;  %v3395_v32 = vmul.f32 %v3394_v54, %v7650_v11  ;;  %v7722_v39 = vadd.f32 1e-09, %v1828_v21  ;;  %v2567_v14 = vand.u32 2147483648, %v7689_v35  ;;  %v1168_v49 = vor.u32 1.1754944e-38, %v1167_v42  ;;  %v7796_v54 = vpop.f32.mrf.mxu2 }
 0x2d5   :  { %v1160_v19 = vadd.f32 %v5003_v6, %v1159_v38  ;;  %v7725_v36 = vadd.f32 1e-09, %v1884_v1  ;;  %5010 = vrcp.f32 %v7707_v23  ;;  %vm2561_vm7 = vweird.f32 %v7689_v35 }
 0x2d6   :  { %5012 = vlog2.f32 %v3395_v32  ;;  %v7736_v15 = vadd.f32 1e-09, %v673_v41  ;;  %v791_v33 = vsub.f32 1.0, %v673_v41  ;;  %v1735_v27 = vmul.f32 0.6931472, %v5005_v26 }
 0x2d7   :  { %v5007_v4 = vpop.eup %5006  ;;  %v1164_v61 = vsel %vm7731_vm8, %v5003_v6, %v1160_v19  ;;  %vm7740_vm9 = vcmp.eq.f32.partialorder %v2565_v2, 8.507059e+37  ;;  %v2079_v45 = vsub.f32 1.0, %v1855_v10  ;;  %v2568_v22 = vor.u32 1.1754944e-38, %v2567_v14 }
 0x2d8   :  { %v2557_v24 = vmul.f32 %v5007_v4, %v7689_v35  ;;  %v3405_v43 = vand.u32 2147483647, %v7707_v23  ;;  %v7746_v25 = vadd.f32 1e-09, %v791_v33  ;;  %v1169_v29 = vsel %vm7718_vm6, %v1168_v49, %v1164_v61  ;;  %v1829_v49 = vld [vmem:[#allocation2 + $0xa8] sm:$0xff] }
 0x2d9   :  { %v5009_v21 = vpop.eup %5008  ;;  %v3407_v50 = vand.u32 2147483648, %v7707_v23  ;;  %v2135_v46 = vsub.f32 1.0, %v1911_v31  ;;  %v7751_v18 = vadd.f32 1e-09, %v2079_v45  ;;  %vm2562_vm10 = vweird.f32 %v5007_v4 }
 0x2da   :  { %v3975_v1 = vmul.f32 0.6931472, %v5009_v21  ;;  %v2558_v17 = vsub.f32 1.0, %v2557_v24  ;;  %5014 = vrcp.f32 %v7746_v25  ;;  %vm3401_vm11 = vweird.f32 %v7707_v23  ;;  %vm7765_vm13 = vmor %vm2561_vm7, %vm2562_vm10 }
 0x2db   :  { %v5011_v56 = vpop.eup %5010  ;;  %v7755_v44 = vadd.f32 1e-09, %v1855_v10  ;;  %v7757_v58 = vadd.f32 1e-09, %v1911_v31  ;;  %v7759_v16 = vadd.f32 1e-09, %v2135_v46  ;;  %v1170_v12 = vmul.f32 %v1169_v29, %v7658_v52 }
 0x2dc   :  { %v5013_v62 = vpop.eup %5012  ;;  %v4179_v9 = vadd.f32 %v3975_v1, %v1735_v27  ;;  %v2559_v37 = vmul.f32 %v5007_v4, %v2558_v17  ;;  %v3397_v3 = vmul.f32 %v5011_v56, %v7707_v23  ;;  %v1570_v0 = vand.u32 2147483647, %v7746_v25 }
 0x2dd   :  { %v4087_v53 = vmul.f32 0.6931472, %v5013_v62  ;;  %v1572_v6 = vand.u32 2147483648, %v7746_v25  ;;  %5016 = vrcp.f32 %v7751_v18  ;;  %vm3402_vm15 = vweird.f32 %v5011_v56 }
 0x2de   :  { %v4291_v57 = vmul.f32 -10.0, %v4179_v9  ;;  %v2560_v13 = vadd.f32 %v5007_v4, %v2559_v37  ;;  %v3398_v63 = vsub.f32 1.0, %v3397_v3  ;;  %vm7772_vm0 = vcmp.eq.f32.partialorder %v3405_v43, 8.507059e+37  ;;  %vm7785_vm2 = vmor %vm3401_vm11, %vm3402_vm15 }
 0x2df   :  { %v4235_v52 = vadd.f32 %v4087_v53, %v1735_v27  ;;  %v3408_v35 = vor.u32 1.1754944e-38, %v3407_v50  ;;  %5018 = vrcp.f32 %v7759_v16  ;;  %vm1566_vm1 = vweird.f32 %v7746_v25 }
 0x2e0   :  { %v5015_v7 = vpop.eup %5014  ;;  %4404 = vst.msk [vmem:[#allocation5 + $0x98] sm:$0xff] %vm4385_vm14, %v4291_v57  ;;  %5020 = vlog2.f32 %v1170_v12  ;;  %v2564_v47 = vsel %vm7765_vm13, %v5007_v4, %v2560_v13  ;;  %v3399_v30 = vmul.f32 %v5011_v56, %v3398_v63  ;;  %vm7790_vm4 = vcmp.eq.f32.partialorder %v1570_v0, 8.507059e+37 }
 0x2e1   :  { %v4347_v48 = vmul.f32 -10.0, %v4235_v52  ;;  %v2569_v20 = vsel %vm7740_vm9, %v2568_v22, %v2564_v47  ;;  %v1562_v42 = vmul.f32 %v5015_v7, %v7746_v25  ;;  %v1573_v34 = vor.u32 1.1754944e-38, %v1572_v6  ;;  %v1885_v22 = vld [vmem:[#allocation2 + $0x268] sm:$0xff] }
 0x2e2   :  { %v2570_v55 = vmul.f32 %v2569_v20, %v7722_v39  ;;  %v3400_v8 = vadd.f32 %v5011_v56, %v3399_v30  ;;  %vm2966_vm3 = vweird.f32 %v7751_v18  ;;  %v2970_v2 = vand.u32 2147483647, %v7751_v18 }
 0x2e3   :  { %v5017_v38 = vpop.eup %5016  ;;  %4460 = vst.msk [vmem:[#allocation5 + $0x258] sm:$0xff] %vm4385_vm14, %v4347_v48  ;;  %v1563_v23 = vsub.f32 1.0, %v1562_v42  ;;  %v2972_v41 = vand.u32 2147483648, %v7751_v18  ;;  %vm3806_vm12 = vweird.f32 %v7759_v16  ;;  %v3810_v28 = vand.u32 2147483647, %v7759_v16  ;;  %v536_v42 = vpop.f32.mrf.mxu1 }
 0x2e4   :  { %v3404_v26 = vsel %vm7785_vm2, %v5011_v56, %v3400_v8  ;;  %5022 = vlog2.f32 %v2570_v55  ;;  %v2962_v32 = vmul.f32 %v5017_v38, %v7751_v18  ;;  %vm1567_vm5 = vweird.f32 %v5015_v7 }
 0x2e5   :  { %v5019_v39 = vpop.eup %5018  ;;  %v3409_v14 = vsel %vm7772_vm0, %v3408_v35, %v3404_v26  ;;  %v1564_v10 = vmul.f32 %v5015_v7, %v1563_v23  ;;  %v765_v19 = vsub.f32 1.0, %v7796_v54  ;;  %vm2967_vm6 = vweird.f32 %v5017_v38  ;;  %vm1568_vm7 = vmor %vm1566_vm1, %vm1567_vm5  ;;  %v1830_v26 = vld [vmem:[#allocation2 + $0xb0] sm:$0xff] }
 0x2e6   :  { %v5021_v11 = vpop.eup %5020  ;;  %v3410_v33 = vmul.f32 %v3409_v14, %v7725_v36  ;;  %v2963_v31 = vsub.f32 1.0, %v2962_v32  ;;  %v3802_v4 = vmul.f32 %v5019_v39, %v7759_v16  ;;  %vm3807_vm8 = vweird.f32 %v5019_v39  ;;  %vm7818_vm9 = vmor %vm2966_vm3, %vm2967_vm6  ;;  %v1886_v14 = vld [vmem:[#allocation2 + $0x270] sm:$0xff] }
 0x2e7   :  { %v1565_v27 = vadd.f32 %v5015_v7, %v1564_v10  ;;  %v3812_v61 = vand.u32 2147483648, %v7759_v16  ;;  %v7812_v40 = vadd.f32 1e-09, %v765_v19  ;;  %v2053_v43 = vsub.f32 1.0, %v1829_v49  ;;  %vm7829_vm11 = vmor %vm3806_vm12, %vm3807_vm8 }
 0x2e8   :  { %5024 = vlog2.f32 %v3410_v33  ;;  %v2964_v45 = vmul.f32 %v5017_v38, %v2963_v31  ;;  %v3803_v24 = vsub.f32 1.0, %v3802_v4  ;;  %v1737_v21 = vmul.f32 0.6931472, %v5021_v11 }
 0x2e9   :  { %v1569_v36 = vsel %vm1568_vm7, %v5015_v7, %v1565_v27  ;;  %v2973_v50 = vor.u32 1.1754944e-38, %v2972_v41  ;;  %5026 = vrcp.f32 %v7812_v40  ;;  %vm2971_vm10 = vcmp.eq.f32.partialorder %v2970_v2, 8.507059e+37  ;;  %v1913_v2 = vld [vmem:[#allocation2 + $0x348] sm:$0xff] }
 0x2ea   :  { %v5023_v46 = vpop.eup %5022  ;;  %v1574_v25 = vsel %vm7790_vm4, %v1573_v34, %v1569_v36  ;;  %v2965_v1 = vadd.f32 %v5017_v38, %v2964_v45  ;;  %v3804_v17 = vmul.f32 %v5019_v39, %v3803_v24  ;;  %v3813_v9 = vor.u32 1.1754944e-38, %v3812_v61 }
 0x2eb   :  { %v3977_v56 = vmul.f32 0.6931472, %v5023_v46  ;;  %v1575_v62 = vmul.f32 %v1574_v25, %v7736_v15  ;;  %v2109_v12 = vsub.f32 1.0, %v1885_v22  ;;  %vm3811_vm13 = vcmp.eq.f32.partialorder %v3810_v28, 8.507059e+37 }
 0x2ec   :  { %v2969_v37 = vsel %vm7818_vm9, %v5017_v38, %v2965_v1  ;;  %v3805_v3 = vadd.f32 %v5019_v39, %v3804_v17  ;;  %v7835_v53 = vadd.f32 1e-09, %v2053_v43  ;;  %v1180_v13 = vand.u32 2147483647, %v7812_v40 }
 0x2ed   :  { %v4180_v51 = vadd.f32 %v3977_v56, %v1737_v21  ;;  %5028 = vlog2.f32 %v1575_v62  ;;  %v2974_v0 = vsel %vm2971_vm10, %v2973_v50, %v2969_v37  ;;  %v7837_v15 = vadd.f32 1e-09, %v2109_v12 }
 0x2ee   :  { %v5025_v6 = vpop.eup %5024  ;;  %v2975_v16 = vmul.f32 %v2974_v0, %v7755_v44  ;;  %v3809_v57 = vsel %vm7829_vm11, %v5019_v39, %v3805_v3  ;;  %5030 = vrcp.f32 %v7835_v53  ;;  %v1182_v7 = vand.u32 2147483648, %v7812_v40  ;;  %v637_v0 = vpop.f32.mrf.mxu2 }
 0x2ef   :  { %v5027_v63 = vpop.eup %5026  ;;  %v4089_v52 = vmul.f32 0.6931472, %v5025_v6  ;;  %v4292_v59 = vmul.f32 -10.0, %v4180_v51  ;;  %v3814_v35 = vsel %vm3811_vm13, %v3813_v9, %v3809_v57  ;;  %v2580_v44 = vand.u32 2147483647, %v7835_v53 }
 0x2f0   :  { %v3815_v47 = vmul.f32 %v3814_v35, %v7757_v58  ;;  %5032 = vlog2.f32 %v2975_v16  ;;  %v1172_v30 = vmul.f32 %v5027_v63, %v7812_v40  ;;  %v709_v20 = vadd.f32 1e-09, %v7796_v54 }
 0x2f1   :  { %v4236_v48 = vadd.f32 %v4089_v52, %v1737_v21  ;;  %4405 = vst [vmem:[#allocation5 + $0xa0] sm:$0xff] %v4292_v59  ;;  %v7849_v5 = vadd.f32 1e-09, %v1829_v49  ;;  %5034 = vrcp.f32 %v7837_v15  ;;  %vm1176_vm15 = vweird.f32 %v7812_v40 }
 0x2f2   :  { %5036 = vlog2.f32 %v3815_v47  ;;  %v1173_v60 = vsub.f32 1.0, %v1172_v30  ;;  %v7853_v55 = vadd.f32 1e-09, %v1885_v22  ;;  %vm7855_vm0 = vcmp.eq.f32.partialorder %v1180_v13, 8.507059e+37 }
 0x2f3   :  { %v5029_v58 = vpop.eup %5028  ;;  %v4348_v8 = vmul.f32 -10.0, %v4236_v48  ;;  %v1183_v38 = vor.u32 1.1754944e-38, %v1182_v7  ;;  %vm2576_vm1 = vweird.f32 %v7835_v53  ;;  %vm1177_vm2 = vweird.f32 %v5027_v63  ;;  %v676_v7 = vpop.f32.mrf.mxu3 }
 0x2f4   :  { %v5031_v54 = vpop.eup %5030  ;;  %v1174_v23 = vmul.f32 %v5027_v63, %v1173_v60  ;;  %vm7860_vm4 = vcmp.eq.f32.partialorder %v2580_v44, 8.507059e+37  ;;  %v766_v41 = vsub.f32 1.0, %v536_v42  ;;  %v1791_v32 = vmul.f32 0.6931472, %v5029_v58  ;;  %vm1178_vm12 = vmor %vm1176_vm15, %vm1177_vm2 }
 0x2f5   :  { %4461 = vst [vmem:[#allocation5 + $0x260] sm:$0xff] %v4348_v8  ;;  %v2572_v28 = vmul.f32 %v5031_v54, %v7835_v53  ;;  %v2582_v39 = vand.u32 2147483648, %v7835_v53  ;;  %vm3416_vm3 = vweird.f32 %v7837_v15  ;;  %v3420_v49 = vand.u32 2147483647, %v7837_v15 }
 0x2f6   :  { %v5033_v10 = vpop.eup %5032  ;;  %v1175_v19 = vadd.f32 %v5027_v63, %v1174_v23  ;;  %v3422_v11 = vand.u32 2147483648, %v7837_v15  ;;  %v7869_v33 = vadd.f32 1e-09, %v766_v41  ;;  %vm2577_vm5 = vweird.f32 %v5031_v54  ;;  %v1857_v23 = vld [vmem:[#allocation2 + $0x188] sm:$0xff] }
 0x2f7   :  { %v5035_v31 = vpop.eup %5034  ;;  %v4031_v4 = vmul.f32 0.6931472, %v5033_v10  ;;  %v2573_v27 = vsub.f32 1.0, %v2572_v28  ;;  %v2054_v61 = vsub.f32 1.0, %v1830_v26  ;;  %v2110_v43 = vsub.f32 1.0, %v1886_v14  ;;  %vm7880_vm6 = vmor %vm2576_vm1, %vm2577_vm5 }
 0x2f8   :  { %v5037_v45 = vpop.eup %5036  ;;  %v1179_v24 = vsel %vm1178_vm12, %v5027_v63, %v1175_v19  ;;  %v3412_v22 = vmul.f32 %v5035_v31, %v7837_v15  ;;  %5038 = vrcp.f32 %v7869_v33  ;;  %v2583_v25 = vor.u32 1.1754944e-38, %v2582_v39 }
 0x2f9   :  { %v4143_v21 = vmul.f32 0.6931472, %v5037_v45  ;;  %v4207_v36 = vadd.f32 %v4031_v4, %v1791_v32  ;;  %v1184_v29 = vsel %vm7855_vm0, %v1183_v38, %v1179_v24  ;;  %v2574_v50 = vmul.f32 %v5031_v54, %v2573_v27 }
 0x2fa   :  { %v1185_v46 = vmul.f32 %v1184_v29, %v709_v20  ;;  %v3413_v1 = vsub.f32 1.0, %v3412_v22  ;;  %vm3417_vm8 = vweird.f32 %v5035_v31  ;;  %v7884_v18 = vadd.f32 1e-09, %v536_v42 }
 0x2fb   :  { %v4263_v17 = vadd.f32 %v4143_v21, %v1791_v32  ;;  %v4319_v56 = vmul.f32 -10.0, %v4207_v36  ;;  %v2575_v62 = vadd.f32 %v5031_v54, %v2574_v50  ;;  %vm7886_vm7 = vcmp.eq.f32.partialorder %v3420_v49, 8.507059e+37  ;;  %vm7897_vm9 = vmor %vm3416_vm3, %vm3417_vm8 }
 0x2fc   :  { %v3414_v9 = vmul.f32 %v5035_v31, %v3413_v1  ;;  %v3423_v37 = vor.u32 1.1754944e-38, %v3422_v11  ;;  %v7890_v3 = vadd.f32 1e-09, %v2054_v61  ;;  %5040 = vlog2.f32 %v1185_v46 }
 0x2fd   :  { %v4375_v53 = vmul.f32 -10.0, %v4263_v17  ;;  %4432 = vst.msk [vmem:[#allocation5 + $0x178] sm:$0xff] %vm4385_vm14, %v4319_v56  ;;  %v2579_v51 = vsel %vm7880_vm6, %v5031_v54, %v2575_v62  ;;  %v7901_v6 = vadd.f32 1e-09, %v2110_v43  ;;  %v1195_v63 = vand.u32 2147483647, %v7869_v33 }
 0x2fe   :  { %v5039_v16 = vpop.eup %5038  ;;  %v2584_v57 = vsel %vm7860_vm4, %v2583_v25, %v2579_v51  ;;  %v3415_v13 = vadd.f32 %v5035_v31, %v3414_v9  ;;  %5042 = vrcp.f32 %v7890_v3  ;;  %v1197_v59 = vand.u32 2147483648, %v7869_v33 }
 0x2ff   :  { %4488 = vst.msk [vmem:[#allocation5 + $0x338] sm:$0xff] %vm4385_vm14, %v4375_v53  ;;  %v2585_v52 = vmul.f32 %v2584_v57, %v7849_v5  ;;  %v1187_v15 = vmul.f32 %v5039_v16, %v7869_v33  ;;  %v7911_v35 = vadd.f32 1e-09, %v1830_v26  ;;  %v7915_v30 = vadd.f32 1e-09, %v1886_v14 }
 0x300   :  { %v3419_v47 = vsel %vm7897_vm9, %v5035_v31, %v3415_v13  ;;  %v2595_v44 = vand.u32 2147483647, %v7890_v3  ;;  %5044 = vrcp.f32 %v7901_v6  ;;  %v2597_v5 = vand.u32 2147483648, %v7890_v3 }
 0x301   :  { %v3424_v48 = vsel %vm7886_vm7, %v3423_v37, %v3419_v47  ;;  %5046 = vlog2.f32 %v2585_v52  ;;  %v1188_v20 = vsub.f32 1.0, %v1187_v15  ;;  %vm1191_vm10 = vweird.f32 %v7869_v33 }
 0x302   :  { %v3425_v42 = vmul.f32 %v3424_v48, %v7853_v55  ;;  %vm7924_vm11 = vcmp.eq.f32.partialorder %v1195_v63, 8.507059e+37  ;;  %v7928_v58 = vadd.f32 1e-09, %v676_v7  ;;  %v5041_v8 = vpop.eup %5040  ;;  %vm1192_vm13 = vweird.f32 %v5039_v16 }
 0x303   :  { %v1189_v34 = vmul.f32 %v5039_v16, %v1188_v20  ;;  %v1198_v38 = vor.u32 1.1754944e-38, %v1197_v59  ;;  %v793_v54 = vsub.f32 1.0, %v676_v7  ;;  %vm2591_vm15 = vweird.f32 %v7890_v3  ;;  %vm1193_vm2 = vmor %vm1191_vm10, %vm1192_vm13 }
 0x304   :  { %v5043_v41 = vpop.eup %5042  ;;  %5048 = vlog2.f32 %v3425_v42  ;;  %vm7931_vm0 = vcmp.eq.f32.partialorder %v2595_v44, 8.507059e+37  ;;  %vm3431_vm1 = vweird.f32 %v7901_v6  ;;  %v2598_v28 = vor.u32 1.1754944e-38, %v2597_v5 }
 0x305   :  { %v1190_v26 = vadd.f32 %v5039_v16, %v1189_v34  ;;  %v2587_v32 = vmul.f32 %v5043_v41, %v7890_v3  ;;  %v7937_v39 = vadd.f32 1e-09, %v793_v54  ;;  %v1739_v10 = vmul.f32 0.6931472, %v5041_v8  ;;  %v1831_v54 = vld [vmem:[#allocation2 + $0xb8] sm:$0xff] }
 0x306   :  { %v5045_v14 = vpop.eup %5044  ;;  %v3435_v19 = vand.u32 2147483647, %v7901_v6  ;;  %v2081_v49 = vsub.f32 1.0, %v1857_v23  ;;  %v2137_v11 = vsub.f32 1.0, %v1913_v2  ;;  %vm2592_vm4 = vweird.f32 %v5043_v41 }
 0x307   :  { %v5047_v31 = vpop.eup %5046  ;;  %v1194_v4 = vsel %vm1193_vm2, %v5039_v16, %v1190_v26  ;;  %v2588_v27 = vsub.f32 1.0, %v2587_v32  ;;  %v3427_v61 = vmul.f32 %v5045_v14, %v7901_v6  ;;  %v3437_v22 = vand.u32 2147483648, %v7901_v6  ;;  %vm7951_vm12 = vmor %vm2591_vm15, %vm2592_vm4 }
 0x308   :  { %v3979_v45 = vmul.f32 0.6931472, %v5047_v31  ;;  %v1199_v24 = vsel %vm7924_vm11, %v1198_v38, %v1194_v4  ;;  %5050 = vrcp.f32 %v7937_v39  ;;  %vm3432_vm3 = vweird.f32 %v5045_v14 }
 0x309   :  { %v1200_v33 = vmul.f32 %v1199_v24, %v7884_v18  ;;  %v2589_v43 = vmul.f32 %v5043_v41, %v2588_v27  ;;  %v3428_v21 = vsub.f32 1.0, %v3427_v61  ;;  %v7955_v46 = vadd.f32 1e-09, %v1857_v23  ;;  %vm7967_vm6 = vmor %vm3431_vm1, %vm3432_vm3 }
 0x30a   :  { %v5049_v36 = vpop.eup %5048  ;;  %v4181_v29 = vadd.f32 %v3979_v45, %v1739_v10  ;;  %v7957_v40 = vadd.f32 1e-09, %v2081_v49  ;;  %v7959_v25 = vadd.f32 1e-09, %v2137_v11  ;;  %vm7961_vm5 = vcmp.eq.f32.partialorder %v3435_v19, 8.507059e+37  ;;  %v1887_v19 = vld [vmem:[#allocation2 + $0x278] sm:$0xff] }
 0x30b   :  { %v4091_v1 = vmul.f32 0.6931472, %v5049_v36  ;;  %v2590_v17 = vadd.f32 %v5043_v41, %v2589_v43  ;;  %v3429_v56 = vmul.f32 %v5045_v14, %v3428_v21  ;;  %v3438_v12 = vor.u32 1.1754944e-38, %v3437_v22 }
 0x30c   :  { %v4293_v18 = vmul.f32 -10.0, %v4181_v29  ;;  %v7971_v37 = vadd.f32 1e-09, %v1913_v2  ;;  %5052 = vrcp.f32 %v7957_v40  ;;  %v1600_v57 = vand.u32 2147483647, %v7937_v39 }
 0x30d   :  { %v4237_v3 = vadd.f32 %v4091_v1, %v1739_v10  ;;  %5054 = vlog2.f32 %v1200_v33  ;;  %v2594_v53 = vsel %vm7951_vm12, %v5043_v41, %v2590_v17  ;;  %v3430_v51 = vadd.f32 %v5045_v14, %v3429_v56 }
 0x30e   :  { %v5051_v16 = vpop.eup %5050  ;;  %4406 = vst.msk [vmem:[#allocation5 + $0xa8] sm:$0xff] %vm4385_vm14, %v4293_v18  ;;  %v2599_v6 = vsel %vm7931_vm0, %v2598_v28, %v2594_v53  ;;  %v1602_v13 = vand.u32 2147483648, %v7937_v39  ;;  %5056 = vrcp.f32 %v7959_v25  ;;  %v3000_v47 = vand.u32 2147483647, %v7957_v40 }
 0x30f   :  { %v4349_v63 = vmul.f32 -10.0, %v4237_v3  ;;  %v2600_v52 = vmul.f32 %v2599_v6, %v7911_v35  ;;  %v3434_v15 = vsel %vm7967_vm6, %v5045_v14, %v3430_v51  ;;  %v1592_v59 = vmul.f32 %v5051_v16, %v7937_v39 }
 0x310   :  { %v3439_v7 = vsel %vm7961_vm5, %v3438_v12, %v3434_v15  ;;  %v7989_v44 = vadd.f32 1e-09, %v637_v0  ;;  %v767_v48 = vsub.f32 1.0, %v637_v0  ;;  %vm1596_vm8 = vweird.f32 %v7937_v39 }
 0x311   :  { %4462 = vst.msk [vmem:[#allocation5 + $0x268] sm:$0xff] %vm4385_vm14, %v4349_v63  ;;  %v3440_v20 = vmul.f32 %v3439_v7, %v7915_v30  ;;  %5058 = vlog2.f32 %v2600_v52  ;;  %v1593_v5 = vsub.f32 1.0, %v1592_v59  ;;  %vm7994_vm7 = vcmp.eq.f32.partialorder %v1600_v57, 8.507059e+37  ;;  %v539_v59 = vpop.f32.mrf.mxu1 }
 0x312   :  { %v5053_v35 = vpop.eup %5052  ;;  %v1603_v60 = vor.u32 1.1754944e-38, %v1602_v13  ;;  %vm2996_vm9 = vweird.f32 %v7957_v40  ;;  %v3002_v8 = vand.u32 2147483648, %v7957_v40  ;;  %vm1597_vm10 = vweird.f32 %v5051_v16 }
 0x313   :  { %v5055_v34 = vpop.eup %5054  ;;  %5060 = vlog2.f32 %v3440_v20  ;;  %v1594_v38 = vmul.f32 %v5051_v16, %v1593_v5  ;;  %v2992_v30 = vmul.f32 %v5053_v35, %v7957_v40  ;;  %vm8001_vm11 = vcmp.eq.f32.partialorder %v3000_v47, 8.507059e+37  ;;  %vm1598_vm0 = vmor %vm1596_vm8, %vm1597_vm10  ;;  %v679_v40 = vpop.f32.mrf.mxu3 }
 0x314   :  { %v5057_v23 = vpop.eup %5056  ;;  %vm3836_vm13 = vweird.f32 %v7959_v25  ;;  %v3840_v41 = vand.u32 2147483647, %v7959_v25  ;;  %v8007_v55 = vadd.f32 1e-09, %v767_v48  ;;  %vm2997_vm15 = vweird.f32 %v5053_v35 }
 0x315   :  { %v1595_v26 = vadd.f32 %v5051_v16, %v1594_v38  ;;  %v2993_v32 = vsub.f32 1.0, %v2992_v30  ;;  %v3832_v28 = vmul.f32 %v5057_v23, %v7959_v25  ;;  %v1741_v14 = vmul.f32 0.6931472, %v5055_v34  ;;  %vm8019_vm2 = vmor %vm2996_vm9, %vm2997_vm15 }
 0x316   :  { %v3842_v10 = vand.u32 2147483648, %v7959_v25  ;;  %5062 = vrcp.f32 %v8007_v55  ;;  %v2055_v49 = vsub.f32 1.0, %v1831_v54  ;;  %vm3837_vm1 = vweird.f32 %v5057_v23 }
 0x317   :  { %v5059_v11 = vpop.eup %5058  ;;  %v1599_v31 = vsel %vm1598_vm0, %v5051_v16, %v1595_v26  ;;  %v2994_v4 = vmul.f32 %v5053_v35, %v2993_v32  ;;  %v3833_v27 = vsub.f32 1.0, %v3832_v28  ;;  %v3003_v24 = vor.u32 1.1754944e-38, %v3002_v8  ;;  %vm8030_vm3 = vmor %vm3836_vm13, %vm3837_vm1  ;;  %v1832_v8 = vld [vmem:[#allocation2 + $0xc0] sm:$0xff] }
 0x318   :  { %v3981_v61 = vmul.f32 0.6931472, %v5059_v11  ;;  %v1604_v45 = vsel %vm7994_vm7, %v1603_v60, %v1599_v31  ;;  %vm8023_vm4 = vcmp.eq.f32.partialorder %v3840_v41, 8.507059e+37  ;;  %v2111_v29 = vsub.f32 1.0, %v1887_v19  ;;  %v1888_v26 = vld [vmem:[#allocation2 + $0x280] sm:$0xff] }
 0x319   :  { %v5061_v33 = vpop.eup %5060  ;;  %v1605_v43 = vmul.f32 %v1604_v45, %v7928_v58  ;;  %v2995_v21 = vadd.f32 %v5053_v35, %v2994_v4  ;;  %v3834_v36 = vmul.f32 %v5057_v23, %v3833_v27  ;;  %v3843_v17 = vor.u32 1.1754944e-38, %v3842_v10 }
 0x31a   :  { %v4093_v50 = vmul.f32 0.6931472, %v5061_v33  ;;  %v4182_v1 = vadd.f32 %v3981_v61, %v1741_v14  ;;  %v8034_v56 = vadd.f32 1e-09, %v2055_v49  ;;  %v8038_v58 = vadd.f32 1e-09, %v2111_v29 }
 0x31b   :  { %5064 = vlog2.f32 %v1605_v43  ;;  %v2999_v62 = vsel %vm8019_vm2, %v5053_v35, %v2995_v21  ;;  %v3835_v18 = vadd.f32 %v5057_v23, %v3834_v36  ;;  %v1210_v16 = vand.u32 2147483647, %v8007_v55 }
 0x31c   :  { %v5063_v9 = vpop.eup %5062  ;;  %v4238_v12 = vadd.f32 %v4093_v50, %v1741_v14  ;;  %v4294_v3 = vmul.f32 -10.0, %v4182_v1  ;;  %v3004_v25 = vsel %vm8001_vm11, %v3003_v24, %v2999_v62  ;;  %5066 = vrcp.f32 %v8034_v56 }
 0x31d   :  { %v3005_v53 = vmul.f32 %v3004_v25, %v7955_v46  ;;  %v3839_v51 = vsel %vm8030_vm3, %v5057_v23, %v3835_v18  ;;  %v1202_v0 = vmul.f32 %v5063_v9, %v8007_v55  ;;  %v1212_v13 = vand.u32 2147483648, %v8007_v55 }
 0x31e   :  { %v4350_v6 = vmul.f32 -10.0, %v4238_v12  ;;  %4407 = vst [vmem:[#allocation5 + $0xb0] sm:$0xff] %v4294_v3  ;;  %v3844_v57 = vsel %vm8023_vm4, %v3843_v17, %v3839_v51  ;;  %v8051_v63 = vadd.f32 1e-09, %v1831_v54  ;;  %v2610_v15 = vand.u32 2147483647, %v8034_v56 }
 0x31f   :  { %v3845_v52 = vmul.f32 %v3844_v57, %v7971_v37  ;;  %5068 = vlog2.f32 %v3005_v53  ;;  %v1203_v46 = vsub.f32 1.0, %v1202_v0  ;;  %vm1206_vm12 = vweird.f32 %v8007_v55 }
 0x320   :  { %4463 = vst [vmem:[#allocation5 + $0x270] sm:$0xff] %v4350_v6  ;;  %v8056_v7 = vadd.f32 1e-09, %v1887_v19  ;;  %v2612_v47 = vand.u32 2147483648, %v8034_v56  ;;  %5070 = vrcp.f32 %v8038_v58  ;;  %vm1207_vm5 = vweird.f32 %v5063_v9 }
 0x321   :  { %v5065_v48 = vpop.eup %5064  ;;  %5072 = vlog2.f32 %v3845_v52  ;;  %v1204_v20 = vmul.f32 %v5063_v9, %v1203_v46  ;;  %vm8060_vm6 = vcmp.eq.f32.partialorder %v1210_v16, 8.507059e+37  ;;  %v1213_v35 = vor.u32 1.1754944e-38, %v1212_v13  ;;  %vm1208_vm9 = vmor %vm1206_vm12, %vm1207_vm5 }
 0x322   :  { %v5067_v5 = vpop.eup %5066  ;;  %vm2606_vm8 = vweird.f32 %v8034_v56  ;;  %v8065_v42 = vadd.f32 1e-09, %v539_v59  ;;  %v768_v60 = vsub.f32 1.0, %v539_v59  ;;  %vm8068_vm7 = vcmp.eq.f32.partialorder %v2610_v15, 8.507059e+37 }
 0x323   :  { %v1205_v34 = vadd.f32 %v5063_v9, %v1204_v20  ;;  %v2602_v38 = vmul.f32 %v5067_v5, %v8034_v56  ;;  %v3450_v54 = vand.u32 2147483647, %v8038_v58  ;;  %v1795_v23 = vmul.f32 0.6931472, %v5065_v48 }
 0x324   :  { %v2613_v2 = vor.u32 1.1754944e-38, %v2612_v47  ;;  %vm3446_vm10 = vweird.f32 %v8038_v58  ;;  %v8076_v41 = vadd.f32 1e-09, %v768_v60  ;;  %vm2607_vm11 = vweird.f32 %v5067_v5 }
 0x325   :  { %v5069_v32 = vpop.eup %5068  ;;  %v1209_v28 = vsel %vm1208_vm9, %v5063_v9, %v1205_v34  ;;  %v2603_v14 = vsub.f32 1.0, %v2602_v38  ;;  %v2056_v10 = vsub.f32 1.0, %v1832_v8  ;;  %v3452_v31 = vand.u32 2147483648, %v8038_v58  ;;  %vm8086_vm13 = vmor %vm2606_vm8, %vm2607_vm11 }
 0x326   :  { %v5071_v19 = vpop.eup %5070  ;;  %v4035_v49 = vmul.f32 0.6931472, %v5069_v32  ;;  %v1214_v11 = vsel %vm8060_vm6, %v1213_v35, %v1209_v28  ;;  %5074 = vrcp.f32 %v8076_v41  ;;  %v2112_v45 = vsub.f32 1.0, %v1888_v26 }
 0x327   :  { %v5073_v55 = vpop.eup %5072  ;;  %v1215_v4 = vmul.f32 %v1214_v11, %v7989_v44  ;;  %v2604_v27 = vmul.f32 %v5067_v5, %v2603_v14  ;;  %v3442_v61 = vmul.f32 %v5071_v19, %v8038_v58  ;;  %vm8090_vm15 = vcmp.eq.f32.partialorder %v3450_v54, 8.507059e+37 }
 0x328   :  { %v4147_v39 = vmul.f32 0.6931472, %v5073_v55  ;;  %v4209_v24 = vadd.f32 %v4035_v49, %v1795_v23  ;;  %v8094_v43 = vadd.f32 1e-09, %v1832_v8  ;;  %vm3447_vm0 = vweird.f32 %v5071_v19  ;;  %v640_v55 = vpop.f32.mrf.mxu2 }
 0x329   :  { %v2605_v21 = vadd.f32 %v5067_v5, %v2604_v27  ;;  %v3443_v44 = vsub.f32 1.0, %v3442_v61  ;;  %v8096_v36 = vadd.f32 1e-09, %v2056_v10  ;;  %5076 = vlog2.f32 %v1215_v4  ;;  %vm8109_vm1 = vmor %vm3446_vm10, %vm3447_vm0 }
 0x32a   :  { %v4265_v29 = vadd.f32 %v4147_v39, %v1795_v23  ;;  %v4321_v50 = vmul.f32 -10.0, %v4209_v24  ;;  %v3453_v1 = vor.u32 1.1754944e-38, %v3452_v31  ;;  %v8100_v62 = vadd.f32 1e-09, %v2112_v45 }
 0x32b   :  { %v2609_v17 = vsel %vm8086_vm13, %v5067_v5, %v2605_v21  ;;  %v3444_v56 = vmul.f32 %v5071_v19, %v3443_v44  ;;  %5078 = vrcp.f32 %v8096_v36  ;;  %v1225_v25 = vand.u32 2147483647, %v8076_v41 }
 0x32c   :  { %v5075_v18 = vpop.eup %5074  ;;  %v4377_v9 = vmul.f32 -10.0, %v4265_v29  ;;  %4434 = vst.msk [vmem:[#allocation5 + $0x188] sm:$0xff] %vm4385_vm14, %v4321_v50  ;;  %v2614_v12 = vsel %vm8068_vm7, %v2613_v2, %v2609_v17  ;;  %v8114_v53 = vadd.f32 1e-09, %v1888_v26  ;;  %v795_v6 = vsub.f32 1.0, %v679_v40  ;;  %v1859_v2 = vld [vmem:[#allocation2 + $0x198] sm:$0xff] }
 0x32d   :  { %v2615_v51 = vmul.f32 %v2614_v12, %v8051_v63  ;;  %v3445_v0 = vadd.f32 %v5071_v19, %v3444_v56  ;;  %v1217_v16 = vmul.f32 %v5075_v18, %v8076_v41  ;;  %vm1221_vm2 = vweird.f32 %v8076_v41 }
 0x32e   :  { %4490 = vst.msk [vmem:[#allocation5 + $0x348] sm:$0xff] %vm4385_vm14, %v4377_v9  ;;  %v1227_v58 = vand.u32 2147483648, %v8076_v41  ;;  %5080 = vrcp.f32 %v8100_v62  ;;  %v8122_v57 = vadd.f32 1e-09, %v679_v40  ;;  %v2625_v63 = vand.u32 2147483647, %v8096_v36 }
 0x32f   :  { %v3449_v13 = vsel %vm8109_vm1, %v5071_v19, %v3445_v0  ;;  %5082 = vlog2.f32 %v2615_v51  ;;  %v1218_v52 = vsub.f32 1.0, %v1217_v16  ;;  %v5077_v46 = vpop.eup %5076  ;;  %vm1222_vm4 = vweird.f32 %v5075_v18  ;;  %v1915_v19 = vld [vmem:[#allocation2 + $0x358] sm:$0xff] }
 0x330   :  { %v3454_v15 = vsel %vm8090_vm15, %v3453_v1, %v3449_v13  ;;  %vm8129_vm3 = vcmp.eq.f32.partialorder %v1225_v25, 8.507059e+37  ;;  %v2627_v47 = vand.u32 2147483648, %v8096_v36  ;;  %v3465_v5 = vand.u32 2147483647, %v8100_v62  ;;  %vm1223_vm8 = vmor %vm1221_vm2, %vm1222_vm4 }
 0x331   :  { %v5079_v48 = vpop.eup %5078  ;;  %v3455_v20 = vmul.f32 %v3454_v15, %v8056_v7  ;;  %v1219_v37 = vmul.f32 %v5075_v18, %v1218_v52  ;;  %v8136_v35 = vadd.f32 1e-09, %v795_v6  ;;  %v1228_v60 = vor.u32 1.1754944e-38, %v1227_v58 }
 0x332   :  { %v2617_v8 = vmul.f32 %v5079_v48, %v8096_v36  ;;  %vm2621_vm12 = vweird.f32 %v8096_v36  ;;  %v3467_v34 = vand.u32 2147483648, %v8100_v62  ;;  %vm8141_vm5 = vcmp.eq.f32.partialorder %v2625_v63, 8.507059e+37 }
 0x333   :  { %5084 = vlog2.f32 %v3455_v20  ;;  %v1220_v38 = vadd.f32 %v5075_v18, %v1219_v37  ;;  %vm3461_vm6 = vweird.f32 %v8100_v62  ;;  %v1743_v54 = vmul.f32 0.6931472, %v5077_v46 }
 0x334   :  { %v5081_v7 = vpop.eup %5080  ;;  %v2618_v23 = vsub.f32 1.0, %v2617_v8  ;;  %vm2622_vm7 = vweird.f32 %v5079_v48  ;;  %5086 = vrcp.f32 %v8136_v35  ;;  %v2628_v28 = vor.u32 1.1754944e-38, %v2627_v47  ;;  %v1833_v8 = vld [vmem:[#allocation2 + $0xc8] sm:$0xff] }
 0x335   :  { %v5083_v26 = vpop.eup %5082  ;;  %v1224_v32 = vsel %vm1223_vm8, %v5075_v18, %v1220_v38  ;;  %v3457_v14 = vmul.f32 %v5081_v7, %v8100_v62  ;;  %vm8151_vm9 = vcmp.eq.f32.partialorder %v3465_v5, 8.507059e+37  ;;  %v3468_v31 = vor.u32 1.1754944e-38, %v3467_v34  ;;  %vm8161_vm10 = vmor %vm2621_vm12, %vm2622_vm7 }
 0x336   :  { %v3983_v49 = vmul.f32 0.6931472, %v5083_v26  ;;  %v1229_v41 = vsel %vm8129_vm3, %v1228_v60, %v1224_v32  ;;  %v2619_v11 = vmul.f32 %v5079_v48, %v2618_v23  ;;  %vm3462_vm11 = vweird.f32 %v5081_v7 }
 0x337   :  { %v1230_v4 = vmul.f32 %v1229_v41, %v8065_v42  ;;  %v3458_v61 = vsub.f32 1.0, %v3457_v14  ;;  %v2083_v45 = vsub.f32 1.0, %v1859_v2  ;;  %v8165_v22 = vadd.f32 1e-09, %v1859_v2  ;;  %vm8175_vm13 = vmor %vm3461_vm6, %vm3462_vm11 }
 0x338   :  { %v4183_v39 = vadd.f32 %v3983_v49, %v1743_v54  ;;  %v2620_v24 = vadd.f32 %v5079_v48, %v2619_v11  ;;  %v2139_v33 = vsub.f32 1.0, %v1915_v19  ;;  %v1630_v29 = vand.u32 2147483647, %v8136_v35 }
 0x339   :  { %v5085_v21 = vpop.eup %5084  ;;  %v3459_v44 = vmul.f32 %v5081_v7, %v3458_v61  ;;  %v8168_v42 = vadd.f32 1e-09, %v2083_v45  ;;  %v769_v50 = vsub.f32 1.0, %v640_v55  ;;  %5088 = vlog2.f32 %v1230_v4 }
 0x33a   :  { %v5087_v36 = vpop.eup %5086  ;;  %v4095_v1 = vmul.f32 0.6931472, %v5085_v21  ;;  %v4295_v40 = vmul.f32 -10.0, %v4183_v39  ;;  %v2624_v17 = vsel %vm8161_vm10, %v5079_v48, %v2620_v24  ;;  %v1632_v3 = vand.u32 2147483648, %v8136_v35  ;;  %v542_v21 = vpop.f32.mrf.mxu1 }
 0x33b   :  { %v2629_v18 = vsel %vm8141_vm5, %v2628_v28, %v2624_v17  ;;  %v3460_v9 = vadd.f32 %v5081_v7, %v3459_v44  ;;  %v1622_v12 = vmul.f32 %v5087_v36, %v8136_v35  ;;  %v8185_v0 = vadd.f32 1e-09, %v2139_v33 }
 0x33c   :  { %v4239_v25 = vadd.f32 %v4095_v1, %v1743_v54  ;;  %4408 = vst.msk [vmem:[#allocation5 + $0xb8] sm:$0xff] %vm4385_vm14, %v4295_v40  ;;  %v2630_v51 = vmul.f32 %v2629_v18, %v8094_v43  ;;  %5090 = vrcp.f32 %v8168_v42  ;;  %vm1626_vm15 = vweird.f32 %v8136_v35  ;;  %v1889_v54 = vld [vmem:[#allocation2 + $0x288] sm:$0xff] }
 0x33d   :  { %v3464_v62 = vsel %vm8175_vm13, %v5081_v7, %v3460_v9  ;;  %v1623_v16 = vsub.f32 1.0, %v1622_v12  ;;  %v8191_v6 = vadd.f32 1e-09, %v1915_v19  ;;  %v8195_v52 = vadd.f32 1e-09, %v769_v50 }
 0x33e   :  { %v4351_v58 = vmul.f32 -10.0, %v4239_v25  ;;  %v3469_v13 = vsel %vm8151_vm9, %v3468_v31, %v3464_v62  ;;  %5092 = vlog2.f32 %v2630_v51  ;;  %vm1627_vm0 = vweird.f32 %v5087_v36 }
 0x33f   :  { %v3470_v43 = vmul.f32 %v3469_v13, %v8114_v53  ;;  %v1624_v63 = vmul.f32 %v5087_v36, %v1623_v16  ;;  %v3030_v46 = vand.u32 2147483647, %v8168_v42  ;;  %v5089_v15 = vpop.eup %5088  ;;  %vm8200_vm1 = vcmp.eq.f32.partialorder %v1630_v29, 8.507059e+37  ;;  %vm1628_vm4 = vmor %vm1626_vm15, %vm1627_vm0 }
 0x340   :  { %4464 = vst.msk [vmem:[#allocation5 + $0x278] sm:$0xff] %vm4385_vm14, %v4351_v58  ;;  %v1633_v47 = vor.u32 1.1754944e-38, %v1632_v3  ;;  %v3032_v48 = vand.u32 2147483648, %v8168_v42  ;;  %5094 = vrcp.f32 %v8185_v0  ;;  %vm3026_vm2 = vweird.f32 %v8168_v42 }
 0x341   :  { %5096 = vlog2.f32 %v3470_v43  ;;  %v1625_v20 = vadd.f32 %v5087_v36, %v1624_v63  ;;  %v8207_v53 = vadd.f32 1e-09, %v640_v55  ;;  %vm3866_vm3 = vweird.f32 %v8185_v0  ;;  %v1834_v63 = vld [vmem:[#allocation2 + $0xd0] sm:$0xff] }
 0x342   :  { %v5091_v37 = vpop.eup %5090  ;;  %v3870_v5 = vand.u32 2147483647, %v8185_v0  ;;  %v3872_v60 = vand.u32 2147483648, %v8185_v0  ;;  %5098 = vrcp.f32 %v8195_v52  ;;  %v1745_v34 = vmul.f32 0.6931472, %v5089_v15 }
 0x343   :  { %v1629_v38 = vsel %vm1628_vm4, %v5087_v36, %v1625_v20  ;;  %v3022_v30 = vmul.f32 %v5091_v37, %v8168_v42  ;;  %vm8216_vm12 = vcmp.eq.f32.partialorder %v3030_v46, 8.507059e+37  ;;  %vm3027_vm5 = vweird.f32 %v5091_v37 }
 0x344   :  { %v5093_v35 = vpop.eup %5092  ;;  %v1634_v23 = vsel %vm8200_vm1, %v1633_v47, %v1629_v38  ;;  %v3033_v2 = vor.u32 1.1754944e-38, %v3032_v48  ;;  %v1240_v26 = vand.u32 2147483647, %v8195_v52  ;;  %v2057_v10 = vsub.f32 1.0, %v1833_v8  ;;  %vm8234_vm7 = vmor %vm3026_vm2, %vm3027_vm5 }
 0x345   :  { %v3985_v32 = vmul.f32 0.6931472, %v5093_v35  ;;  %v1635_v28 = vmul.f32 %v1634_v23, %v8122_v57  ;;  %v3023_v14 = vsub.f32 1.0, %v3022_v30  ;;  %vm8224_vm6 = vcmp.eq.f32.partialorder %v3870_v5, 8.507059e+37  ;;  %v1890_v35 = vld [vmem:[#allocation2 + $0x290] sm:$0xff] }
 0x346   :  { %v5095_v19 = vpop.eup %5094  ;;  %v3873_v41 = vor.u32 1.1754944e-38, %v3872_v60  ;;  %v1242_v11 = vand.u32 2147483648, %v8195_v52  ;;  %v2113_v31 = vsub.f32 1.0, %v1889_v54  ;;  %vm1236_vm8 = vweird.f32 %v8195_v52 }
 0x347   :  { %v5097_v55 = vpop.eup %5096  ;;  %v4184_v4 = vadd.f32 %v3985_v32, %v1745_v34  ;;  %5100 = vlog2.f32 %v1635_v28  ;;  %v3024_v27 = vmul.f32 %v5091_v37, %v3023_v14  ;;  %v3862_v61 = vmul.f32 %v5095_v19, %v8185_v0 }
 0x348   :  { %v5099_v57 = vpop.eup %5098  ;;  %v4097_v45 = vmul.f32 0.6931472, %v5097_v55  ;;  %vm3867_vm9 = vweird.f32 %v5095_v19  ;;  %v8238_v24 = vadd.f32 1e-09, %v2057_v10  ;;  %v8240_v33 = vadd.f32 1e-09, %v2113_v31 }
 0x349   :  { %v4296_v44 = vmul.f32 -10.0, %v4184_v4  ;;  %v3025_v29 = vadd.f32 %v5091_v37, %v3024_v27  ;;  %v3863_v50 = vsub.f32 1.0, %v3862_v61  ;;  %v1232_v36 = vmul.f32 %v5099_v57, %v8195_v52  ;;  %vm8259_vm11 = vmor %vm3866_vm3, %vm3867_vm9 }
 0x34a   :  { %vm8243_vm10 = vcmp.eq.f32.partialorder %v1240_v26, 8.507059e+37  ;;  %v4240_v42 = vadd.f32 %v4097_v45, %v1745_v34  ;;  %v8247_v40 = vadd.f32 1e-09, %v1833_v8  ;;  %v8249_v17 = vadd.f32 1e-09, %v1889_v54  ;;  %v643_v45 = vpop.f32.mrf.mxu2 }
 0x34b   :  { %5102 = vrcp.f32 %v8238_v24  ;;  %4409 = vst [vmem:[#allocation5 + $0xc0] sm:$0xff] %v4296_v44  ;;  %v3029_v56 = vsel %vm8234_vm7, %v5091_v37, %v3025_v29  ;;  %v3864_v18 = vmul.f32 %v5095_v19, %v3863_v50  ;;  %v1233_v9 = vsub.f32 1.0, %v1232_v36 }
 0x34c   :  { %v770_v12 = vsub.f32 1.0, %v542_v21  ;;  %v4352_v3 = vmul.f32 -10.0, %v4240_v42  ;;  %v3034_v25 = vsel %vm8216_vm12, %v3033_v2, %v3029_v56  ;;  %v2640_v62 = vand.u32 2147483647, %v8238_v24 }
 0x34d   :  { %5104 = vrcp.f32 %v8240_v33  ;;  %v5101_v16 = vpop.eup %5100  ;;  %v3035_v58 = vmul.f32 %v3034_v25, %v8165_v22  ;;  %v3865_v13 = vadd.f32 %v5095_v19, %v3864_v18  ;;  %v1234_v43 = vmul.f32 %v5099_v57, %v1233_v9 }
 0x34e   :  { %vm1237_vm13 = vweird.f32 %v5099_v57  ;;  %4465 = vst [vmem:[#allocation5 + $0x280] sm:$0xff] %v4352_v3  ;;  %v1243_v46 = vor.u32 1.1754944e-38, %v1242_v11  ;;  %vm2636_vm15 = vweird.f32 %v8238_v24  ;;  %v8267_v0 = vadd.f32 1e-09, %v542_v21  ;;  %v682_v3 = vpop.f32.mrf.mxu3 }
 0x34f   :  { %v8269_v15 = vadd.f32 1e-09, %v1834_v63  ;;  %v3869_v59 = vsel %vm8259_vm11, %v5095_v19, %v3865_v13  ;;  %5106 = vlog2.f32 %v3035_v58  ;;  %v1235_v47 = vadd.f32 %v5099_v57, %v1234_v43  ;;  %vm1238_vm0 = vmor %vm1236_vm8, %vm1237_vm13 }
 0x350   :  { %v2642_v48 = vand.u32 2147483648, %v8238_v24  ;;  %v3874_v20 = vsel %vm8224_vm6, %v3873_v41, %v3869_v59  ;;  %vm8278_vm1 = vcmp.eq.f32.partialorder %v2640_v62, 8.507059e+37  ;;  %v3480_v5 = vand.u32 2147483647, %v8240_v33 }
 0x351   :  { %v5103_v22 = vpop.eup %5102  ;;  %v8283_v60 = vadd.f32 1e-09, %v770_v12  ;;  %v1799_v8 = vmul.f32 0.6931472, %v5101_v16  ;;  %v3875_v34 = vmul.f32 %v3874_v20, %v8191_v6  ;;  %v1239_v38 = vsel %vm1238_vm0, %v5099_v57, %v1235_v47  ;;  %v1917_v20 = vld [vmem:[#allocation2 + $0x368] sm:$0xff] }
 0x352   :  { %v2632_v30 = vmul.f32 %v5103_v22, %v8238_v24  ;;  %v1244_v54 = vsel %vm8243_vm10, %v1243_v46, %v1239_v38  ;;  %vm2637_vm2 = vweird.f32 %v5103_v22  ;;  %v3482_v52 = vand.u32 2147483648, %v8240_v33 }
 0x353   :  { %v5105_v7 = vpop.eup %5104  ;;  %5108 = vrcp.f32 %v8283_v60  ;;  %v1245_v23 = vmul.f32 %v1244_v54, %v8207_v53  ;;  %v2643_v6 = vor.u32 1.1754944e-38, %v2642_v48  ;;  %vm3476_vm4 = vweird.f32 %v8240_v33  ;;  %vm8301_vm5 = vmor %vm2636_vm15, %vm2637_vm2 }
 0x354   :  { %5110 = vlog2.f32 %v3875_v34  ;;  %v2633_v2 = vsub.f32 1.0, %v2632_v30  ;;  %v3472_v26 = vmul.f32 %v5105_v7, %v8240_v33  ;;  %vm8294_vm3 = vcmp.eq.f32.partialorder %v3480_v5, 8.507059e+37 }
 0x355   :  { %v2058_v28 = vsub.f32 1.0, %v1834_v63  ;;  %v5107_v14 = vpop.eup %5106  ;;  %vm3477_vm12 = vweird.f32 %v5105_v7  ;;  %v2114_v49 = vsub.f32 1.0, %v1890_v35  ;;  %v8305_v11 = vadd.f32 1e-09, %v1890_v35 }
 0x356   :  { %v2634_v10 = vmul.f32 %v5103_v22, %v2633_v2  ;;  %v3473_v19 = vsub.f32 1.0, %v3472_v26  ;;  %v4039_v41 = vmul.f32 0.6931472, %v5107_v14  ;;  %5112 = vlog2.f32 %v1245_v23  ;;  %vm8311_vm6 = vmor %vm3476_vm4, %vm3477_vm12 }
 0x357   :  { %v8307_v31 = vadd.f32 1e-09, %v2058_v28  ;;  %v3483_v27 = vor.u32 1.1754944e-38, %v3482_v52  ;;  %vm1251_vm8 = vweird.f32 %v8283_v60  ;;  %v8316_v39 = vadd.f32 1e-09, %v2114_v49 }
 0x358   :  { %v2635_v55 = vadd.f32 %v5103_v22, %v2634_v10  ;;  %v3474_v4 = vmul.f32 %v5105_v7, %v3473_v19  ;;  %v4211_v57 = vadd.f32 %v4039_v41, %v1799_v8  ;;  %v1255_v50 = vand.u32 2147483647, %v8283_v60 }
 0x359   :  { %v5109_v61 = vpop.eup %5108  ;;  %5114 = vrcp.f32 %v8307_v31  ;;  %v1257_v42 = vand.u32 2147483648, %v8283_v60  ;;  %v2655_v12 = vand.u32 2147483647, %v8307_v31  ;;  %v2657_v58 = vand.u32 2147483648, %v8307_v31 }
 0x35a   :  { %v5111_v24 = vpop.eup %5110  ;;  %v2639_v21 = vsel %vm8301_vm5, %v5103_v22, %v2635_v55  ;;  %v3475_v44 = vadd.f32 %v5105_v7, %v3474_v4  ;;  %v1247_v29 = vmul.f32 %v5109_v61, %v8283_v60  ;;  %v4323_v36 = vmul.f32 -10.0, %v4211_v57 }
 0x35b   :  { %v4151_v33 = vmul.f32 0.6931472, %v5111_v24  ;;  %v2644_v1 = vsel %vm8278_vm1, %v2643_v6, %v2639_v21  ;;  %vm1252_vm7 = vweird.f32 %v5109_v61  ;;  %5116 = vrcp.f32 %v8316_v39 }
 0x35c   :  { %v2645_v56 = vmul.f32 %v2644_v1, %v8247_v40  ;;  %v3479_v18 = vsel %vm8311_vm6, %v5105_v7, %v3475_v44  ;;  %v1248_v9 = vsub.f32 1.0, %v1247_v29  ;;  %4436 = vst.msk [vmem:[#allocation5 + $0x198] sm:$0xff] %vm4385_vm14, %v4323_v36  ;;  %v5113_v62 = vpop.eup %5112  ;;  %vm8336_vm9 = vcmp.eq.f32.partialorder %v1255_v50, 8.507059e+37  ;;  %vm1253_vm11 = vmor %vm1251_vm8, %vm1252_vm7 }
 0x35d   :  { %v4267_v25 = vadd.f32 %v4151_v33, %v1799_v8  ;;  %v3484_v51 = vsel %vm8294_vm3, %v3483_v27, %v3479_v18  ;;  %v1258_v46 = vor.u32 1.1754944e-38, %v1257_v42  ;;  %v8340_v59 = vadd.f32 1e-09, %v682_v3 }
 0x35e   :  { %v3485_v16 = vmul.f32 %v3484_v51, %v8249_v17  ;;  %5118 = vlog2.f32 %v2645_v56  ;;  %v1249_v40 = vmul.f32 %v5109_v61, %v1248_v9  ;;  %vm8343_vm10 = vcmp.eq.f32.partialorder %v2655_v12, 8.507059e+37  ;;  %v1861_v17 = vld [vmem:[#allocation2 + $0x1a8] sm:$0xff] }
 0x35f   :  { %v5115_v13 = vpop.eup %5114  ;;  %v4379_v43 = vmul.f32 -10.0, %v4267_v25  ;;  %v1747_v37 = vmul.f32 0.6931472, %v5113_v62  ;;  %vm2651_vm13 = vweird.f32 %v8307_v31  ;;  %v3495_v5 = vand.u32 2147483647, %v8316_v39 }
 0x360   :  { %5120 = vlog2.f32 %v3485_v16  ;;  %v1250_v47 = vadd.f32 %v5109_v61, %v1249_v40  ;;  %v2647_v48 = vmul.f32 %v5115_v13, %v8307_v31  ;;  %v797_v8 = vsub.f32 1.0, %v682_v3 }
 0x361   :  { %4492 = vst.msk [vmem:[#allocation5 + $0x358] sm:$0xff] %vm4385_vm14, %v4379_v43  ;;  %vm2652_vm15 = vweird.f32 %v5115_v13  ;;  %v2658_v30 = vor.u32 1.1754944e-38, %v2657_v58  ;;  %v5117_v7 = vpop.eup %5116  ;;  %v3497_v52 = vand.u32 2147483648, %v8316_v39  ;;  %v2085_v23 = vsub.f32 1.0, %v1861_v17 }
 0x362   :  { %v1254_v34 = vsel %vm1253_vm11, %v5109_v61, %v1250_v47  ;;  %v2648_v38 = vsub.f32 1.0, %v2647_v48  ;;  %v8356_v35 = vadd.f32 1e-09, %v797_v8  ;;  %v3487_v6 = vmul.f32 %v5117_v7, %v8316_v39  ;;  %vm8362_vm0 = vmor %vm2651_vm13, %vm2652_vm15 }
 0x363   :  { %v1259_v54 = vsel %vm8336_vm9, %v1258_v46, %v1254_v34  ;;  %v2141_v32 = vsub.f32 1.0, %v1917_v20  ;;  %vm3491_vm1 = vweird.f32 %v8316_v39  ;;  %vm8367_vm2 = vcmp.eq.f32.partialorder %v3495_v5, 8.507059e+37 }
 0x364   :  { %v5119_v60 = vpop.eup %5118  ;;  %v1260_v2 = vmul.f32 %v1259_v54, %v8267_v0  ;;  %v2649_v26 = vmul.f32 %v5115_v13, %v2648_v38  ;;  %5122 = vrcp.f32 %v8356_v35  ;;  %v3488_v49 = vsub.f32 1.0, %v3487_v6 }
 0x365   :  { %v3987_v28 = vmul.f32 0.6931472, %v5119_v60  ;;  %vm3492_vm4 = vweird.f32 %v5117_v7  ;;  %v3498_v31 = vor.u32 1.1754944e-38, %v3497_v52  ;;  %v8372_v55 = vadd.f32 1e-09, %v2085_v23 }
 0x366   :  { %v5121_v0 = vpop.eup %5120  ;;  %5124 = vlog2.f32 %v1260_v2  ;;  %v2650_v19 = vadd.f32 %v5115_v13, %v2649_v26  ;;  %v3489_v27 = vmul.f32 %v5117_v7, %v3488_v49  ;;  %v1660_v61 = vand.u32 2147483647, %v8356_v35  ;;  %vm8383_vm3 = vmor %vm3491_vm1, %vm3492_vm4 }
 0x367   :  { %v4099_v41 = vmul.f32 0.6931472, %v5121_v0  ;;  %v4185_v53 = vadd.f32 %v3987_v28, %v1747_v37  ;;  %v8377_v57 = vadd.f32 1e-09, %v2141_v32  ;;  %5126 = vrcp.f32 %v8372_v55 }
 0x368   :  { %v2654_v4 = vsel %vm8362_vm0, %v5115_v13, %v2650_v19  ;;  %v3490_v33 = vadd.f32 %v5117_v7, %v3489_v27  ;;  %v1662_v36 = vand.u32 2147483648, %v8356_v35  ;;  %v8390_v1 = vadd.f32 1e-09, %v1861_v17  ;;  %v1835_v13 = vld [vmem:[#allocation2 + $0xd8] sm:$0xff] }
 0x369   :  { %v4241_v24 = vadd.f32 %v4099_v41, %v1747_v37  ;;  %v4297_v21 = vmul.f32 -10.0, %v4185_v53  ;;  %v2659_v44 = vsel %vm8343_vm10, %v2658_v30, %v2654_v4  ;;  %v8393_v18 = vadd.f32 1e-09, %v1917_v20 }
 0x36a   :  { %v2660_v50 = vmul.f32 %v2659_v44, %v8269_v15  ;;  %v5123_v42 = vpop.eup %5122  ;;  %5128 = vrcp.f32 %v8377_v57  ;;  %v8396_v39 = vadd.f32 1e-09, %v643_v45  ;;  %v3494_v12 = vsel %vm8383_vm3, %v5117_v7, %v3490_v33  ;;  %v1891_v7 = vld [vmem:[#allocation2 + $0x298] sm:$0xff] }
 0x36b   :  { %v4353_v56 = vmul.f32 -10.0, %v4241_v24  ;;  %4410 = vst.msk [vmem:[#allocation5 + $0xc8] sm:$0xff] %vm4385_vm14, %v4297_v21  ;;  %v1652_v15 = vmul.f32 %v5123_v42, %v8356_v35  ;;  %v3060_v3 = vand.u32 2147483647, %v8372_v55  ;;  %v3499_v25 = vsel %vm8367_vm2, %v3498_v31, %v3494_v12 }
 0x36c   :  { %v5125_v9 = vpop.eup %5124  ;;  %5130 = vlog2.f32 %v2660_v50  ;;  %vm1656_vm12 = vweird.f32 %v8356_v35  ;;  %vm8406_vm5 = vcmp.eq.f32.partialorder %v1660_v61, 8.507059e+37  ;;  %v3062_v62 = vand.u32 2147483648, %v8372_v55 }
 0x36d   :  { %4466 = vst.msk [vmem:[#allocation5 + $0x288] sm:$0xff] %vm4385_vm14, %v4353_v56  ;;  %v3500_v16 = vmul.f32 %v3499_v25, %v8305_v11  ;;  %v1653_v40 = vsub.f32 1.0, %v1652_v15  ;;  %v1663_v58 = vor.u32 1.1754944e-38, %v1662_v36  ;;  %vm3056_vm6 = vweird.f32 %v8372_v55  ;;  %v5127_v43 = vpop.eup %5126 }
 0x36e   :  { %v1749_v63 = vmul.f32 0.6931472, %v5125_v9  ;;  %vm1657_vm8 = vweird.f32 %v5123_v42  ;;  %vm3896_vm7 = vweird.f32 %v8377_v57  ;;  %v771_v46 = vsub.f32 1.0, %v643_v45 }
 0x36f   :  { %5132 = vlog2.f32 %v3500_v16  ;;  %v1654_v47 = vmul.f32 %v5123_v42, %v1653_v40  ;;  %v3052_v48 = vmul.f32 %v5127_v43, %v8372_v55  ;;  %vm8415_vm9 = vcmp.eq.f32.partialorder %v3060_v3, 8.507059e+37  ;;  %vm1658_vm11 = vmor %vm1656_vm12, %vm1657_vm8  ;;  %v545_v3 = vpop.f32.mrf.mxu1 }
 0x370   :  { %v5129_v11 = vpop.eup %5128  ;;  %v3063_v17 = vor.u32 1.1754944e-38, %v3062_v62  ;;  %v3900_v20 = vand.u32 2147483647, %v8377_v57  ;;  %v8420_v37 = vadd.f32 1e-09, %v771_v46  ;;  %v2059_v5 = vsub.f32 1.0, %v1835_v13 }
 0x371   :  { %v1655_v34 = vadd.f32 %v5123_v42, %v1654_v47  ;;  %v3053_v38 = vsub.f32 1.0, %v3052_v48  ;;  %vm3057_vm10 = vweird.f32 %v5127_v43  ;;  %v3892_v30 = vmul.f32 %v5129_v11, %v8377_v57  ;;  %v1836_v46 = vld [vmem:[#allocation2 + $0xe0] sm:$0xff] }
 0x372   :  { %v5131_v8 = vpop.eup %5130  ;;  %v3902_v52 = vand.u32 2147483648, %v8377_v57  ;;  %5134 = vrcp.f32 %v8420_v37  ;;  %v8428_v23 = vadd.f32 1e-09, %v1835_v13  ;;  %vm3897_vm13 = vweird.f32 %v5129_v11  ;;  %vm8434_vm15 = vmor %vm3056_vm6, %vm3057_vm10 }
 0x373   :  { %v3989_v54 = vmul.f32 0.6931472, %v5131_v8  ;;  %v1659_v60 = vsel %vm1658_vm11, %v5123_v42, %v1655_v34  ;;  %v3054_v2 = vmul.f32 %v5127_v43, %v3053_v38  ;;  %v3893_v26 = vsub.f32 1.0, %v3892_v30  ;;  %vm8447_vm1 = vmor %vm3896_vm7, %vm3897_vm13 }
 0x374   :  { %v1664_v32 = vsel %vm8406_vm5, %v1663_v58, %v1659_v60  ;;  %v2115_v35 = vsub.f32 1.0, %v1891_v7  ;;  %v8438_v14 = vadd.f32 1e-09, %v2059_v5  ;;  %vm8441_vm0 = vcmp.eq.f32.partialorder %v3900_v20, 8.507059e+37 }
 0x375   :  { %v4186_v6 = vadd.f32 %v3989_v54, %v1749_v63  ;;  %v5133_v10 = vpop.eup %5132  ;;  %v1665_v0 = vmul.f32 %v1664_v32, %v8340_v59  ;;  %v3055_v19 = vadd.f32 %v5127_v43, %v3054_v2  ;;  %v3894_v49 = vmul.f32 %v5129_v11, %v3893_v26 }
 0x376   :  { %v4101_v53 = vmul.f32 0.6931472, %v5133_v10  ;;  %v3903_v4 = vor.u32 1.1754944e-38, %v3902_v52  ;;  %5136 = vrcp.f32 %v8438_v14  ;;  %v1270_v61 = vand.u32 2147483647, %v8420_v37 }
 0x377   :  { %v4298_v31 = vmul.f32 -10.0, %v4186_v6  ;;  %5138 = vlog2.f32 %v1665_v0  ;;  %v3059_v59 = vsel %vm8434_vm15, %v5127_v43, %v3055_v19  ;;  %v3895_v27 = vadd.f32 %v5129_v11, %v3894_v49 }
 0x378   :  { %v5135_v45 = vpop.eup %5134  ;;  %v4242_v24 = vadd.f32 %v4101_v53, %v1749_v63  ;;  %v3064_v57 = vsel %vm8415_vm9, %v3063_v17, %v3059_v59  ;;  %v1272_v21 = vand.u32 2147483648, %v8420_v37  ;;  %v8458_v44 = vadd.f32 1e-09, %v2115_v35  ;;  %v685_v53 = vpop.f32.mrf.mxu3 }
 0x379   :  { %4411 = vst [vmem:[#allocation5 + $0xd0] sm:$0xff] %v4298_v31  ;;  %v3065_v29 = vmul.f32 %v3064_v57, %v8390_v1  ;;  %v3899_v50 = vsel %vm8447_vm1, %v5129_v11, %v3895_v27  ;;  %v1262_v33 = vmul.f32 %v5135_v45, %v8420_v37  ;;  %v8464_v36 = vadd.f32 1e-09, %v1891_v7  ;;  %v1892_v11 = vld [vmem:[#allocation2 + $0x2a0] sm:$0xff] }
 0x37a   :  { %v4354_v42 = vmul.f32 -10.0, %v4242_v24  ;;  %v3904_v56 = vsel %vm8441_vm0, %v3903_v4, %v3899_v50  ;;  %vm1266_vm2 = vweird.f32 %v8420_v37  ;;  %v2670_v9 = vand.u32 2147483647, %v8438_v14 }
 0x37b   :  { %v3905_v12 = vmul.f32 %v3904_v56, %v8393_v18  ;;  %5140 = vlog2.f32 %v3065_v29  ;;  %v1263_v15 = vsub.f32 1.0, %v1262_v33  ;;  %v2672_v1 = vand.u32 2147483648, %v8438_v14  ;;  %v1863_v56 = vld [vmem:[#allocation2 + $0x1b8] sm:$0xff] }
 0x37c   :  { %v5137_v25 = vpop.eup %5136  ;;  %4467 = vst [vmem:[#allocation5 + $0x290] sm:$0xff] %v4354_v42  ;;  %vm1267_vm4 = vweird.f32 %v5135_v45  ;;  %vm8472_vm3 = vcmp.eq.f32.partialorder %v1270_v61, 8.507059e+37  ;;  %v1273_v62 = vor.u32 1.1754944e-38, %v1272_v21  ;;  %5142 = vrcp.f32 %v8458_v44 }
 0x37d   :  { %v5139_v16 = vpop.eup %5138  ;;  %5144 = vlog2.f32 %v3905_v12  ;;  %v1264_v40 = vmul.f32 %v5135_v45, %v1263_v15  ;;  %v2662_v18 = vmul.f32 %v5137_v25, %v8438_v14  ;;  %v3510_v58 = vand.u32 2147483647, %v8458_v44  ;;  %vm1268_vm8 = vmor %vm1266_vm2, %vm1267_vm4 }
 0x37e   :  { %vm2666_vm12 = vweird.f32 %v8438_v14  ;;  %vm8480_vm5 = vcmp.eq.f32.partialorder %v2670_v9, 8.507059e+37  ;;  %v3512_v43 = vand.u32 2147483648, %v8458_v44  ;;  %v772_v63 = vsub.f32 1.0, %v545_v3 }
 0x37f   :  { %v1265_v47 = vadd.f32 %v5135_v45, %v1264_v40  ;;  %v2663_v48 = vsub.f32 1.0, %v2662_v18  ;;  %vm2667_vm6 = vweird.f32 %v5137_v25  ;;  %v2673_v22 = vor.u32 1.1754944e-38, %v2672_v1 }
 0x380   :  { %v1803_v17 = vmul.f32 0.6931472, %v5139_v16  ;;  %vm3506_vm7 = vweird.f32 %v8458_v44  ;;  %v8489_v20 = vadd.f32 1e-09, %v545_v3  ;;  %v8491_v5 = vadd.f32 1e-09, %v772_v63  ;;  %vm8502_vm10 = vmor %vm2666_vm12, %vm2667_vm6 }
 0x381   :  { %v5141_v8 = vpop.eup %5140  ;;  %v1269_v34 = vsel %vm1268_vm8, %v5135_v45, %v1265_v47  ;;  %v2664_v38 = vmul.f32 %v5137_v25, %v2663_v48  ;;  %vm8493_vm9 = vcmp.eq.f32.partialorder %v3510_v58, 8.507059e+37  ;;  %v2060_v7 = vsub.f32 1.0, %v1836_v46 }
 0x382   :  { %v5143_v54 = vpop.eup %5142  ;;  %v4043_v52 = vmul.f32 0.6931472, %v5141_v8  ;;  %v1274_v37 = vsel %vm8472_vm3, %v1273_v62, %v1269_v34  ;;  %v3513_v2 = vor.u32 1.1754944e-38, %v3512_v43  ;;  %5146 = vrcp.f32 %v8491_v5 }
 0x383   :  { %v5145_v26 = vpop.eup %5144  ;;  %v1275_v6 = vmul.f32 %v1274_v37, %v8396_v39  ;;  %v2665_v32 = vadd.f32 %v5137_v25, %v2664_v38  ;;  %v3502_v28 = vmul.f32 %v5143_v54, %v8458_v44  ;;  %v2116_v35 = vsub.f32 1.0, %v1892_v11 }
 0x384   :  { %v4155_v10 = vmul.f32 0.6931472, %v5145_v26  ;;  %v4213_v0 = vadd.f32 %v4043_v52, %v1803_v17  ;;  %vm3507_vm11 = vweird.f32 %v5143_v54  ;;  %v8509_v19 = vadd.f32 1e-09, %v1836_v46 }
 0x385   :  { %5148 = vlog2.f32 %v1275_v6  ;;  %v2669_v14 = vsel %vm8502_vm10, %v5137_v25, %v2665_v32  ;;  %v3503_v49 = vsub.f32 1.0, %v3502_v28  ;;  %v8513_v41 = vadd.f32 1e-09, %v2060_v7  ;;  %vm8527_vm13 = vmor %vm3506_vm7, %vm3507_vm11 }
 0x386   :  { %v4269_v31 = vadd.f32 %v4155_v10, %v1803_v17  ;;  %v4325_v55 = vmul.f32 -10.0, %v4213_v0  ;;  %v2674_v39 = vsel %vm8480_vm5, %v2673_v22, %v2669_v14  ;;  %v8517_v4 = vadd.f32 1e-09, %v1892_v11 }
 0x387   :  { %v2675_v59 = vmul.f32 %v2674_v39, %v8428_v23  ;;  %v3504_v27 = vmul.f32 %v5143_v54, %v3503_v49  ;;  %v1285_v61 = vand.u32 2147483647, %v8491_v5  ;;  %v8521_v45 = vadd.f32 1e-09, %v2116_v35 }
 0x388   :  { %v5147_v24 = vpop.eup %5146  ;;  %v4381_v57 = vmul.f32 -10.0, %v4269_v31  ;;  %4438 = vst.msk [vmem:[#allocation5 + $0x1a8] sm:$0xff] %vm4385_vm14, %v4325_v55  ;;  %5150 = vrcp.f32 %v8513_v41  ;;  %v8532_v29 = vadd.f32 1e-09, %v685_v53  ;;  %v799_v23 = vsub.f32 1.0, %v685_v53  ;;  %v646_v31 = vpop.f32.mrf.mxu2 }
 0x389   :  { %v3505_v50 = vadd.f32 %v5143_v54, %v3504_v27  ;;  %5152 = vlog2.f32 %v2675_v59  ;;  %v1277_v33 = vmul.f32 %v5147_v24, %v8491_v5  ;;  %v1287_v42 = vand.u32 2147483648, %v8491_v5 }
 0x38a   :  { %4494 = vst.msk [vmem:[#allocation5 + $0x368] sm:$0xff] %vm4385_vm14, %v4381_v57  ;;  %v2685_v44 = vand.u32 2147483647, %v8513_v41  ;;  %5154 = vrcp.f32 %v8521_v45  ;;  %v8539_v9 = vadd.f32 1e-09, %v1863_v56  ;;  %vm1281_vm15 = vweird.f32 %v8491_v5 }
 0x38b   :  { %v5149_v12 = vpop.eup %5148  ;;  %v3509_v15 = vsel %vm8527_vm13, %v5143_v54, %v3505_v50  ;;  %v1278_v1 = vsub.f32 1.0, %v1277_v33  ;;  %vm8544_vm0 = vcmp.eq.f32.partialorder %v1285_v61, 8.507059e+37  ;;  %v2687_v51 = vand.u32 2147483648, %v8513_v41 }
 0x38c   :  { %v3514_v25 = vsel %vm8493_vm9, %v3513_v2, %v3509_v15  ;;  %v3525_v62 = vand.u32 2147483647, %v8521_v45  ;;  %v8552_v16 = vadd.f32 1e-09, %v799_v23  ;;  %vm1282_vm1 = vweird.f32 %v5147_v24 }
 0x38d   :  { %v3515_v40 = vmul.f32 %v3514_v25, %v8464_v36  ;;  %v1279_v18 = vmul.f32 %v5147_v24, %v1278_v1  ;;  %v1288_v58 = vor.u32 1.1754944e-38, %v1287_v42  ;;  %v1751_v43 = vmul.f32 0.6931472, %v5149_v12  ;;  %v1919_v36 = vld [vmem:[#allocation2 + $0x378] sm:$0xff]  ;;  %vm1283_vm12 = vmor %vm1281_vm15, %vm1282_vm1 }
 0x38e   :  { %v5151_v13 = vpop.eup %5150  ;;  %vm2681_vm2 = vweird.f32 %v8513_v41  ;;  %vm8556_vm4 = vcmp.eq.f32.partialorder %v2685_v44, 8.507059e+37  ;;  %5156 = vrcp.f32 %v8552_v16  ;;  %vm3521_vm3 = vweird.f32 %v8521_v45 }
 0x38f   :  { %v5153_v46 = vpop.eup %5152  ;;  %5158 = vlog2.f32 %v3515_v40  ;;  %v1280_v47 = vadd.f32 %v5147_v24, %v1279_v18  ;;  %v2677_v48 = vmul.f32 %v5151_v13, %v8513_v41  ;;  %v2688_v17 = vor.u32 1.1754944e-38, %v2687_v51 }
 0x390   :  { %v5155_v22 = vpop.eup %5154  ;;  %v3991_v11 = vmul.f32 0.6931472, %v5153_v46  ;;  %vm8566_vm5 = vcmp.eq.f32.partialorder %v3525_v62, 8.507059e+37  ;;  %v3527_v34 = vand.u32 2147483648, %v8521_v45  ;;  %vm2682_vm6 = vweird.f32 %v5151_v13 }
 0x391   :  { %v1284_v38 = vsel %vm1283_vm12, %v5147_v24, %v1280_v47  ;;  %v2678_v30 = vsub.f32 1.0, %v2677_v48  ;;  %v3517_v7 = vmul.f32 %v5155_v22, %v8521_v45  ;;  %v2087_v37 = vsub.f32 1.0, %v1863_v56  ;;  %vm8577_vm7 = vmor %vm2681_vm2, %vm2682_vm6  ;;  %v1837_v48 = vld [vmem:[#allocation2 + $0xe8] sm:$0xff] }
 0x392   :  { %v4187_v54 = vadd.f32 %v3991_v11, %v1751_v43  ;;  %v1289_v52 = vsel %vm8544_vm0, %v1288_v58, %v1284_v38  ;;  %v2143_v60 = vsub.f32 1.0, %v1919_v36  ;;  %vm3522_vm8 = vweird.f32 %v5155_v22 }
 0x393   :  { %v1290_v5 = vmul.f32 %v1289_v52, %v8489_v20  ;;  %v2679_v2 = vmul.f32 %v5151_v13, %v2678_v30  ;;  %v3518_v26 = vsub.f32 1.0, %v3517_v7  ;;  %v3528_v35 = vor.u32 1.1754944e-38, %v3527_v34  ;;  %vm8591_vm10 = vmor %vm3521_vm3, %vm3522_vm8 }
 0x394   :  { %v5157_v6 = vpop.eup %5156  ;;  %v4299_v32 = vmul.f32 -10.0, %v4187_v54  ;;  %v8581_v10 = vadd.f32 1e-09, %v2087_v37  ;;  %v8583_v0 = vadd.f32 1e-09, %v2143_v60  ;;  %vm1686_vm9 = vweird.f32 %v8552_v16 }
 0x395   :  { %v5159_v14 = vpop.eup %5158  ;;  %v2680_v49 = vadd.f32 %v5151_v13, %v2679_v2  ;;  %v3519_v53 = vmul.f32 %v5155_v22, %v3518_v26  ;;  %v1682_v20 = vmul.f32 %v5157_v6, %v8552_v16  ;;  %v1690_v39 = vand.u32 2147483647, %v8552_v16 }
 0x396   :  { %v4103_v55 = vmul.f32 0.6931472, %v5159_v14  ;;  %4412 = vst.msk [vmem:[#allocation5 + $0xd8] sm:$0xff] %vm4385_vm14, %v4299_v32  ;;  %v1692_v59 = vand.u32 2147483648, %v8552_v16  ;;  %5160 = vrcp.f32 %v8581_v10  ;;  %v773_v21 = vsub.f32 1.0, %v646_v31 }
 0x397   :  { %5162 = vlog2.f32 %v1290_v5  ;;  %v2684_v27 = vsel %vm8577_vm7, %v5151_v13, %v2680_v49  ;;  %v3520_v61 = vadd.f32 %v5155_v22, %v3519_v53  ;;  %v1683_v24 = vsub.f32 1.0, %v1682_v20 }
 0x398   :  { %v4243_v57 = vadd.f32 %v4103_v55, %v1751_v43  ;;  %v2689_v45 = vsel %vm8556_vm4, %v2688_v17, %v2684_v27  ;;  %5164 = vrcp.f32 %v8583_v0  ;;  %vm1687_vm11 = vweird.f32 %v5157_v6  ;;  %v548_v55 = vpop.f32.mrf.mxu1 }
 0x399   :  { %v2690_v23 = vmul.f32 %v2689_v45, %v8509_v19  ;;  %v3524_v50 = vsel %vm8591_vm10, %v5155_v22, %v3520_v61  ;;  %v1684_v33 = vmul.f32 %v5157_v6, %v1683_v24  ;;  %vm8608_vm13 = vcmp.eq.f32.partialorder %v1690_v39, 8.507059e+37  ;;  %vm1688_vm15 = vmor %vm1686_vm9, %vm1687_vm11 }
 0x39a   :  { %v4355_v42 = vmul.f32 -10.0, %v4243_v57  ;;  %v3529_v56 = vsel %vm8566_vm5, %v3528_v35, %v3524_v50  ;;  %v1693_v12 = vor.u32 1.1754944e-38, %v1692_v59  ;;  %v8613_v3 = vadd.f32 1e-09, %v1919_v36  ;;  %v1893_v36 = vld [vmem:[#allocation2 + $0x2a8] sm:$0xff] }
 0x39b   :  { %v3530_v15 = vmul.f32 %v3529_v56, %v8517_v4  ;;  %5166 = vlog2.f32 %v2690_v23  ;;  %v1685_v1 = vadd.f32 %v5157_v6, %v1684_v33  ;;  %v3090_v25 = vand.u32 2147483647, %v8581_v10 }
 0x39c   :  { %v5161_v19 = vpop.eup %5160  ;;  %4468 = vst.msk [vmem:[#allocation5 + $0x298] sm:$0xff] %vm4385_vm14, %v4355_v42  ;;  %v3092_v51 = vand.u32 2147483648, %v8581_v10  ;;  %v8620_v62 = vadd.f32 1e-09, %v773_v21  ;;  %vm3086_vm0 = vweird.f32 %v8581_v10  ;;  %v3930_v16 = vand.u32 2147483647, %v8583_v0 }
 0x39d   :  { %v5163_v40 = vpop.eup %5162  ;;  %5168 = vlog2.f32 %v3530_v15  ;;  %v1689_v18 = vsel %vm1688_vm15, %v5157_v6, %v1685_v1  ;;  %v3082_v4 = vmul.f32 %v5161_v19, %v8581_v10  ;;  %v3932_v43 = vand.u32 2147483648, %v8583_v0 }
 0x39e   :  { %v5165_v58 = vpop.eup %5164  ;;  %v1694_v13 = vsel %vm8608_vm13, %v1693_v12, %v1689_v18  ;;  %5170 = vrcp.f32 %v8620_v62  ;;  %vm3087_vm1 = vweird.f32 %v5161_v19  ;;  %v1753_v22 = vmul.f32 0.6931472, %v5163_v40 }
 0x39f   :  { %v1695_v63 = vmul.f32 %v1694_v13, %v8532_v29  ;;  %v3083_v46 = vsub.f32 1.0, %v3082_v4  ;;  %v3922_v47 = vmul.f32 %v5165_v58, %v8583_v0  ;;  %vm8631_vm2 = vcmp.eq.f32.partialorder %v3090_v25, 8.507059e+37  ;;  %vm8640_vm12 = vmor %vm3086_vm0, %vm3087_vm1  ;;  %v8691_v4 = vld [vmem:[#allocation2 + $0x2b0] sm:$0xff] }
 0x3a0   :  { %v3093_v17 = vor.u32 1.1754944e-38, %v3092_v51  ;;  %v8635_v8 = vadd.f32 1e-09, %v646_v31  ;;  %vm3926_vm4 = vweird.f32 %v8583_v0  ;;  %vm3927_vm3 = vweird.f32 %v5165_v58 }
 0x3a1   :  { %v5167_v34 = vpop.eup %5166  ;;  %v3084_v38 = vmul.f32 %v5161_v19, %v3083_v46  ;;  %v3923_v30 = vsub.f32 1.0, %v3922_v47  ;;  %vm8644_vm5 = vcmp.eq.f32.partialorder %v3930_v16, 8.507059e+37  ;;  %v3933_v52 = vor.u32 1.1754944e-38, %v3932_v43  ;;  %vm8650_vm6 = vmor %vm3926_vm4, %vm3927_vm3 }
 0x3a2   :  { %v3993_v29 = vmul.f32 0.6931472, %v5167_v34  ;;  %v2061_v37 = vsub.f32 1.0, %v1837_v48  ;;  %5172 = vlog2.f32 %v1695_v63  ;;  %v2117_v26 = vsub.f32 1.0, %v1893_v36 }
 0x3a3   :  { %v5169_v60 = vpop.eup %5168  ;;  %v3085_v5 = vadd.f32 %v5161_v19, %v3084_v38  ;;  %v3924_v2 = vmul.f32 %v5165_v58, %v3923_v30  ;;  %v1300_v10 = vand.u32 2147483647, %v8620_v62  ;;  %v1302_v31 = vand.u32 2147483648, %v8620_v62 }
 0x3a4   :  { %v5171_v6 = vpop.eup %5170  ;;  %v4105_v32 = vmul.f32 0.6931472, %v5169_v60  ;;  %v4188_v28 = vadd.f32 %v3993_v29, %v1753_v22  ;;  %v8655_v14 = vadd.f32 1e-09, %v2061_v37  ;;  %v8663_v59 = vadd.f32 1e-09, %v2117_v26 }
 0x3a5   :  { %v3089_v49 = vsel %vm8640_vm12, %v5161_v19, %v3085_v5  ;;  %v3925_v53 = vadd.f32 %v5165_v58, %v3924_v2  ;;  %v1292_v20 = vmul.f32 %v5171_v6, %v8620_v62  ;;  %vm1296_vm8 = vweird.f32 %v8620_v62 }
 0x3a6   :  { %v4244_v41 = vadd.f32 %v4105_v32, %v1753_v22  ;;  %v4300_v39 = vmul.f32 -10.0, %v4188_v28  ;;  %v3094_v0 = vsel %vm8631_vm2, %v3093_v17, %v3089_v49  ;;  %5174 = vrcp.f32 %v8655_v14 }
 0x3a7   :  { %v3095_v27 = vmul.f32 %v3094_v0, %v8539_v9  ;;  %v3929_v61 = vsel %vm8650_vm6, %v5165_v58, %v3925_v53  ;;  %v1293_v24 = vsub.f32 1.0, %v1292_v20  ;;  %v774_v21 = vsub.f32 1.0, %v548_v55  ;;  %v1838_v9 = vld [vmem:[#allocation2 + $0xf0] sm:$0xff] }
 0x3a8   :  { %v4356_v57 = vmul.f32 -10.0, %v4244_v41  ;;  %4413 = vst [vmem:[#allocation5 + $0xe0] sm:$0xff] %v4300_v39  ;;  %v3934_v45 = vsel %vm8644_vm5, %v3933_v52, %v3929_v61  ;;  %v5173_v23 = vpop.eup %5172  ;;  %vm1297_vm7 = vweird.f32 %v5171_v6  ;;  %vm8673_vm9 = vcmp.eq.f32.partialorder %v1300_v10, 8.507059e+37 }
 0x3a9   :  { %v3935_v50 = vmul.f32 %v3934_v45, %v8613_v3  ;;  %5176 = vlog2.f32 %v3095_v27  ;;  %v1294_v33 = vmul.f32 %v5171_v6, %v1293_v24  ;;  %v8677_v56 = vadd.f32 1e-09, %v1837_v48  ;;  %vm1298_vm10 = vmor %vm1296_vm8, %vm1297_vm7 }
 0x3aa   :  { %4469 = vst [vmem:[#allocation5 + $0x2a0] sm:$0xff] %v4356_v57  ;;  %v8679_v44 = vadd.f32 1e-09, %v1893_v36  ;;  %5178 = vrcp.f32 %v8663_v59  ;;  %v1303_v15 = vor.u32 1.1754944e-38, %v1302_v31  ;;  %v2700_v1 = vand.u32 2147483647, %v8655_v14 }
 0x3ab   :  { %5180 = vlog2.f32 %v3935_v50  ;;  %v1295_v12 = vadd.f32 %v5171_v6, %v1294_v33  ;;  %v1807_v3 = vmul.f32 0.6931472, %v5173_v23  ;;  %v8685_v19 = vadd.f32 1e-09, %v548_v55  ;;  %v649_v23 = vpop.f32.mrf.mxu2 }
 0x3ac   :  { %v8687_v25 = vadd.f32 1e-09, %v774_v21  ;;  %v5175_v51 = vpop.eup %5174  ;;  %vm2696_vm11 = vweird.f32 %v8655_v14  ;;  %v2702_v18 = vand.u32 2147483648, %v8655_v14  ;;  %v2062_v58 = vsub.f32 1.0, %v1838_v9 }
 0x3ad   :  { %v1299_v40 = vsel %vm1298_vm10, %v5171_v6, %v1295_v12  ;;  %v2692_v16 = vmul.f32 %v5175_v51, %v8655_v14  ;;  %vm3536_vm13 = vweird.f32 %v8663_v59  ;;  %vm2697_vm15 = vweird.f32 %v5175_v51 }
 0x3ae   :  { %v1304_v13 = vsel %vm8673_vm9, %v1303_v15, %v1299_v40  ;;  %5182 = vrcp.f32 %v8687_v25  ;;  %vm8699_vm0 = vcmp.eq.f32.partialorder %v2700_v1, 8.507059e+37  ;;  %v3540_v46 = vand.u32 2147483647, %v8663_v59  ;;  %vm8713_vm1 = vmor %vm2696_vm11, %vm2697_vm15  ;;  %v1839_v1 = vld [vmem:[#allocation2 + $0xf8] sm:$0xff] }
 0x3af   :  { %v5177_v62 = vpop.eup %5176  ;;  %v1305_v43 = vmul.f32 %v1304_v13, %v8635_v8  ;;  %v2693_v36 = vsub.f32 1.0, %v2692_v16  ;;  %v2118_v22 = vsub.f32 1.0, %v8691_v4  ;;  %v8705_v11 = vadd.f32 1e-09, %v2062_v58  ;;  %v1895_v16 = vld [vmem:[#allocation2 + $0x2b8] sm:$0xff] }
 0x3b0   :  { %v5179_v47 = vpop.eup %5178  ;;  %v4047_v48 = vmul.f32 0.6931472, %v5177_v62  ;;  %v2703_v34 = vor.u32 1.1754944e-38, %v2702_v18  ;;  %v3542_v8 = vand.u32 2147483648, %v8663_v59  ;;  %v1315_v30 = vand.u32 2147483647, %v8687_v25 }
 0x3b1   :  { %v5181_v17 = vpop.eup %5180  ;;  %v3532_v38 = vmul.f32 %v5179_v47, %v8663_v59  ;;  %5184 = vlog2.f32 %v1305_v43  ;;  %v2694_v54 = vmul.f32 %v5175_v51, %v2693_v36  ;;  %vm3537_vm2 = vweird.f32 %v5179_v47 }
 0x3b2   :  { %v4159_v29 = vmul.f32 0.6931472, %v5181_v17  ;;  %v4215_v7 = vadd.f32 %v4047_v48, %v1807_v3  ;;  %v8717_v60 = vadd.f32 1e-09, %v2118_v22  ;;  %5186 = vrcp.f32 %v8705_v11  ;;  %vm8734_vm3 = vmor %vm3536_vm13, %vm3537_vm2 }
 0x3b3   :  { %v3533_v37 = vsub.f32 1.0, %v3532_v38  ;;  %v2695_v6 = vadd.f32 %v5175_v51, %v2694_v54  ;;  %v1317_v32 = vand.u32 2147483648, %v8687_v25  ;;  %vm8721_vm4 = vcmp.eq.f32.partialorder %v3540_v46, 8.507059e+37 }
 0x3b4   :  { %v5183_v5 = vpop.eup %5182  ;;  %v4271_v2 = vadd.f32 %v4159_v29, %v1807_v3  ;;  %v4327_v26 = vmul.f32 -10.0, %v4215_v7  ;;  %v8726_v14 = vadd.f32 1e-09, %v1838_v9  ;;  %v3543_v31 = vor.u32 1.1754944e-38, %v3542_v8 }
 0x3b5   :  { %v3534_v28 = vmul.f32 %v5179_v47, %v3533_v37  ;;  %v1307_v10 = vmul.f32 %v5183_v5, %v8687_v25  ;;  %v2699_v53 = vsel %vm8713_vm1, %v5175_v51, %v2695_v6  ;;  %5188 = vrcp.f32 %v8717_v60 }
 0x3b6   :  { %v4383_v49 = vmul.f32 -10.0, %v4271_v2  ;;  %4440 = vst.msk [vmem:[#allocation5 + $0x1b8] sm:$0xff] %vm4385_vm14, %v4327_v26  ;;  %v2704_v55 = vsel %vm8699_vm0, %v2703_v34, %v2699_v53  ;;  %v2717_v0 = vand.u32 2147483648, %v8705_v11  ;;  %vm1311_vm12 = vweird.f32 %v8687_v25 }
 0x3b7   :  { %v3535_v41 = vadd.f32 %v5179_v47, %v3534_v28  ;;  %v1308_v39 = vsub.f32 1.0, %v1307_v10  ;;  %v5185_v27 = vpop.eup %5184  ;;  %v2705_v61 = vmul.f32 %v2704_v55, %v8677_v56  ;;  %vm8745_vm5 = vcmp.eq.f32.partialorder %v1315_v30, 8.507059e+37 }
 0x3b8   :  { %4496 = vst.msk [vmem:[#allocation5 + $0x378] sm:$0xff] %vm4385_vm14, %v4383_v49  ;;  %v1318_v24 = vor.u32 1.1754944e-38, %v1317_v32  ;;  %v5187_v57 = vpop.eup %5186  ;;  %vm1312_vm6 = vweird.f32 %v5183_v5  ;;  %vm2711_vm8 = vweird.f32 %v8705_v11  ;;  %v2715_v9 = vand.u32 2147483647, %v8705_v11 }
 0x3b9   :  { %v3539_v45 = vsel %vm8734_vm3, %v5179_v47, %v3535_v41  ;;  %v1309_v21 = vmul.f32 %v5183_v5, %v1308_v39  ;;  %5190 = vlog2.f32 %v2705_v61  ;;  %v2707_v33 = vmul.f32 %v5187_v57, %v8705_v11  ;;  %vm1313_vm7 = vmor %vm1311_vm12, %vm1312_vm6 }
 0x3ba   :  { %v3544_v50 = vsel %vm8721_vm4, %v3543_v31, %v3539_v45  ;;  %v1755_v42 = vmul.f32 0.6931472, %v5185_v27  ;;  %v2718_v15 = vor.u32 1.1754944e-38, %v2717_v0  ;;  %vm2712_vm9 = vweird.f32 %v5187_v57 }
 0x3bb   :  { %v3545_v56 = vmul.f32 %v3544_v50, %v8679_v44  ;;  %v1310_v12 = vadd.f32 %v5183_v5, %v1309_v21  ;;  %v5189_v3 = vpop.eup %5188  ;;  %v2708_v51 = vsub.f32 1.0, %v2707_v33  ;;  %vm3551_vm10 = vweird.f32 %v8717_v60  ;;  %vm8769_vm11 = vmor %vm2711_vm8, %vm2712_vm9 }
 0x3bc   :  { %v775_v40 = vsub.f32 1.0, %v649_v23  ;;  %v3547_v58 = vmul.f32 %v5189_v3, %v8717_v60  ;;  %v3557_v13 = vand.u32 2147483648, %v8717_v60  ;;  %v2063_v25 = vsub.f32 1.0, %v1839_v1 }
 0x3bd   :  { %5192 = vlog2.f32 %v3545_v56  ;;  %v1314_v18 = vsel %vm1313_vm7, %v5183_v5, %v1310_v12  ;;  %v2709_v62 = vmul.f32 %v5187_v57, %v2708_v51  ;;  %vm3552_vm13 = vweird.f32 %v5189_v3 }
 0x3be   :  { %v1319_v44 = vsel %vm8745_vm5, %v1318_v24, %v1314_v18  ;;  %v8764_v43 = vadd.f32 1e-09, %v775_v40  ;;  %v3548_v47 = vsub.f32 1.0, %v3547_v58  ;;  %v3555_v48 = vand.u32 2147483647, %v8717_v60  ;;  %vm8782_vm0 = vmor %vm3551_vm10, %vm3552_vm13  ;;  %v551_v60 = vpop.f32.mrf.mxu1 }
 0x3bf   :  { %v1320_v63 = vmul.f32 %v1319_v44, %v8685_v19  ;;  %v5191_v36 = vpop.eup %5190  ;;  %v2710_v22 = vadd.f32 %v5187_v57, %v2709_v62  ;;  %vm2716_vm15 = vcmp.eq.f32.partialorder %v2715_v9, 8.507059e+37  ;;  %v2119_v17 = vsub.f32 1.0, %v1895_v16  ;;  %v1840_v9 = vld [vmem:[#allocation2 + $0x100] sm:$0xff] }
 0x3c0   :  { %5194 = vrcp.f32 %v8764_v43  ;;  %v3995_v34 = vmul.f32 0.6931472, %v5191_v36  ;;  %v2006_v38 = vadd.f32 1e-09, %v8691_v4  ;;  %v3549_v19 = vmul.f32 %v5189_v3, %v3548_v47 }
 0x3c1   :  { %v8776_v8 = vadd.f32 1e-09, %v649_v23  ;;  %5196 = vlog2.f32 %v1320_v63  ;;  %v2714_v11 = vsel %vm8769_vm11, %v5187_v57, %v2710_v22  ;;  %v3558_v29 = vor.u32 1.1754944e-38, %v3557_v13 }
 0x3c2   :  { %v8786_v7 = vadd.f32 1e-09, %v2063_v25  ;;  %v4189_v52 = vadd.f32 %v3995_v34, %v1755_v42  ;;  %v2719_v37 = vsel %vm2716_vm15, %v2718_v15, %v2714_v11  ;;  %v3550_v4 = vadd.f32 %v5189_v3, %v3549_v19 }
 0x3c3   :  { %v5193_v54 = vpop.eup %5192  ;;  %vm3556_vm1 = vcmp.eq.f32.partialorder %v3555_v48, 8.507059e+37  ;;  %v2720_v2 = vmul.f32 %v2719_v37, %v8726_v14  ;;  %v8789_v26 = vadd.f32 1e-09, %v2119_v17  ;;  %v1330_v28 = vand.u32 2147483647, %v8764_v43 }
 0x3c4   :  { %v4107_v5 = vmul.f32 0.6931472, %v5193_v54  ;;  %5198 = vrcp.f32 %v8786_v7  ;;  %v4301_v6 = vmul.f32 -10.0, %v4189_v52  ;;  %v3554_v32 = vsel %vm8782_vm0, %v5189_v3, %v3550_v4 }
 0x3c5   :  { %v8795_v35 = vadd.f32 1e-09, %v1839_v1  ;;  %v3559_v53 = vsel %vm3556_vm1, %v3558_v29, %v3554_v32  ;;  %5200 = vlog2.f32 %v2720_v2  ;;  %v1332_v20 = vand.u32 2147483648, %v8764_v43 }
 0x3c6   :  { %v5195_v10 = vpop.eup %5194  ;;  %v4245_v49 = vadd.f32 %v4107_v5, %v1755_v42  ;;  %4414 = vst.msk [vmem:[#allocation5 + $0xe8] sm:$0xff] %vm4385_vm14, %v4301_v6  ;;  %v3560_v14 = vmul.f32 %v3559_v53, %v2006_v38  ;;  %v8800_v55 = vadd.f32 1e-09, %v1895_v16  ;;  %v8802_v41 = vadd.f32 1e-09, %v551_v60  ;;  %v1896_v42 = vld [vmem:[#allocation2 + $0x2c0] sm:$0xff] }
 0x3c7   :  { %v1322_v31 = vmul.f32 %v5195_v10, %v8764_v43  ;;  %v5197_v39 = vpop.eup %5196  ;;  %v2730_v27 = vand.u32 2147483647, %v8786_v7  ;;  %v2732_v61 = vand.u32 2147483648, %v8786_v7  ;;  %5202 = vrcp.f32 %v8789_v26 }
 0x3c8   :  { %v4357_v0 = vmul.f32 -10.0, %v4245_v49  ;;  %5204 = vlog2.f32 %v3560_v14  ;;  %vm1326_vm2 = vweird.f32 %v8764_v43  ;;  %vm8808_vm4 = vcmp.eq.f32.partialorder %v1330_v28, 8.507059e+37 }
 0x3c9   :  { %v1323_v59 = vsub.f32 1.0, %v1322_v31  ;;  %v1333_v45 = vor.u32 1.1754944e-38, %v1332_v20  ;;  %vm2726_vm3 = vweird.f32 %v8786_v7  ;;  %vm3566_vm12 = vweird.f32 %v8789_v26 }
 0x3ca   :  { %v5199_v57 = vpop.eup %5198  ;;  %4470 = vst.msk [vmem:[#allocation5 + $0x2a8] sm:$0xff] %vm4385_vm14, %v4357_v0  ;;  %v776_v21 = vsub.f32 1.0, %v551_v60  ;;  %v1757_v23 = vmul.f32 0.6931472, %v5197_v39  ;;  %vm1327_vm5 = vweird.f32 %v5195_v10  ;;  %vm8816_vm6 = vcmp.eq.f32.partialorder %v2730_v27, 8.507059e+37 }
 0x3cb   :  { %v1324_v50 = vmul.f32 %v5195_v10, %v1323_v59  ;;  %v2722_v33 = vmul.f32 %v5199_v57, %v8786_v7  ;;  %v5201_v56 = vpop.eup %5200  ;;  %v2733_v15 = vor.u32 1.1754944e-38, %v2732_v61  ;;  %v3570_v1 = vand.u32 2147483647, %v8789_v26  ;;  %vm1328_vm7 = vmor %vm1326_vm2, %vm1327_vm5  ;;  %v652_v7 = vpop.f32.mrf.mxu2 }
 0x3cc   :  { %v8821_v3 = vadd.f32 1e-09, %v776_v21  ;;  %v3997_v51 = vmul.f32 0.6931472, %v5201_v56  ;;  %vm2727_vm8 = vweird.f32 %v5199_v57  ;;  %v3572_v13 = vand.u32 2147483648, %v8789_v26 }
 0x3cd   :  { %v1325_v40 = vadd.f32 %v5195_v10, %v1324_v50  ;;  %v2723_v18 = vsub.f32 1.0, %v2722_v33  ;;  %v5203_v58 = vpop.eup %5202  ;;  %v2064_v16 = vsub.f32 1.0, %v1840_v9  ;;  %v2120_v44 = vsub.f32 1.0, %v1896_v42  ;;  %vm8832_vm9 = vmor %vm2726_vm3, %vm2727_vm8 }
 0x3ce   :  { %5206 = vrcp.f32 %v8821_v3  ;;  %v5205_v62 = vpop.eup %5204  ;;  %v4190_v25 = vadd.f32 %v3997_v51, %v1757_v23  ;;  %v3562_v47 = vmul.f32 %v5203_v58, %v8789_v26  ;;  %vm3567_vm10 = vweird.f32 %v5203_v58 }
 0x3cf   :  { %v1329_v63 = vsel %vm1328_vm7, %v5195_v10, %v1325_v40  ;;  %v2724_v46 = vmul.f32 %v5199_v57, %v2723_v18  ;;  %v4109_v48 = vmul.f32 0.6931472, %v5205_v62  ;;  %vm8836_vm11 = vcmp.eq.f32.partialorder %v3570_v1, 8.507059e+37  ;;  %vm8853_vm13 = vmor %vm3566_vm12, %vm3567_vm10  ;;  %v1897_v18 = vld [vmem:[#allocation2 + $0x2c8] sm:$0xff] }
 0x3d0   :  { %v1334_v36 = vsel %vm8808_vm4, %v1333_v45, %v1329_v63  ;;  %v4302_v17 = vmul.f32 -10.0, %v4190_v25  ;;  %v3563_v19 = vsub.f32 1.0, %v3562_v47  ;;  %v3573_v30 = vor.u32 1.1754944e-38, %v3572_v13 }
 0x3d1   :  { %v1335_v34 = vmul.f32 %v1334_v36, %v8776_v8  ;;  %v2725_v38 = vadd.f32 %v5199_v57, %v2724_v46  ;;  %v4246_v11 = vadd.f32 %v4109_v48, %v1757_v23  ;;  %v8841_v29 = vadd.f32 1e-09, %v2064_v16 }
 0x3d2   :  { %v8843_v54 = vadd.f32 1e-09, %v2120_v44  ;;  %4415 = vst [vmem:[#allocation5 + $0xf0] sm:$0xff] %v4302_v17  ;;  %v3564_v37 = vmul.f32 %v5203_v58, %v3563_v19  ;;  %v1345_v4 = vand.u32 2147483647, %v8821_v3  ;;  %v1347_v6 = vand.u32 2147483648, %v8821_v3 }
 0x3d3   :  { %5208 = vlog2.f32 %v1335_v34  ;;  %v2729_v52 = vsel %vm8832_vm9, %v5199_v57, %v2725_v38  ;;  %v4358_v2 = vmul.f32 -10.0, %v4246_v11  ;;  %v777_v49 = vsub.f32 1.0, %v652_v7  ;;  %v1841_v57 = vld [vmem:[#allocation2 + $0x108] sm:$0xff] }
 0x3d4   :  { %v5207_v5 = vpop.eup %5206  ;;  %v2734_v8 = vsel %vm8816_vm6, %v2733_v15, %v2729_v52  ;;  %5210 = vrcp.f32 %v8841_v29  ;;  %v3565_v28 = vadd.f32 %v5203_v58, %v3564_v37  ;;  %v8861_v53 = vadd.f32 1e-09, %v1840_v9 }
 0x3d5   :  { %v2735_v32 = vmul.f32 %v2734_v8, %v8795_v35  ;;  %v1337_v10 = vmul.f32 %v5207_v5, %v8821_v3  ;;  %4471 = vst [vmem:[#allocation5 + $0x2b0] sm:$0xff] %v4358_v2  ;;  %v8863_v20 = vadd.f32 1e-09, %v1896_v42  ;;  %5212 = vrcp.f32 %v8843_v54 }
 0x3d6   :  { %v3569_v26 = vsel %vm8853_vm13, %v5203_v58, %v3565_v28  ;;  %v8868_v31 = vadd.f32 1e-09, %v652_v7  ;;  %vm1341_vm15 = vweird.f32 %v8821_v3  ;;  %vm8873_vm0 = vcmp.eq.f32.partialorder %v1345_v4, 8.507059e+37  ;;  %v8921_v7 = vpop.f32.mrf.mxu1 }
 0x3d7   :  { %5214 = vlog2.f32 %v2735_v32  ;;  %v1338_v14 = vsub.f32 1.0, %v1337_v10  ;;  %v3574_v35 = vsel %vm8836_vm11, %v3573_v30, %v3569_v26  ;;  %v1348_v0 = vor.u32 1.1754944e-38, %v1347_v6 }
 0x3d8   :  { %v3575_v61 = vmul.f32 %v3574_v35, %v8800_v55  ;;  %vm1342_vm1 = vweird.f32 %v5207_v5  ;;  %v8878_v24 = vadd.f32 1e-09, %v777_v49  ;;  %vm2741_vm2 = vweird.f32 %v8841_v29 }
 0x3d9   :  { %v5209_v27 = vpop.eup %5208  ;;  %v1339_v59 = vmul.f32 %v5207_v5, %v1338_v14  ;;  %v2745_v21 = vand.u32 2147483647, %v8841_v29  ;;  %v2747_v23 = vand.u32 2147483648, %v8841_v29  ;;  %vm3581_vm4 = vweird.f32 %v8843_v54  ;;  %vm1343_vm3 = vmor %vm1341_vm15, %vm1342_vm1 }
 0x3da   :  { %v5211_v45 = vpop.eup %5210  ;;  %5216 = vlog2.f32 %v3575_v61  ;;  %v3585_v55 = vand.u32 2147483647, %v8843_v54  ;;  %v1759_v42 = vmul.f32 0.6931472, %v5209_v27  ;;  %v3587_v56 = vand.u32 2147483648, %v8843_v54  ;;  %v1842_v61 = vld [vmem:[#allocation2 + $0x110] sm:$0xff] }
 0x3db   :  { %v1340_v50 = vadd.f32 %v5207_v5, %v1339_v59  ;;  %v2737_v33 = vmul.f32 %v5211_v45, %v8841_v29  ;;  %v5213_v9 = vpop.eup %5212  ;;  %5218 = vrcp.f32 %v8878_v24  ;;  %v2065_v12 = vsub.f32 1.0, %v1841_v57 }
 0x3dc   :  { %vm2742_vm12 = vweird.f32 %v5211_v45  ;;  %v3577_v40 = vmul.f32 %v5213_v9, %v8843_v54  ;;  %vm8893_vm5 = vcmp.eq.f32.partialorder %v2745_v21, 8.507059e+37  ;;  %v2748_v3 = vor.u32 1.1754944e-38, %v2747_v23 }
 0x3dd   :  { %v5215_v15 = vpop.eup %5214  ;;  %v1344_v1 = vsel %vm1343_vm3, %v5207_v5, %v1340_v50  ;;  %v2738_v51 = vsub.f32 1.0, %v2737_v33  ;;  %vm3582_vm6 = vweird.f32 %v5213_v9  ;;  %vm8900_vm8 = vmor %vm2741_vm2, %vm2742_vm12  ;;  %vm8904_vm7 = vcmp.eq.f32.partialorder %v3585_v55, 8.507059e+37  ;;  %v8958_v55 = vld [vmem:[#allocation2 + $0x2d0] sm:$0xff] }
 0x3de   :  { %v3999_v58 = vmul.f32 0.6931472, %v5215_v15  ;;  %v1349_v13 = vsel %vm8873_vm0, %v1348_v0, %v1344_v1  ;;  %v3578_v25 = vsub.f32 1.0, %v3577_v40  ;;  %v2121_v48 = vsub.f32 1.0, %v1897_v18  ;;  %vm8914_vm9 = vmor %vm3581_vm4, %vm3582_vm6 }
 0x3df   :  { %v1350_v44 = vmul.f32 %v1349_v13, %v8802_v41  ;;  %v2739_v62 = vmul.f32 %v5211_v45, %v2738_v51  ;;  %v8908_v36 = vadd.f32 1e-09, %v2065_v12  ;;  %v3588_v17 = vor.u32 1.1754944e-38, %v3587_v56 }
 0x3e0   :  { %v4191_v63 = vadd.f32 %v3999_v58, %v1759_v42  ;;  %v5217_v43 = vpop.eup %5216  ;;  %v3579_v41 = vmul.f32 %v5213_v9, %v3578_v25  ;;  %v8910_v34 = vadd.f32 1e-09, %v1841_v57  ;;  %v8918_v29 = vadd.f32 1e-09, %v2121_v48 }
 0x3e1   :  { %v2740_v22 = vadd.f32 %v5211_v45, %v2739_v62  ;;  %v5219_v38 = vpop.eup %5218  ;;  %v4111_v19 = vmul.f32 0.6931472, %v5217_v43  ;;  %5220 = vrcp.f32 %v8908_v36  ;;  %v1360_v2 = vand.u32 2147483647, %v8878_v24 }
 0x3e2   :  { %v4303_v11 = vmul.f32 -10.0, %v4191_v63  ;;  %5222 = vlog2.f32 %v1350_v44  ;;  %v3580_v37 = vadd.f32 %v5213_v9, %v3579_v41  ;;  %v1352_v4 = vmul.f32 %v5219_v38, %v8878_v24 }
 0x3e3   :  { %v2744_v52 = vsel %vm8900_vm8, %v5211_v45, %v2740_v22  ;;  %v4247_v5 = vadd.f32 %v4111_v19, %v1759_v42  ;;  %v1362_v8 = vand.u32 2147483648, %v8878_v24  ;;  %v778_v28 = vsub.f32 1.0, %v8921_v7 }
 0x3e4   :  { %4416 = vst.msk [vmem:[#allocation5 + $0xf8] sm:$0xff] %vm4385_vm14, %v4303_v11  ;;  %v2749_v54 = vsel %vm8893_vm5, %v2748_v3, %v2744_v52  ;;  %v3584_v6 = vsel %vm8914_vm9, %v5213_v9, %v3580_v37  ;;  %v1353_v32 = vsub.f32 1.0, %v1352_v4  ;;  %v2760_v26 = vand.u32 2147483647, %v8908_v36 }
 0x3e5   :  { %v2750_v60 = vmul.f32 %v2749_v54, %v8861_v53  ;;  %v4359_v10 = vmul.f32 -10.0, %v4247_v5  ;;  %v3589_v49 = vsel %vm8904_vm7, %v3588_v17, %v3584_v6  ;;  %5224 = vrcp.f32 %v8918_v29 }
 0x3e6   :  { %v3590_v14 = vmul.f32 %v3589_v49, %v8863_v20  ;;  %v1354_v35 = vmul.f32 %v5219_v38, %v1353_v32  ;;  %vm1357_vm10 = vweird.f32 %v5219_v38  ;;  %vm1356_vm11 = vweird.f32 %v8878_v24 }
 0x3e7   :  { %5226 = vlog2.f32 %v2750_v60  ;;  %v5221_v53 = vpop.eup %5220  ;;  %4472 = vst.msk [vmem:[#allocation5 + $0x2b8] sm:$0xff] %vm4385_vm14, %v4359_v10  ;;  %vm8942_vm13 = vcmp.eq.f32.partialorder %v1360_v2, 8.507059e+37  ;;  %v1363_v0 = vor.u32 1.1754944e-38, %v1362_v8  ;;  %v2762_v27 = vand.u32 2147483648, %v8908_v36  ;;  %vm1358_vm15 = vmor %vm1356_vm11, %vm1357_vm10 }
 0x3e8   :  { %v5223_v59 = vpop.eup %5222  ;;  %5228 = vlog2.f32 %v3590_v14  ;;  %v1355_v57 = vadd.f32 %v5219_v38, %v1354_v35  ;;  %v8947_v20 = vadd.f32 1e-09, %v1897_v18  ;;  %v2752_v45 = vmul.f32 %v5221_v53, %v8908_v36  ;;  %v9009_v14 = vld [vmem:[#allocation2 + $0x118] sm:$0xff] }
 0x3e9   :  { %vm2756_vm0 = vweird.f32 %v8908_v36  ;;  %vm8951_vm1 = vcmp.eq.f32.partialorder %v2760_v26, 8.507059e+37  ;;  %v3602_v21 = vand.u32 2147483648, %v8918_v29  ;;  %v8956_v23 = vadd.f32 1e-09, %v778_v28 }
 0x3ea   :  { %v1359_v50 = vsel %vm1358_vm15, %v5219_v38, %v1355_v57  ;;  %v2753_v33 = vsub.f32 1.0, %v2752_v45  ;;  %vm2757_vm2 = vweird.f32 %v5221_v53  ;;  %v2066_v9 = vsub.f32 1.0, %v1842_v61 }
 0x3eb   :  { %v5225_v42 = vpop.eup %5224  ;;  %v1761_v56 = vmul.f32 0.6931472, %v5223_v59  ;;  %v1364_v12 = vsel %vm8942_vm13, %v1363_v0, %v1359_v50  ;;  %v2763_v15 = vor.u32 1.1754944e-38, %v2762_v27  ;;  %5230 = vrcp.f32 %v8956_v23  ;;  %vm8968_vm3 = vmor %vm2756_vm0, %vm2757_vm2  ;;  %v1899_v0 = vld [vmem:[#allocation2 + $0x2d8] sm:$0xff] }
 0x3ec   :  { %v1365_v51 = vmul.f32 %v1364_v12, %v8868_v31  ;;  %v2754_v40 = vmul.f32 %v5221_v53, %v2753_v33  ;;  %v3592_v18 = vmul.f32 %v5225_v42, %v8918_v29  ;;  %vm3596_vm4 = vweird.f32 %v8918_v29 }
 0x3ed   :  { %v5227_v1 = vpop.eup %5226  ;;  %v3600_v16 = vand.u32 2147483647, %v8918_v29  ;;  %v3603_v3 = vor.u32 1.1754944e-38, %v3602_v21  ;;  %v2122_v44 = vsub.f32 1.0, %v8958_v55  ;;  %vm3597_vm12 = vweird.f32 %v5225_v42 }
 0x3ee   :  { %v4001_v58 = vmul.f32 0.6931472, %v5227_v1  ;;  %v5229_v62 = vpop.eup %5228  ;;  %v2755_v25 = vadd.f32 %v5221_v53, %v2754_v40  ;;  %v3593_v31 = vsub.f32 1.0, %v3592_v18  ;;  %v8974_v63 = vadd.f32 1e-09, %v2066_v9  ;;  %vm8986_vm5 = vmor %vm3596_vm4, %vm3597_vm12 }
 0x3ef   :  { %v4113_v46 = vmul.f32 0.6931472, %v5229_v62  ;;  %5232 = vlog2.f32 %v1365_v51  ;;  %v8976_v48 = vadd.f32 1e-09, %v2122_v44  ;;  %v1375_v22 = vand.u32 2147483647, %v8956_v23 }
 0x3f0   :  { %v4192_v47 = vadd.f32 %v4001_v58, %v1761_v56  ;;  %v2759_v36 = vsel %vm8968_vm3, %v5221_v53, %v2755_v25  ;;  %v3594_v43 = vmul.f32 %v5225_v42, %v3593_v31  ;;  %5234 = vrcp.f32 %v8974_v63 }
 0x3f1   :  { %v5231_v41 = vpop.eup %5230  ;;  %v4248_v17 = vadd.f32 %v4113_v46, %v1761_v56  ;;  %v2764_v19 = vsel %vm8951_vm1, %v2763_v15, %v2759_v36  ;;  %v1377_v30 = vand.u32 2147483648, %v8956_v23  ;;  %vm3601_vm6 = vcmp.eq.f32.partialorder %v3600_v16, 8.507059e+37 }
 0x3f2   :  { %v4304_v38 = vmul.f32 -10.0, %v4192_v47  ;;  %v2765_v52 = vmul.f32 %v2764_v19, %v8910_v34  ;;  %v3595_v37 = vadd.f32 %v5225_v42, %v3594_v43  ;;  %v1367_v4 = vmul.f32 %v5231_v41, %v8956_v23  ;;  %v9000_v34 = vpop.f32.mrf.mxu2 }
 0x3f3   :  { %v4360_v5 = vmul.f32 -10.0, %v4248_v17  ;;  %v722_v54 = vadd.f32 1e-09, %v8921_v7  ;;  %v8994_v2 = vadd.f32 1e-09, %v1842_v61  ;;  %5236 = vrcp.f32 %v8976_v48 }
 0x3f4   :  { %4417 = vst [vmem:[#allocation5 + $0x100] sm:$0xff] %v4304_v38  ;;  %v3599_v29 = vsel %vm8986_vm5, %v5225_v42, %v3595_v37  ;;  %5238 = vlog2.f32 %v2765_v52  ;;  %v1368_v8 = vsub.f32 1.0, %v1367_v4  ;;  %v2777_v60 = vand.u32 2147483648, %v8974_v63  ;;  %v9057_v4 = vpop.f32.mrf.mxu1 }
 0x3f5   :  { %v5233_v6 = vpop.eup %5232  ;;  %4473 = vst [vmem:[#allocation5 + $0x2c0] sm:$0xff] %v4360_v5  ;;  %v3604_v32 = vsel %vm3601_vm6, %v3603_v3, %v3599_v29  ;;  %vm1371_vm8 = vweird.f32 %v8956_v23  ;;  %vm9003_vm7 = vcmp.eq.f32.partialorder %v1375_v22, 8.507059e+37  ;;  %v1378_v28 = vor.u32 1.1754944e-38, %v1377_v30 }
 0x3f6   :  { %v5235_v10 = vpop.eup %5234  ;;  %v3605_v49 = vmul.f32 %v3604_v32, %v8947_v20  ;;  %v1369_v26 = vmul.f32 %v5231_v41, %v1368_v8  ;;  %vm1372_vm9 = vweird.f32 %v5231_v41  ;;  %vm2771_vm10 = vweird.f32 %v8974_v63 }
 0x3f7   :  { %v2767_v35 = vmul.f32 %v5235_v10, %v8974_v63  ;;  %v2775_v53 = vand.u32 2147483647, %v8974_v63  ;;  %vm3611_vm11 = vweird.f32 %v8976_v48  ;;  %v779_v39 = vsub.f32 1.0, %v9000_v34  ;;  %vm1373_vm13 = vmor %vm1371_vm8, %vm1372_vm9 }
 0x3f8   :  { %v1763_v27 = vmul.f32 0.6931472, %v5233_v6  ;;  %5240 = vlog2.f32 %v3605_v49  ;;  %v1370_v61 = vadd.f32 %v5231_v41, %v1369_v26  ;;  %v2778_v59 = vor.u32 1.1754944e-38, %v2777_v60  ;;  %v1844_v26 = vld [vmem:[#allocation2 + $0x120] sm:$0xff] }
 0x3f9   :  { %v5237_v57 = vpop.eup %5236  ;;  %v2768_v20 = vsub.f32 1.0, %v2767_v35  ;;  %vm2772_vm15 = vweird.f32 %v5235_v10  ;;  %v9017_v45 = vadd.f32 1e-09, %v779_v39  ;;  %v2067_v24 = vsub.f32 1.0, %v9009_v14 }
 0x3fa   :  { %v5239_v21 = vpop.eup %5238  ;;  %v1374_v50 = vsel %vm1373_vm13, %v5231_v41, %v1370_v61  ;;  %v3607_v33 = vmul.f32 %v5237_v57, %v8976_v48  ;;  %v3617_v9 = vand.u32 2147483648, %v8976_v48  ;;  %v2123_v42 = vsub.f32 1.0, %v1899_v0  ;;  %vm9027_vm0 = vmor %vm2771_vm10, %vm2772_vm15 }
 0x3fb   :  { %v4003_v56 = vmul.f32 0.6931472, %v5239_v21  ;;  %v1379_v12 = vsel %vm9003_vm7, %v1378_v28, %v1374_v50  ;;  %v2769_v15 = vmul.f32 %v5235_v10, %v2768_v20  ;;  %5242 = vrcp.f32 %v9017_v45  ;;  %v1900_v20 = vld [vmem:[#allocation2 + $0x2e0] sm:$0xff] }
 0x3fc   :  { %v1380_v23 = vmul.f32 %v1379_v12, %v722_v54  ;;  %v3608_v51 = vsub.f32 1.0, %v3607_v33  ;;  %vm3612_vm1 = vweird.f32 %v5237_v57  ;;  %v3615_v40 = vand.u32 2147483647, %v8976_v48 }
 0x3fd   :  { %v4193_v18 = vadd.f32 %v4003_v56, %v1763_v27  ;;  %v2770_v58 = vadd.f32 %v5235_v10, %v2769_v15  ;;  %vm2776_vm2 = vcmp.eq.f32.partialorder %v2775_v53, 8.507059e+37  ;;  %v9032_v13 = vadd.f32 1e-09, %v2067_v24  ;;  %vm9042_vm4 = vmor %vm3611_vm11, %vm3612_vm1 }
 0x3fe   :  { %v5241_v16 = vpop.eup %5240  ;;  %v2010_v3 = vadd.f32 1e-09, %v8958_v55  ;;  %v3609_v44 = vmul.f32 %v5237_v57, %v3608_v51  ;;  %v3618_v62 = vor.u32 1.1754944e-38, %v3617_v9  ;;  %v9035_v25 = vadd.f32 1e-09, %v2123_v42 }
 0x3ff   :  { %v4115_v31 = vmul.f32 0.6931472, %v5241_v16  ;;  %v4305_v63 = vmul.f32 -10.0, %v4193_v18  ;;  %5244 = vlog2.f32 %v1380_v23  ;;  %v2774_v46 = vsel %vm9027_vm0, %v5235_v10, %v2770_v58 }
 0x400   :  { %v2779_v36 = vsel %vm2776_vm2, %v2778_v59, %v2774_v46  ;;  %v3610_v43 = vadd.f32 %v5237_v57, %v3609_v44  ;;  %vm3616_vm3 = vcmp.eq.f32.partialorder %v3615_v40, 8.507059e+37  ;;  %5246 = vrcp.f32 %v9032_v13 }
 0x401   :  { %v5243_v55 = vpop.eup %5242  ;;  %v4249_v22 = vadd.f32 %v4115_v31, %v1763_v27  ;;  %4418 = vst.msk [vmem:[#allocation5 + $0x108] sm:$0xff] %vm4385_vm14, %v4305_v63  ;;  %v2780_v41 = vmul.f32 %v2779_v36, %v8994_v2  ;;  %v1390_v17 = vand.u32 2147483647, %v9017_v45  ;;  %v1392_v38 = vand.u32 2147483648, %v9017_v45 }
 0x402   :  { %v3614_v48 = vsel %vm9042_vm4, %v5237_v57, %v3610_v43  ;;  %v723_v19 = vadd.f32 1e-09, %v9000_v34  ;;  %v1382_v11 = vmul.f32 %v5243_v55, %v9017_v45  ;;  %5248 = vrcp.f32 %v9035_v25 }
 0x403   :  { %v4361_v30 = vmul.f32 -10.0, %v4249_v22  ;;  %v3619_v52 = vsel %vm3616_vm3, %v3618_v62, %v3614_v48  ;;  %5250 = vlog2.f32 %v2780_v41  ;;  %v2790_v37 = vand.u32 2147483647, %v9032_v13 }
 0x404   :  { %v3620_v5 = vmul.f32 %v3619_v52, %v2010_v3  ;;  %v1383_v54 = vsub.f32 1.0, %v1382_v11  ;;  %v9060_v2 = vadd.f32 1e-09, %v9009_v14  ;;  %v9062_v29 = vadd.f32 1e-09, %v1899_v0 }
 0x405   :  { %v5245_v8 = vpop.eup %5244  ;;  %4474 = vst.msk [vmem:[#allocation5 + $0x2c8] sm:$0xff] %vm4385_vm14, %v4361_v30  ;;  %vm1386_vm12 = vweird.f32 %v9017_v45  ;;  %vm9066_vm5 = vcmp.eq.f32.partialorder %v1390_v17, 8.507059e+37  ;;  %v1393_v34 = vor.u32 1.1754944e-38, %v1392_v38  ;;  %vm2786_vm6 = vweird.f32 %v9032_v13 }
 0x406   :  { %v5247_v6 = vpop.eup %5246  ;;  %5252 = vlog2.f32 %v3620_v5  ;;  %v1384_v32 = vmul.f32 %v5243_v55, %v1383_v54  ;;  %vm1387_vm8 = vweird.f32 %v5243_v55  ;;  %v780_v7 = vsub.f32 1.0, %v9057_v4  ;;  %v658_v5 = vpop.f32.mrf.mxu2 }
 0x407   :  { %v2782_v28 = vmul.f32 %v5247_v6, %v9032_v13  ;;  %vm9073_vm7 = vcmp.eq.f32.partialorder %v2790_v37, 8.507059e+37  ;;  %v2792_v49 = vand.u32 2147483648, %v9032_v13  ;;  %vm3626_vm9 = vweird.f32 %v9035_v25  ;;  %vm1388_vm10 = vmor %vm1386_vm12, %vm1387_vm8 }
 0x408   :  { %v5249_v14 = vpop.eup %5248  ;;  %v1765_v35 = vmul.f32 0.6931472, %v5245_v8  ;;  %v1385_v53 = vadd.f32 %v5243_v55, %v1384_v32  ;;  %v3630_v39 = vand.u32 2147483647, %v9035_v25  ;;  %v9080_v0 = vadd.f32 1e-09, %v780_v7 }
 0x409   :  { %v5251_v27 = vpop.eup %5250  ;;  %v2783_v61 = vsub.f32 1.0, %v2782_v28  ;;  %vm2787_vm11 = vweird.f32 %v5247_v6  ;;  %v3622_v59 = vmul.f32 %v5249_v14, %v9035_v25  ;;  %v3632_v57 = vand.u32 2147483648, %v9035_v25  ;;  %v1845_v7 = vld [vmem:[#allocation2 + $0x128] sm:$0xff] }
 0x40a   :  { %v4005_v24 = vmul.f32 0.6931472, %v5251_v27  ;;  %v1389_v21 = vsel %vm1388_vm10, %v5243_v55, %v1385_v53  ;;  %5254 = vrcp.f32 %v9080_v0  ;;  %v2068_v50 = vsub.f32 1.0, %v1844_v26  ;;  %vm9092_vm15 = vmor %vm2786_vm6, %vm2787_vm11 }
 0x40b   :  { %v1394_v33 = vsel %vm9066_vm5, %v1393_v34, %v1389_v21  ;;  %v2784_v9 = vmul.f32 %v5247_v6, %v2783_v61  ;;  %v3623_v42 = vsub.f32 1.0, %v3622_v59  ;;  %vm3627_vm13 = vweird.f32 %v5249_v14 }
 0x40c   :  { %v5253_v45 = vpop.eup %5252  ;;  %v4194_v56 = vadd.f32 %v4005_v24, %v1765_v35  ;;  %v1395_v12 = vmul.f32 %v1394_v33, %v723_v19  ;;  %v2793_v23 = vor.u32 1.1754944e-38, %v2792_v49  ;;  %v2124_v1 = vsub.f32 1.0, %v1900_v20  ;;  %vm9102_vm1 = vmor %vm3626_vm9, %vm3627_vm13 }
 0x40d   :  { %v4117_v51 = vmul.f32 0.6931472, %v5253_v45  ;;  %v2785_v40 = vadd.f32 %v5247_v6, %v2784_v9  ;;  %v3624_v18 = vmul.f32 %v5249_v14, %v3623_v42  ;;  %vm9096_vm0 = vcmp.eq.f32.partialorder %v3630_v39, 8.507059e+37 }
 0x40e   :  { %v4306_v16 = vmul.f32 -10.0, %v4194_v56  ;;  %v3633_v13 = vor.u32 1.1754944e-38, %v3632_v57  ;;  %v1405_v44 = vand.u32 2147483647, %v9080_v0  ;;  %v9107_v62 = vadd.f32 1e-09, %v2068_v50 }
 0x40f   :  { %v4250_v31 = vadd.f32 %v4117_v51, %v1765_v35  ;;  %5256 = vlog2.f32 %v1395_v12  ;;  %v2789_v63 = vsel %vm9092_vm15, %v5247_v6, %v2785_v40  ;;  %v3625_v46 = vadd.f32 %v5249_v14, %v3624_v18 }
 0x410   :  { %v5255_v47 = vpop.eup %5254  ;;  %4419 = vst [vmem:[#allocation5 + $0x110] sm:$0xff] %v4306_v16  ;;  %v2794_v25 = vsel %vm9073_vm7, %v2793_v23, %v2789_v63  ;;  %v1407_v36 = vand.u32 2147483648, %v9080_v0  ;;  %v9114_v43 = vadd.f32 1e-09, %v2124_v1  ;;  %5258 = vrcp.f32 %v9107_v62 }
 0x411   :  { %v4362_v55 = vmul.f32 -10.0, %v4250_v31  ;;  %v2795_v22 = vmul.f32 %v2794_v25, %v9060_v2  ;;  %v3629_v41 = vsel %vm9102_vm1, %v5249_v14, %v3625_v46  ;;  %v1397_v17 = vmul.f32 %v5255_v47, %v9080_v0  ;;  %v1901_v14 = vld [vmem:[#allocation2 + $0x2e8] sm:$0xff] }
 0x412   :  { %v3634_v38 = vsel %vm9096_vm0, %v3633_v13, %v3629_v41  ;;  %v724_v48 = vadd.f32 1e-09, %v9057_v4  ;;  %v9124_v19 = vadd.f32 1e-09, %v1844_v26  ;;  %v2805_v11 = vand.u32 2147483647, %v9107_v62  ;;  %v560_v13 = vpop.f32.mrf.mxu1 }
 0x413   :  { %4475 = vst [vmem:[#allocation5 + $0x2d0] sm:$0xff] %v4362_v55  ;;  %v3635_v30 = vmul.f32 %v3634_v38, %v9062_v29  ;;  %5260 = vlog2.f32 %v2795_v22  ;;  %v1398_v52 = vsub.f32 1.0, %v1397_v17  ;;  %v2807_v37 = vand.u32 2147483648, %v9107_v62 }
 0x414   :  { %vm1401_vm2 = vweird.f32 %v9080_v0  ;;  %vm9130_vm4 = vcmp.eq.f32.partialorder %v1405_v44, 8.507059e+37  ;;  %v9134_v2 = vadd.f32 1e-09, %v1900_v20  ;;  %5262 = vrcp.f32 %v9114_v43 }
 0x415   :  { %v5257_v4 = vpop.eup %5256  ;;  %5264 = vlog2.f32 %v3635_v30  ;;  %v1399_v8 = vmul.f32 %v5255_v47, %v1398_v52  ;;  %vm1402_vm3 = vweird.f32 %v5255_v47  ;;  %v1408_v29 = vor.u32 1.1754944e-38, %v1407_v36 }
 0x416   :  { %v5259_v60 = vpop.eup %5258  ;;  %vm2801_vm12 = vweird.f32 %v9107_v62  ;;  %vm9138_vm5 = vcmp.eq.f32.partialorder %v2805_v11, 8.507059e+37  ;;  %v3645_v6 = vand.u32 2147483647, %v9114_v43  ;;  %v781_v32 = vsub.f32 1.0, %v658_v5  ;;  %vm1403_vm6 = vmor %vm1401_vm2, %vm1402_vm3 }
 0x417   :  { %v1400_v28 = vadd.f32 %v5255_v47, %v1399_v8  ;;  %v2797_v10 = vmul.f32 %v5259_v60, %v9107_v62  ;;  %v2808_v49 = vor.u32 1.1754944e-38, %v2807_v37  ;;  %v3647_v26 = vand.u32 2147483648, %v9114_v43 }
 0x418   :  { %v1767_v35 = vmul.f32 0.6931472, %v5257_v4  ;;  %vm3641_vm8 = vweird.f32 %v9114_v43  ;;  %v9148_v53 = vadd.f32 1e-09, %v658_v5  ;;  %v9150_v39 = vadd.f32 1e-09, %v781_v32 }
 0x419   :  { %v5261_v27 = vpop.eup %5260  ;;  %v1404_v61 = vsel %vm1403_vm6, %v5255_v47, %v1400_v28  ;;  %v2798_v59 = vsub.f32 1.0, %v2797_v10  ;;  %vm2802_vm7 = vweird.f32 %v5259_v60  ;;  %v2069_v57 = vsub.f32 1.0, %v1845_v7 }
 0x41a   :  { %v5263_v20 = vpop.eup %5262  ;;  %v4007_v24 = vmul.f32 0.6931472, %v5261_v27  ;;  %v1409_v21 = vsel %vm9130_vm4, %v1408_v29, %v1404_v61  ;;  %vm9154_vm9 = vcmp.eq.f32.partialorder %v3645_v6, 8.507059e+37  ;;  %5266 = vrcp.f32 %v9150_v39  ;;  %vm9162_vm10 = vmor %vm2801_vm12, %vm2802_vm7 }
 0x41b   :  { %v5265_v0 = vpop.eup %5264  ;;  %v1410_v33 = vmul.f32 %v1409_v21, %v724_v48  ;;  %v2799_v9 = vmul.f32 %v5259_v60, %v2798_v59  ;;  %v3637_v42 = vmul.f32 %v5263_v20, %v9114_v43  ;;  %v2125_v45 = vsub.f32 1.0, %v1901_v14  ;;  %v1846_v48 = vld [vmem:[#allocation2 + $0x130] sm:$0xff] }
 0x41c   :  { %v4119_v56 = vmul.f32 0.6931472, %v5265_v0  ;;  %v4195_v12 = vadd.f32 %v4007_v24, %v1767_v35  ;;  %v3648_v23 = vor.u32 1.1754944e-38, %v3647_v26  ;;  %v9166_v1 = vadd.f32 1e-09, %v1845_v7  ;;  %v1902_v26 = vld [vmem:[#allocation2 + $0x2f0] sm:$0xff] }
 0x41d   :  { %v2800_v51 = vadd.f32 %v5259_v60, %v2799_v9  ;;  %v3638_v40 = vsub.f32 1.0, %v3637_v42  ;;  %vm3642_vm11 = vweird.f32 %v5263_v20  ;;  %v9168_v18 = vadd.f32 1e-09, %v2069_v57 }
 0x41e   :  { %v4251_v58 = vadd.f32 %v4119_v56, %v1767_v35  ;;  %v4307_v16 = vmul.f32 -10.0, %v4195_v12  ;;  %5268 = vlog2.f32 %v1410_v33  ;;  %v9170_v3 = vadd.f32 1e-09, %v1901_v14  ;;  %vm9183_vm13 = vmor %vm3641_vm8, %vm3642_vm11 }
 0x41f   :  { %v2804_v44 = vsel %vm9162_vm10, %v5259_v60, %v2800_v51  ;;  %v3639_v62 = vmul.f32 %v5263_v20, %v3638_v40  ;;  %v9174_v31 = vadd.f32 1e-09, %v2125_v45  ;;  %5270 = vrcp.f32 %v9168_v18  ;;  %v661_v51 = vpop.f32.mrf.mxu2 }
 0x420   :  { %v5267_v63 = vpop.eup %5266  ;;  %v4363_v46 = vmul.f32 -10.0, %v4251_v58  ;;  %4420 = vst.msk [vmem:[#allocation5 + $0x118] sm:$0xff] %vm4385_vm14, %v4307_v16  ;;  %v2809_v47 = vsel %vm9138_vm5, %v2808_v49, %v2804_v44  ;;  %v1420_v36 = vand.u32 2147483647, %v9150_v39  ;;  %v1422_v55 = vand.u32 2147483648, %v9150_v39 }
 0x421   :  { %v2810_v22 = vmul.f32 %v2809_v47, %v9124_v19  ;;  %v3640_v41 = vadd.f32 %v5263_v20, %v3639_v62  ;;  %v1412_v17 = vmul.f32 %v5267_v63, %v9150_v39  ;;  %v782_v38 = vsub.f32 1.0, %v560_v13 }
 0x422   :  { %4476 = vst.msk [vmem:[#allocation5 + $0x2d8] sm:$0xff] %vm4385_vm14, %v4363_v46  ;;  %5272 = vrcp.f32 %v9174_v31  ;;  %v9193_v43 = vadd.f32 1e-09, %v560_v13  ;;  %v9195_v11 = vadd.f32 1e-09, %v1846_v48  ;;  %vm1416_vm15 = vweird.f32 %v9150_v39 }
 0x423   :  { %v3644_v30 = vsel %vm9183_vm13, %v5263_v20, %v3640_v41  ;;  %5274 = vlog2.f32 %v2810_v22  ;;  %v1413_v52 = vsub.f32 1.0, %v1412_v17  ;;  %vm1417_vm0 = vweird.f32 %v5267_v63 }
 0x424   :  { %v5269_v19 = vpop.eup %5268  ;;  %v3649_v37 = vsel %vm9154_vm9, %v3648_v23, %v3644_v30  ;;  %vm9202_vm1 = vcmp.eq.f32.partialorder %v1420_v36, 8.507059e+37  ;;  %v1423_v54 = vor.u32 1.1754944e-38, %v1422_v55  ;;  %v2822_v60 = vand.u32 2147483648, %v9168_v18  ;;  %vm1418_vm3 = vmor %vm1416_vm15, %vm1417_vm0 }
 0x425   :  { %v5271_v4 = vpop.eup %5270  ;;  %v3650_v8 = vmul.f32 %v3649_v37, %v9134_v2  ;;  %v1414_v29 = vmul.f32 %v5267_v63, %v1413_v52  ;;  %v9208_v34 = vadd.f32 1e-09, %v782_v38  ;;  %vm2816_vm2 = vweird.f32 %v9168_v18 }
 0x426   :  { %v2812_v6 = vmul.f32 %v5271_v4, %v9168_v18  ;;  %v2820_v32 = vand.u32 2147483647, %v9168_v18  ;;  %vm3656_vm4 = vweird.f32 %v9174_v31  ;;  %v1769_v7 = vmul.f32 0.6931472, %v5269_v19 }
 0x427   :  { %5276 = vlog2.f32 %v3650_v8  ;;  %v1415_v28 = vadd.f32 %v5267_v63, %v1414_v29  ;;  %v3662_v10 = vand.u32 2147483648, %v9174_v31  ;;  %vm2817_vm12 = vweird.f32 %v5271_v4 }
 0x428   :  { %v5273_v49 = vpop.eup %5272  ;;  %v2813_v2 = vsub.f32 1.0, %v2812_v6  ;;  %5278 = vrcp.f32 %v9208_v34  ;;  %v2070_v14 = vsub.f32 1.0, %v1846_v48  ;;  %v2823_v61 = vor.u32 1.1754944e-38, %v2822_v60  ;;  %vm9226_vm6 = vmor %vm2816_vm2, %vm2817_vm12 }
 0x429   :  { %v5275_v35 = vpop.eup %5274  ;;  %v1419_v27 = vsel %vm1418_vm3, %v5267_v63, %v1415_v28  ;;  %v3652_v59 = vmul.f32 %v5273_v49, %v9174_v31  ;;  %v3660_v57 = vand.u32 2147483647, %v9174_v31  ;;  %vm3657_vm5 = vweird.f32 %v5273_v49  ;;  %v1847_v28 = vld [vmem:[#allocation2 + $0x138] sm:$0xff] }
 0x42a   :  { %v4009_v20 = vmul.f32 0.6931472, %v5275_v35  ;;  %v1424_v24 = vsel %vm9202_vm1, %v1423_v54, %v1419_v27  ;;  %v2814_v21 = vmul.f32 %v5271_v4, %v2813_v2  ;;  %v2126_v33 = vsub.f32 1.0, %v1902_v26  ;;  %vm9240_vm7 = vmor %vm3656_vm4, %vm3657_vm5 }
 0x42b   :  { %v1425_v39 = vmul.f32 %v1424_v24, %v9148_v53  ;;  %v3653_v0 = vsub.f32 1.0, %v3652_v59  ;;  %v9230_v9 = vadd.f32 1e-09, %v2070_v14  ;;  %vm2821_vm8 = vcmp.eq.f32.partialorder %v2820_v32, 8.507059e+37  ;;  %v1903_v14 = vld [vmem:[#allocation2 + $0x2f8] sm:$0xff] }
 0x42c   :  { %v4196_v42 = vadd.f32 %v4009_v20, %v1769_v7  ;;  %v2815_v45 = vadd.f32 %v5271_v4, %v2814_v21  ;;  %v3663_v56 = vor.u32 1.1754944e-38, %v3662_v10  ;;  %v1435_v23 = vand.u32 2147483647, %v9208_v34 }
 0x42d   :  { %v5277_v12 = vpop.eup %5276  ;;  %5280 = vlog2.f32 %v1425_v39  ;;  %v3654_v15 = vmul.f32 %v5273_v49, %v3653_v0  ;;  %v9233_v53 = vadd.f32 1e-09, %v2126_v33  ;;  %vm3661_vm9 = vcmp.eq.f32.partialorder %v3660_v57, 8.507059e+37 }
 0x42e   :  { %v5279_v40 = vpop.eup %5278  ;;  %v4121_v18 = vmul.f32 0.6931472, %v5277_v12  ;;  %v4308_v58 = vmul.f32 -10.0, %v4196_v42  ;;  %v2819_v16 = vsel %vm9226_vm6, %v5271_v4, %v2815_v45  ;;  %5282 = vrcp.f32 %v9230_v9 }
 0x42f   :  { %v2824_v44 = vsel %vm2821_vm8, %v2823_v61, %v2819_v16  ;;  %v3655_v62 = vadd.f32 %v5273_v49, %v3654_v15  ;;  %v1427_v63 = vmul.f32 %v5279_v40, %v9208_v34  ;;  %v1437_v25 = vand.u32 2147483648, %v9208_v34 }
 0x430   :  { %v4252_v46 = vadd.f32 %v4121_v18, %v1769_v7  ;;  %4421 = vst [vmem:[#allocation5 + $0x120] sm:$0xff] %v4308_v58  ;;  %v2825_v47 = vmul.f32 %v2824_v44, %v9166_v1  ;;  %v783_v36 = vsub.f32 1.0, %v661_v51  ;;  %v9250_v22 = vadd.f32 1e-09, %v1902_v26 }
 0x431   :  { %v3659_v31 = vsel %vm9240_vm7, %v5273_v49, %v3655_v62  ;;  %v1428_v55 = vsub.f32 1.0, %v1427_v63  ;;  %5284 = vrcp.f32 %v9233_v53  ;;  %vm9253_vm10 = vcmp.eq.f32.partialorder %v1435_v23, 8.507059e+37 }
 0x432   :  { %v4364_v41 = vmul.f32 -10.0, %v4252_v46  ;;  %v3664_v17 = vsel %vm3661_vm9, %v3663_v56, %v3659_v31  ;;  %5286 = vlog2.f32 %v2825_v47  ;;  %vm1432_vm11 = vweird.f32 %v5279_v40 }
 0x433   :  { %v5281_v48 = vpop.eup %5280  ;;  %v3665_v1 = vmul.f32 %v3664_v17, %v9170_v3  ;;  %v1429_v30 = vmul.f32 %v5279_v40, %v1428_v55  ;;  %v9258_v52 = vadd.f32 1e-09, %v661_v51  ;;  %vm1431_vm13 = vweird.f32 %v9208_v34 }
 0x434   :  { %v5283_v19 = vpop.eup %5282  ;;  %4477 = vst [vmem:[#allocation5 + $0x2e0] sm:$0xff] %v4364_v41  ;;  %v1438_v37 = vor.u32 1.1754944e-38, %v1437_v25  ;;  %v2835_v5 = vand.u32 2147483647, %v9230_v9  ;;  %v9262_v54 = vadd.f32 1e-09, %v783_v36  ;;  %vm1433_vm15 = vmor %vm1431_vm13, %vm1432_vm11  ;;  %vm2831_vm0 = vweird.f32 %v9230_v9 }
 0x435   :  { %5288 = vlog2.f32 %v3665_v1  ;;  %v1430_v4 = vadd.f32 %v5279_v40, %v1429_v30  ;;  %v2827_v8 = vmul.f32 %v5283_v19, %v9230_v9  ;;  %v2837_v29 = vand.u32 2147483648, %v9230_v9 }
 0x436   :  { %v1771_v3 = vmul.f32 0.6931472, %v5281_v48  ;;  %v3675_v60 = vand.u32 2147483647, %v9233_v53  ;;  %5290 = vrcp.f32 %v9262_v54  ;;  %vm2832_vm1 = vweird.f32 %v5283_v19  ;;  %v1848_v48 = vld [vmem:[#allocation2 + $0x140] sm:$0xff] }
 0x437   :  { %v5285_v34 = vpop.eup %5284  ;;  %v1434_v6 = vsel %vm1433_vm15, %v5279_v40, %v1430_v4  ;;  %v2828_v32 = vsub.f32 1.0, %v2827_v8  ;;  %v3677_v7 = vand.u32 2147483648, %v9233_v53  ;;  %vm9272_vm2 = vcmp.eq.f32.partialorder %v2835_v5, 8.507059e+37  ;;  %vm9281_vm3 = vmor %vm2831_vm0, %vm2832_vm1  ;;  %v1904_v4 = vld [vmem:[#allocation2 + $0x300] sm:$0xff] }
 0x438   :  { %v5287_v10 = vpop.eup %5286  ;;  %v1439_v49 = vsel %vm9253_vm10, %v1438_v37, %v1434_v6  ;;  %v3667_v26 = vmul.f32 %v5285_v34, %v9233_v53  ;;  %vm3671_vm4 = vweird.f32 %v9233_v53  ;;  %v2838_v59 = vor.u32 1.1754944e-38, %v2837_v29 }
 0x439   :  { %v4011_v35 = vmul.f32 0.6931472, %v5287_v10  ;;  %v1440_v27 = vmul.f32 %v1439_v49, %v9193_v43  ;;  %v2829_v61 = vmul.f32 %v5283_v19, %v2828_v32  ;;  %vm3672_vm12 = vweird.f32 %v5285_v34 }
 0x43a   :  { %v3668_v20 = vsub.f32 1.0, %v3667_v26  ;;  %vm9285_vm5 = vcmp.eq.f32.partialorder %v3675_v60, 8.507059e+37  ;;  %v2071_v21 = vsub.f32 1.0, %v1847_v28  ;;  %v3678_v33 = vor.u32 1.1754944e-38, %v3677_v7  ;;  %vm9296_vm6 = vmor %vm3671_vm4, %vm3672_vm12 }
 0x43b   :  { %v5289_v39 = vpop.eup %5288  ;;  %v4197_v50 = vadd.f32 %v4011_v35, %v1771_v3  ;;  %v2830_v0 = vadd.f32 %v5283_v19, %v2829_v61  ;;  %v2127_v43 = vsub.f32 1.0, %v1903_v14  ;;  %5292 = vlog2.f32 %v1440_v27 }
 0x43c   :  { %v5291_v42 = vpop.eup %5290  ;;  %v4123_v45 = vmul.f32 0.6931472, %v5289_v39  ;;  %v3669_v9 = vmul.f32 %v5285_v34, %v3668_v20  ;;  %v9289_v56 = vadd.f32 1e-09, %v2071_v21  ;;  %v1450_v40 = vand.u32 2147483647, %v9262_v54 }
 0x43d   :  { %v4309_v12 = vmul.f32 -10.0, %v4197_v50  ;;  %v2834_v15 = vsel %vm9281_vm3, %v5283_v19, %v2830_v0  ;;  %v1442_v51 = vmul.f32 %v5291_v42, %v9262_v54  ;;  %v1452_v13 = vand.u32 2147483648, %v9262_v54 }
 0x43e   :  { %v4253_v18 = vadd.f32 %v4123_v45, %v1771_v3  ;;  %v2839_v58 = vsel %vm9272_vm2, %v2838_v59, %v2834_v15  ;;  %v3670_v16 = vadd.f32 %v5285_v34, %v3669_v9  ;;  %v9307_v62 = vadd.f32 1e-09, %v2127_v43 }
 0x43f   :  { %4422 = vst.msk [vmem:[#allocation5 + $0x128] sm:$0xff] %vm4385_vm14, %v4309_v12  ;;  %v2840_v44 = vmul.f32 %v2839_v58, %v9195_v11  ;;  %v1443_v53 = vsub.f32 1.0, %v1442_v51  ;;  %5294 = vrcp.f32 %v9289_v56  ;;  %vm1446_vm8 = vweird.f32 %v9262_v54  ;;  %v563_v11 = vpop.f32.mrf.mxu1 }
 0x440   :  { %v4365_v63 = vmul.f32 -10.0, %v4253_v18  ;;  %v3674_v46 = vsel %vm9296_vm6, %v5285_v34, %v3670_v16  ;;  %vm1447_vm7 = vweird.f32 %v5291_v42  ;;  %v2850_v36 = vand.u32 2147483647, %v9289_v56 }
 0x441   :  { %v3679_v47 = vsel %vm9285_vm5, %v3678_v33, %v3674_v46  ;;  %5296 = vlog2.f32 %v2840_v44  ;;  %v1444_v25 = vmul.f32 %v5291_v42, %v1443_v53  ;;  %v5293_v31 = vpop.eup %5292  ;;  %vm9318_vm9 = vcmp.eq.f32.partialorder %v1450_v40, 8.507059e+37  ;;  %vm9331_vm10 = vmor %vm1446_vm8, %vm1447_vm7 }
 0x442   :  { %4478 = vst.msk [vmem:[#allocation5 + $0x2e8] sm:$0xff] %vm4385_vm14, %v4365_v63  ;;  %v3680_v55 = vmul.f32 %v3679_v47, %v9250_v22  ;;  %v9322_v17 = vadd.f32 1e-09, %v1847_v28  ;;  %v2852_v38 = vand.u32 2147483648, %v9289_v56  ;;  %v1453_v30 = vor.u32 1.1754944e-38, %v1452_v13  ;;  %v9395_v47 = vpop.f32.mrf.mxu2 }
 0x443   :  { %v1445_v1 = vadd.f32 %v5291_v42, %v1444_v25  ;;  %v9325_v19 = vadd.f32 1e-09, %v1903_v14  ;;  %5298 = vrcp.f32 %v9307_v62  ;;  %vm2846_vm11 = vweird.f32 %v9289_v56 }
 0x444   :  { %5300 = vlog2.f32 %v3680_v55  ;;  %v9336_v37 = vadd.f32 1e-09, %v563_v11  ;;  %v784_v5 = vsub.f32 1.0, %v563_v11  ;;  %v1773_v29 = vmul.f32 0.6931472, %v5293_v31 }
 0x445   :  { %v5295_v8 = vpop.eup %5294  ;;  %v1449_v3 = vsel %vm9331_vm10, %v5291_v42, %v1445_v1  ;;  %vm9340_vm13 = vcmp.eq.f32.partialorder %v2850_v36, 8.507059e+37  ;;  %v2072_v54 = vsub.f32 1.0, %v1848_v48  ;;  %v2853_v6 = vor.u32 1.1754944e-38, %v2852_v38 }
 0x446   :  { %v2842_v34 = vmul.f32 %v5295_v8, %v9289_v56  ;;  %v3690_v32 = vand.u32 2147483647, %v9307_v62  ;;  %v9346_v7 = vadd.f32 1e-09, %v784_v5  ;;  %v1454_v10 = vsel %vm9318_vm9, %v1453_v30, %v1449_v3  ;;  %v9407_v30 = vld [vmem:[#allocation2 + $0x148] sm:$0xff] }
 0x447   :  { %v5297_v28 = vpop.eup %5296  ;;  %v3692_v49 = vand.u32 2147483648, %v9307_v62  ;;  %v2128_v2 = vsub.f32 1.0, %v1904_v4  ;;  %v9351_v26 = vadd.f32 1e-09, %v2072_v54  ;;  %vm2847_vm15 = vweird.f32 %v5295_v8 }
 0x448   :  { %v4013_v14 = vmul.f32 0.6931472, %v5297_v28  ;;  %v2843_v35 = vsub.f32 1.0, %v2842_v34  ;;  %5302 = vrcp.f32 %v9346_v7  ;;  %vm3686_vm0 = vweird.f32 %v9307_v62  ;;  %vm9365_vm1 = vmor %vm2846_vm11, %vm2847_vm15 }
 0x449   :  { %v5299_v27 = vpop.eup %5298  ;;  %v9355_v61 = vadd.f32 1e-09, %v1848_v48  ;;  %v9357_v59 = vadd.f32 1e-09, %v1904_v4  ;;  %v9359_v57 = vadd.f32 1e-09, %v2128_v2  ;;  %v1455_v21 = vmul.f32 %v1454_v10, %v9258_v52 }
 0x44a   :  { %v5301_v20 = vpop.eup %5300  ;;  %v4198_v24 = vadd.f32 %v4013_v14, %v1773_v29  ;;  %v2844_v39 = vmul.f32 %v5295_v8, %v2843_v35  ;;  %v3682_v50 = vmul.f32 %v5299_v27, %v9307_v62  ;;  %v1465_v43 = vand.u32 2147483647, %v9346_v7 }
 0x44b   :  { %v4125_v0 = vmul.f32 0.6931472, %v5301_v20  ;;  %v1467_v42 = vand.u32 2147483648, %v9346_v7  ;;  %5304 = vrcp.f32 %v9351_v26  ;;  %vm3687_vm2 = vweird.f32 %v5299_v27 }
 0x44c   :  { %v4310_v45 = vmul.f32 -10.0, %v4198_v24  ;;  %v2845_v9 = vadd.f32 %v5295_v8, %v2844_v39  ;;  %v3683_v12 = vsub.f32 1.0, %v3682_v50  ;;  %vm9372_vm4 = vcmp.eq.f32.partialorder %v3690_v32, 8.507059e+37  ;;  %vm9384_vm12 = vmor %vm3686_vm0, %vm3687_vm2 }
 0x44d   :  { %v4254_v52 = vadd.f32 %v4125_v0, %v1773_v29  ;;  %v3693_v56 = vor.u32 1.1754944e-38, %v3692_v49  ;;  %5306 = vrcp.f32 %v9359_v57  ;;  %vm1461_vm3 = vweird.f32 %v9346_v7 }
 0x44e   :  { %v5303_v23 = vpop.eup %5302  ;;  %4423 = vst [vmem:[#allocation5 + $0x130] sm:$0xff] %v4310_v45  ;;  %5308 = vlog2.f32 %v1455_v21  ;;  %v2849_v51 = vsel %vm9365_vm1, %v5295_v8, %v2845_v9  ;;  %v3684_v40 = vmul.f32 %v5299_v27, %v3683_v12  ;;  %vm9389_vm5 = vcmp.eq.f32.partialorder %v1465_v43, 8.507059e+37 }
 0x44f   :  { %v4366_v18 = vmul.f32 -10.0, %v4254_v52  ;;  %v2854_v58 = vsel %vm9340_vm13, %v2853_v6, %v2849_v51  ;;  %v1457_v13 = vmul.f32 %v5303_v23, %v9346_v7  ;;  %v1468_v46 = vor.u32 1.1754944e-38, %v1467_v42  ;;  %v9416_v6 = vld [vmem:[#allocation2 + $0x308] sm:$0xff] }
 0x450   :  { %v2855_v53 = vmul.f32 %v2854_v58, %v9322_v17  ;;  %v3685_v63 = vadd.f32 %v5299_v27, %v3684_v40  ;;  %vm2861_vm6 = vweird.f32 %v9351_v26  ;;  %v2865_v36 = vand.u32 2147483647, %v9351_v26 }
 0x451   :  { %v5305_v25 = vpop.eup %5304  ;;  %4479 = vst [vmem:[#allocation5 + $0x2f0] sm:$0xff] %v4366_v18  ;;  %v1458_v62 = vsub.f32 1.0, %v1457_v13  ;;  %v2867_v11 = vand.u32 2147483648, %v9351_v26  ;;  %vm3701_vm8 = vweird.f32 %v9359_v57  ;;  %v3705_v41 = vand.u32 2147483647, %v9359_v57 }
 0x452   :  { %v3689_v31 = vsel %vm9384_vm12, %v5299_v27, %v3685_v63  ;;  %5310 = vlog2.f32 %v2855_v53  ;;  %v2857_v55 = vmul.f32 %v5305_v25, %v9351_v26  ;;  %vm1462_vm7 = vweird.f32 %v5303_v23 }
 0x453   :  { %v5307_v17 = vpop.eup %5306  ;;  %v3694_v38 = vsel %vm9372_vm4, %v3693_v56, %v3689_v31  ;;  %v1459_v48 = vmul.f32 %v5303_v23, %v1458_v62  ;;  %v785_v1 = vsub.f32 1.0, %v9395_v47  ;;  %vm2862_vm9 = vweird.f32 %v5305_v25  ;;  %vm1463_vm11 = vmor %vm1461_vm3, %vm1462_vm7 }
 0x454   :  { %v5309_v22 = vpop.eup %5308  ;;  %v3695_v5 = vmul.f32 %v3694_v38, %v9325_v19  ;;  %v2858_v4 = vsub.f32 1.0, %v2857_v55  ;;  %v3697_v8 = vmul.f32 %v5307_v17, %v9359_v57  ;;  %vm3702_vm10 = vweird.f32 %v5307_v17  ;;  %vm9421_vm13 = vmor %vm2861_vm6, %vm2862_vm9 }
 0x455   :  { %v1460_v29 = vadd.f32 %v5303_v23, %v1459_v48  ;;  %v3707_v3 = vand.u32 2147483648, %v9359_v57  ;;  %v9412_v60 = vadd.f32 1e-09, %v785_v1  ;;  %v2073_v19 = vsub.f32 1.0, %v9407_v30  ;;  %vm9432_vm0 = vmor %vm3701_vm8, %vm3702_vm10 }
 0x456   :  { %5312 = vlog2.f32 %v3695_v5  ;;  %v2859_v54 = vmul.f32 %v5305_v25, %v2858_v4  ;;  %v3698_v34 = vsub.f32 1.0, %v3697_v8  ;;  %v1775_v32 = vmul.f32 0.6931472, %v5309_v22 }
 0x457   :  { %v1464_v28 = vsel %vm1463_vm11, %v5303_v23, %v1460_v29  ;;  %v2868_v49 = vor.u32 1.1754944e-38, %v2867_v11  ;;  %5314 = vrcp.f32 %v9412_v60  ;;  %vm2866_vm15 = vcmp.eq.f32.partialorder %v2865_v36, 8.507059e+37 }
 0x458   :  { %v5311_v2 = vpop.eup %5310  ;;  %v1469_v7 = vsel %vm9389_vm5, %v1468_v46, %v1464_v28  ;;  %v2860_v14 = vadd.f32 %v5305_v25, %v2859_v54  ;;  %v3699_v35 = vmul.f32 %v5307_v17, %v3698_v34  ;;  %v3708_v24 = vor.u32 1.1754944e-38, %v3707_v3 }
 0x459   :  { %v4015_v27 = vmul.f32 0.6931472, %v5311_v2  ;;  %v1470_v20 = vmul.f32 %v1469_v7, %v9336_v37  ;;  %v2129_v21 = vsub.f32 1.0, %v9416_v6  ;;  %vm3706_vm1 = vcmp.eq.f32.partialorder %v3705_v41, 8.507059e+37 }
 0x45a   :  { %v2864_v39 = vsel %vm9421_vm13, %v5305_v25, %v2860_v14  ;;  %v3700_v50 = vadd.f32 %v5307_v17, %v3699_v35  ;;  %v9439_v0 = vadd.f32 1e-09, %v2073_v19  ;;  %v1480_v40 = vand.u32 2147483647, %v9412_v60 }
 0x45b   :  { %v4199_v33 = vadd.f32 %v4015_v27, %v1775_v32  ;;  %5316 = vlog2.f32 %v1470_v20  ;;  %v2869_v37 = vsel %vm2866_vm15, %v2868_v49, %v2864_v39  ;;  %v9441_v43 = vadd.f32 1e-09, %v2129_v21 }
 0x45c   :  { %v5313_v57 = vpop.eup %5312  ;;  %v2870_v42 = vmul.f32 %v2869_v37, %v9355_v61  ;;  %v3704_v45 = vsel %vm9432_vm0, %v5307_v17, %v3700_v50  ;;  %5318 = vrcp.f32 %v9439_v0  ;;  %v1482_v61 = vand.u32 2147483648, %v9412_v60 }
 0x45d   :  { %v5315_v9 = vpop.eup %5314  ;;  %v4127_v12 = vmul.f32 0.6931472, %v5313_v57  ;;  %v4311_v52 = vmul.f32 -10.0, %v4199_v33  ;;  %v3709_v15 = vsel %vm3706_vm1, %v3708_v24, %v3704_v45  ;;  %v729_v13 = vadd.f32 1e-09, %v9395_v47 }
 0x45e   :  { %v3710_v56 = vmul.f32 %v3709_v15, %v9357_v59  ;;  %5320 = vlog2.f32 %v2870_v42  ;;  %v1472_v23 = vmul.f32 %v5315_v9, %v9412_v60  ;;  %vm1476_vm2 = vweird.f32 %v9412_v60 }
 0x45f   :  { %v4255_v51 = vadd.f32 %v4127_v12, %v1775_v32  ;;  %4424 = vst.msk [vmem:[#allocation5 + $0x138] sm:$0xff] %vm4385_vm14, %v4311_v52  ;;  %5322 = vrcp.f32 %v9441_v43  ;;  %vm1477_vm4 = vweird.f32 %v5315_v9  ;;  %v1961_v53 = vadd.f32 1e-09, %v9407_v30 }
 0x460   :  { %5324 = vlog2.f32 %v3710_v56  ;;  %v1473_v18 = vsub.f32 1.0, %v1472_v23  ;;  %vm9457_vm3 = vcmp.eq.f32.partialorder %v1480_v40, 8.507059e+37  ;;  %v1483_v25 = vor.u32 1.1754944e-38, %v1482_v61  ;;  %vm1478_vm5 = vmor %vm1476_vm2, %vm1477_vm4 }
 0x461   :  { %v5317_v58 = vpop.eup %5316  ;;  %v4367_v16 = vmul.f32 -10.0, %v4255_v51  ;;  %vm2876_vm12 = vweird.f32 %v9439_v0  ;;  %v2880_v47 = vand.u32 2147483647, %v9439_v0  ;;  %v2882_v31 = vand.u32 2147483648, %v9439_v0 }
 0x462   :  { %v5319_v44 = vpop.eup %5318  ;;  %v1474_v59 = vmul.f32 %v5315_v9, %v1473_v18  ;;  %v1777_v63 = vmul.f32 0.6931472, %v5317_v58  ;;  %vm3716_vm8 = vweird.f32 %v9441_v43  ;;  %v3720_v30 = vand.u32 2147483647, %v9441_v43 }
 0x463   :  { %4480 = vst.msk [vmem:[#allocation5 + $0x2f8] sm:$0xff] %vm4385_vm14, %v4367_v16  ;;  %v2872_v62 = vmul.f32 %v5319_v44, %v9439_v0  ;;  %vm2877_vm6 = vweird.f32 %v5319_v44  ;;  %v3722_v22 = vand.u32 2147483648, %v9441_v43  ;;  %v2883_v54 = vor.u32 1.1754944e-38, %v2882_v31 }
 0x464   :  { %v5321_v36 = vpop.eup %5320  ;;  %v1475_v11 = vadd.f32 %v5315_v9, %v1474_v59  ;;  %vm9475_vm7 = vmor %vm2876_vm12, %vm2877_vm6  ;;  %vm2881_vm10 = vcmp.eq.f32.partialorder %v2880_v47, 8.507059e+37  ;;  %v2017_v14 = vadd.f32 1e-09, %v9416_v6  ;;  %vm3721_vm13 = vcmp.eq.f32.partialorder %v3720_v30, 8.507059e+37 }
 0x465   :  { %v5323_v55 = vpop.eup %5322  ;;  %v4017_v41 = vmul.f32 0.6931472, %v5321_v36  ;;  %v2873_v17 = vsub.f32 1.0, %v2872_v62  ;;  %v3723_v7 = vor.u32 1.1754944e-38, %v3722_v22 }
 0x466   :  { %v5325_v38 = vpop.eup %5324  ;;  %v1479_v48 = vsel %vm1478_vm5, %v5315_v9, %v1475_v11  ;;  %v3712_v1 = vmul.f32 %v5323_v55, %v9441_v43  ;;  %vm3717_vm9 = vweird.f32 %v5323_v55 }
 0x467   :  { %v4129_v5 = vmul.f32 0.6931472, %v5325_v38  ;;  %v4200_v4 = vadd.f32 %v4017_v41, %v1777_v63  ;;  %v1484_v8 = vsel %vm9457_vm3, %v1483_v25, %v1479_v48  ;;  %v2874_v29 = vmul.f32 %v5319_v44, %v2873_v17  ;;  %vm3718_vm11 = vmor %vm3716_vm8, %vm3717_vm9 }
 0x468   :  { %v1485_v3 = vmul.f32 %v1484_v8, %v729_v13  ;;  %v3713_v34 = vsub.f32 1.0, %v3712_v1 }
 0x469   :  { %v4256_v19 = vadd.f32 %v4129_v5, %v1777_v63  ;;  %v4312_v32 = vmul.f32 -10.0, %v4200_v4  ;;  %v2875_v28 = vadd.f32 %v5319_v44, %v2874_v29 }
 0x46a   :  { %v3714_v10 = vmul.f32 %v5323_v55, %v3713_v34  ;;  %5326 = vlog2.f32 %v1485_v3 }
 0x46b   :  { %v4368_v49 = vmul.f32 -10.0, %v4256_v19  ;;  %4425 = vst [vmem:[#allocation5 + $0x140] sm:$0xff] %v4312_v32  ;;  %v2879_v2 = vsel %vm9475_vm7, %v5319_v44, %v2875_v28 }
 0x46c   :  { %v2884_v35 = vsel %vm2881_vm10, %v2883_v54, %v2879_v2  ;;  %v3715_v27 = vadd.f32 %v5323_v55, %v3714_v10 }
 0x46d   :  { %4481 = vst [vmem:[#allocation5 + $0x300] sm:$0xff] %v4368_v49  ;;  %v2885_v20 = vmul.f32 %v2884_v35, %v1961_v53 }
 0x46e   :  { %v3719_v26 = vsel %vm3718_vm11, %v5323_v55, %v3715_v27 }
 0x46f   :  { %v3724_v24 = vsel %vm3721_vm13, %v3723_v7, %v3719_v26  ;;  %5328 = vlog2.f32 %v2885_v20 }
 0x470   :  { %v3725_v21 = vmul.f32 %v3724_v24, %v2017_v14  ;;  %v5327_v39 = vpop.eup %5326 }
 0x471   :  { %v1779_v50 = vmul.f32 0.6931472, %v5327_v39 }
 0x472   :  { %5330 = vlog2.f32 %v3725_v21 }
 0x475   :  { %v5329_v0 = vpop.eup %5328 }
 0x476   :  { %v4019_v33 = vmul.f32 0.6931472, %v5329_v0 }
 0x478   :  { %v5331_v37 = vpop.eup %5330  ;;  %v4201_v43 = vadd.f32 %v4019_v33, %v1779_v50 }
 0x479   :  { %v4131_v57 = vmul.f32 0.6931472, %v5331_v37 }
 0x47a   :  { %v4313_v42 = vmul.f32 -10.0, %v4201_v43 }
 0x47b   :  { %v4257_v6 = vadd.f32 %v4131_v57, %v1779_v50 }
 0x47c   :  { %4426 = vst.msk [vmem:[#allocation5 + $0x148] sm:$0xff] %vm4385_vm14, %v4313_v42 }
 0x47d   :  { %v4369_v45 = vmul.f32 -10.0, %v4257_v6 }
 0x47f   :  { %4482 = vst.msk [vmem:[#allocation5 + $0x308] sm:$0xff] %vm4385_vm14, %v4369_v45 }
 0x480   :  { %4509 = dma.vmem_to_hbm [thread:$0]  %s4502_s13, 14336, %s4504_s16, [#allocation4], %s5385_s20, %s5385_s20, %s5386_s21  }
 0x481   :  { %5382 = dma.done.wait [#allocation4], 14336  }
 0x482   :  { %5383 = vsyncadd [#allocation4], 4294952960 }
 0x483   :  { %4514 = vsyncpa [#allocation3], 1 }
 0x484   :  { %4515 = vsyncpa [#allocation4], 1 }

</bundles_post_ra>
